<compile_context>
chip_gen: v7x
topology: tpu7x:2x2x1
jax: 0.10.0
libtpu: 0.0.40
codegen_flags: <defaults>
</compile_context>

<pallas_src>
import inspect

import jax
import jax.numpy as jnp
from jax import lax
from jax.experimental import pallas as pl
from jax.experimental.pallas import tpu as pltpu


def _round_up(x, m):
    return (x + m - 1) // m * m


def _physical_vmem_bytes():
    """Per-core physical VMEM (64 MiB on v7x, 128 MiB on v5e/v6e)."""
    try:
        return int(pltpu.get_tpu_info().vmem_capacity_bytes)
    except Exception:
        return 64 * 2**20  # conservative fallback (v7x-sized)


def _has_pipeline_mode():
    try:
        return (hasattr(pl, "Buffered")
                and "pipeline_mode" in inspect.signature(pl.BlockSpec).parameters)
    except (TypeError, ValueError):
        return False


_HAS_PIPELINE_MODE = _has_pipeline_mode()


def make_fused_mlp_kernel(n1, n2, batch_tile, true_batch, h_pad, compute_dtype,
                          needs_row_mask):
    """Ref order: x, w_layer0_fused, b_layer0_fused,
                  w1[1:], b1[1:], w2[1:], b2[1:], out1_partial, out2."""
    t1, t2 = n1 - 1, n2 - 1

    def kernel(*refs):
        i = 0
        x_ref = refs[i]; i += 1
        wf_ref = refs[i]; bf_ref = refs[i + 1]; i += 2
        w1 = refs[i:i + t1]; i += t1
        b1 = refs[i:i + t1]; i += t1
        w2 = refs[i:i + t2]; i += t2
        b2 = refs[i:i + t2]; i += t2
        out1_ref = refs[i]      # (1, 1, d1_pad) per-tile masked partial sum
        out2_ref = refs[i + 1]  # (batch_tile, d2_pad)

        x = x_ref[...]          # (bt, d_in_pad), already bf16

        # Layer 0 of BOTH heads fused into one MXU matmul (shared LHS,
        # weights concatenated along N), then split at the 128-aligned column.
        h0 = jnp.dot(x, wf_ref[...], preferred_element_type=jnp.float32)
        h0 = jnp.maximum(h0 + bf_ref[...], 0.0)
        h_a = h0[:, :h_pad].astype(compute_dtype)
        h_b = h0[:, h_pad:].astype(compute_dtype)

        def run_tail(h, ws, bs):
            n = len(ws)
            for k in range(n):
                acc = jnp.dot(h, ws[k][...], preferred_element_type=jnp.float32)
                acc = acc + bs[k][...]            # (1, d) f32 bias broadcast
                if k < n - 1:
                    h = jnp.maximum(acc, 0.0).astype(compute_dtype)
                else:
                    h = acc                        # last layer: no ReLU, keep f32
            return h

        h1 = run_tail(h_a, w1, b1)   # (bt, d1_pad) f32
        h2 = run_tail(h_b, w2, b2)   # (bt, d2_pad) f32

        # head-1 batch partial-sum as a (1,bt)@(bt,d1) ones-row MXU matmul;
        # the ones row is zeroed on padded batch rows (only the last tile has any).
        if needs_row_mask:
            col = lax.broadcasted_iota(jnp.int32, (1, batch_tile), 1)
            ones_row = ((col + pl.program_id(0) * batch_tile)
                        < true_batch).astype(jnp.float32)
        else:
            ones_row = jnp.ones((1, batch_tile), jnp.float32)
        partial = jnp.dot(ones_row, h1, preferred_element_type=jnp.float32)

        out1_ref[...] = partial[None]    # (1, 1, d1_pad)
        out2_ref[...] = h2

    return kernel


def mlp_self_forward(x, params, *, compute_dtype=jnp.bfloat16):
    """Fused forward of MLP_self: returns (out1.mean(axis=0), out2)."""
    (w1, b1), (w2, b2) = params
    n1, n2 = len(w1), len(w2)
    batch, num_i = x.shape
    num_o = w1[-1].shape[1]

    # ---- padded geometry (lane-dense features, sublane-aligned batch) -----
    dims1 = [w1[0].shape[0]] + [w.shape[1] for w in w1]
    dims2 = [w2[0].shape[0]] + [w.shape[1] for w in w2]
    pdims1 = [_round_up(d, 128) for d in dims1]
    pdims2 = [_round_up(d, 128) for d in dims2]
    assert pdims1[0] == pdims2[0] and pdims1[1] == pdims2[1], \
        "both heads share the input and first hidden width in MLP_self"
    d_in_pad = pdims1[0]
    h_pad = pdims1[1]
    d1_pad = pdims1[-1]
    d2_pad = pdims2[-1]
    wbytes = jnp.dtype(compute_dtype).itemsize

    # ---- per-generation VMEM budget ----------------------------------------
    phys_vmem = _physical_vmem_bytes()
    vmem_cap = int(phys_vmem * 0.78)   # ~50 MiB on v7x, ~100 MiB on v5e/v6e

    def resident_bytes(buf_factor):
        wsum = (sum(a * b for a, b in zip(pdims1[:-1], pdims1[1:]))
                + sum(a * b for a, b in zip(pdims2[:-1], pdims2[1:])))
        bsum = sum(pdims1[1:]) + sum(pdims2[1:])
        return buf_factor * (wsum * wbytes + bsum * 4)

    max_act = max(max(pdims1), max(pdims2), 2 * h_pad)

    def tile_bytes(bt):
        io = 2 * bt * d_in_pad * wbytes + 2 * bt * d2_pad * 4 + 2 * d1_pad * 4
        act = 3 * bt * max_act * 4          # f32 accum + bf16 copies, with margin
        return io + act

    buf_factor = 1 if _HAS_PIPELINE_MODE else 2

    # ---- batch tile: minimize padded work, fit VMEM, >=2 tiles if possible --
    b8 = _round_up(max(batch, 1), 8)
    cands = [c for c in (512, 256, 128, 64) if c <= b8] or [b8]
    feas = [c for c in cands
            if resident_bytes(buf_factor) + tile_bytes(c) <= vmem_cap] or [min(cands)]
    bt = min(feas, key=lambda c: (_round_up(batch, c), -c))
    b_pad = _round_up(batch, bt)
    num_tiles = b_pad // bt
    if num_tiles == 1 and batch >= 16:
        # give the ("parallel",) grid axis >= 2 steps so both v7x TCs get work
        bt = _round_up((batch + 1) // 2, 8)
        b_pad = _round_up(batch, bt)
        num_tiles = b_pad // bt

    # TODO(synk): when resident_bytes(1) alone exceeds vmem_cap (huge num_h,
    # e.g. the 4h x 8h / 8h x 4h layers at num_h >= ~512 on v7x), stream those
    # layers' weights over K/N with pltpu.emit_pipeline instead of holding them.

    # ---- zero-padded operands (padded rows/cols stay identically 0) --------
    def pad_w(w, ip, op):
        return jnp.zeros((ip, op), compute_dtype).at[:w.shape[0], :w.shape[1]].set(
            w.astype(compute_dtype))

    def pad_b(b, op):
        return jnp.zeros((1, op), jnp.float32).at[0, :b.shape[0]].set(
            b.astype(jnp.float32))

    # layer 0 of both heads, fused along N
    wf = jnp.concatenate([pad_w(w1[0], d_in_pad, h_pad),
                          pad_w(w2[0], d_in_pad, h_pad)], axis=1)
    bf = jnp.concatenate([pad_b(b1[0], h_pad), pad_b(b2[0], h_pad)], axis=1)
    w1p = [pad_w(w, pdims1[i + 1], pdims1[i + 2]) for i, w in enumerate(w1[1:])]
    b1p = [pad_b(b, pdims1[i + 2]) for i, b in enumerate(b1[1:])]
    w2p = [pad_w(w, pdims2[i + 1], pdims2[i + 2]) for i, w in enumerate(w2[1:])]
    b2p = [pad_b(b, pdims2[i + 2]) for i, b in enumerate(b2[1:])]
    # x is cast to the compute dtype in the wrapper: halves its DMA + VMEM.
    x_pad = jnp.zeros((b_pad, d_in_pad), compute_dtype).at[:batch, :num_i].set(
        x.astype(compute_dtype))

    const_arrays = (wf, bf, *w1p, *b1p, *w2p, *b2p)

    out_specs = (
        pl.BlockSpec((1, 1, d1_pad), lambda i: (i, 0, 0)),
        pl.BlockSpec((bt, d2_pad), lambda i: (i, 0)),
    )
    out_shape = (
        jax.ShapeDtypeStruct((num_tiles, 1, d1_pad), jnp.float32),
        jax.ShapeDtypeStruct((b_pad, d2_pad), jnp.float32),
    )

    kernel = make_fused_mlp_kernel(n1, n2, bt, batch, h_pad, compute_dtype,
                                   needs_row_mask=(b_pad != batch))

    def run(single_buffer_weights):
        factor = 1 if single_buffer_weights else 2
        need = resident_bytes(factor) + tile_bytes(bt)
        vmem_limit = int(min(vmem_cap,
                             max(32 * 2**20, int(need * 1.5) + (8 << 20))))
        in_specs = [pl.BlockSpec((bt, d_in_pad), lambda i: (i, 0))]
        for arr in const_arrays:
            if single_buffer_weights:
                # constant index_map + single buffer: weights stay resident once
                spec = pl.BlockSpec(arr.shape, lambda i: (0, 0),
                                    pipeline_mode=pl.Buffered(1))
            else:
                spec = pl.BlockSpec(arr.shape, lambda i: (0, 0))
            in_specs.append(spec)
        return pl.pallas_call(
            kernel,
            grid=(num_tiles,),
            in_specs=in_specs,
            out_specs=out_specs,
            out_shape=out_shape,
            compiler_params=pltpu.CompilerParams(
                dimension_semantics=("parallel",),
                vmem_limit_bytes=vmem_limit,
            ),
        )(x_pad, *const_arrays)

    if _HAS_PIPELINE_MODE:
        try:
            out1_partial, out2_pad = run(True)
        except Exception:
            # backend rejected Buffered(1): fall back to default double-buffering
            out1_partial, out2_pad = run(False)
    else:
        out1_partial, out2_pad = run(False)

    out1 = out1_partial.sum(axis=(0, 1))[:num_o] / jnp.float32(batch)  # (num_o,)
    out2 = out2_pad[:batch, :num_i]                                    # (batch, num_i)
    return out1, out2


# ----------------------------- parameters ----------------------------------
def init_linear(key, fan_in, fan_out):
    """Mimics torch.nn.Linear default init (uniform +-1/sqrt(fan_in)).
    Weight returned pre-transposed to (fan_in, fan_out) so h @ W + b == x @ W.T + b."""
    kw, kb = jax.random.split(key)
    bound = 1.0 / jnp.sqrt(jnp.float32(fan_in))
    w = jax.random.uniform(kw, (fan_in, fan_out), jnp.float32, -bound, bound)
    b = jax.random.uniform(kb, (fan_out,), jnp.float32, -bound, bound)
    return w, b


def build_params(key, num_i, num_h, num_o):
    dims1 = [num_i, num_h, 2 * num_h, 4 * num_h, 2 * num_h, num_h, num_o]
    dims2 = [num_i, num_h, 2 * num_h, 4 * num_h, 8 * num_h,
             4 * num_h, 2 * num_h, num_h, num_i]
    n1, n2 = len(dims1) - 1, len(dims2) - 1
    keys = jax.random.split(key, n1 + n2)

    w1, b1 = [], []
    for i in range(n1):
        w, b = init_linear(keys[i], dims1[i], dims1[i + 1])
        w1.append(w); b1.append(b)
    w2, b2 = [], []
    for i in range(n2):
        w, b = init_linear(keys[n1 + i], dims2[i], dims2[i + 1])
        w2.append(w); b2.append(b)
    return (w1, b1), (w2, b2)


def mlp_self_reference(x, params):
    """Pure-jnp f32 reference matching the PyTorch module."""
    (w1, b1), (w2, b2) = params

    def head(h, ws, bs):
        for i, (w, b) in enumerate(zip(ws, bs)):
            h = h @ w + b
            if i < len(ws) - 1:
                h = jnp.maximum(h, 0.0)
        return h

    return head(x, w1, b1).mean(axis=0), head(x, w2, b2)


if __name__ == "__main__":
    num_i, num_h, num_o = 16, 32, 8
    batch = 4

    key = jax.random.PRNGKey(0)
    k_params, k_x = jax.random.split(key)
    params = build_params(k_params, num_i, num_h, num_o)
    x = jax.random.normal(k_x, (batch, num_i), dtype=jnp.float32)

    # Run eagerly (not under an outer jit) so the Buffered(1) fallback can
    # also catch Mosaic-compile-time rejections.
    out1, out2 = mlp_self_forward(x, params)
    jax.block_until_ready((out1, out2))

    assert out1.shape == (num_o,), out1.shape
    assert out2.shape == (batch, num_i), out2.shape

    ref1, ref2 = mlp_self_reference(x, params)
    assert jnp.allclose(out1, ref1, atol=5e-2, rtol=5e-2), "out1 mismatch"
    assert jnp.allclose(out2, ref2, atol=5e-2, rtol=5e-2), "out2 mismatch"

    print("KERNEL_OK")
</pallas_src>

<mosaic_0001>
module attributes {stable_mosaic.version = 11 : i64} {
  func.func @kernel(%arg0: i32, %arg1: memref<8x128xbf16, #tpu.memory_space<vmem>>, %arg2: memref<128x256xbf16, #tpu.memory_space<vmem>>, %arg3: memref<1x256xf32, #tpu.memory_space<vmem>>, %arg4: memref<128x128xbf16, #tpu.memory_space<vmem>>, %arg5: memref<128x128xbf16, #tpu.memory_space<vmem>>, %arg6: memref<128x128xbf16, #tpu.memory_space<vmem>>, %arg7: memref<128x128xbf16, #tpu.memory_space<vmem>>, %arg8: memref<128x128xbf16, #tpu.memory_space<vmem>>, %arg9: memref<1x128xf32, #tpu.memory_space<vmem>>, %arg10: memref<1x128xf32, #tpu.memory_space<vmem>>, %arg11: memref<1x128xf32, #tpu.memory_space<vmem>>, %arg12: memref<1x128xf32, #tpu.memory_space<vmem>>, %arg13: memref<1x128xf32, #tpu.memory_space<vmem>>, %arg14: memref<128x128xbf16, #tpu.memory_space<vmem>>, %arg15: memref<128x128xbf16, #tpu.memory_space<vmem>>, %arg16: memref<128x256xbf16, #tpu.memory_space<vmem>>, %arg17: memref<256x128xbf16, #tpu.memory_space<vmem>>, %arg18: memref<128x128xbf16, #tpu.memory_space<vmem>>, %arg19: memref<128x128xbf16, #tpu.memory_space<vmem>>, %arg20: memref<128x128xbf16, #tpu.memory_space<vmem>>, %arg21: memref<1x128xf32, #tpu.memory_space<vmem>>, %arg22: memref<1x128xf32, #tpu.memory_space<vmem>>, %arg23: memref<1x256xf32, #tpu.memory_space<vmem>>, %arg24: memref<1x128xf32, #tpu.memory_space<vmem>>, %arg25: memref<1x128xf32, #tpu.memory_space<vmem>>, %arg26: memref<1x128xf32, #tpu.memory_space<vmem>>, %arg27: memref<1x128xf32, #tpu.memory_space<vmem>>, %arg28: memref<1x1x128xf32, #tpu.memory_space<vmem>>, %arg29: memref<8x128xf32, #tpu.memory_space<vmem>>) attributes {dimension_semantics = [#tpu.dimension_semantics<parallel>], iteration_bounds = array<i64: 1>, scalar_prefetch = 0 : i64, scratch_operands = 0 : i64, tpu.core_type = #tpu.core_type<tc>, window_params = [{transform_indices = @transform_0, window_bounds = array<i64: 8, 128>}, {pipeline_mode = #tpu.pipeline_mode<synchronous>, transform_indices = @transform_1, window_bounds = array<i64: 128, 256>}, {pipeline_mode = #tpu.pipeline_mode<synchronous>, transform_indices = @transform_2, window_bounds = array<i64: 1, 256>}, {pipeline_mode = #tpu.pipeline_mode<synchronous>, transform_indices = @transform_3, window_bounds = array<i64: 128, 128>}, {pipeline_mode = #tpu.pipeline_mode<synchronous>, transform_indices = @transform_4, window_bounds = array<i64: 128, 128>}, {pipeline_mode = #tpu.pipeline_mode<synchronous>, transform_indices = @transform_5, window_bounds = array<i64: 128, 128>}, {pipeline_mode = #tpu.pipeline_mode<synchronous>, transform_indices = @transform_6, window_bounds = array<i64: 128, 128>}, {pipeline_mode = #tpu.pipeline_mode<synchronous>, transform_indices = @transform_7, window_bounds = array<i64: 128, 128>}, {pipeline_mode = #tpu.pipeline_mode<synchronous>, transform_indices = @transform_8, window_bounds = array<i64: 1, 128>}, {pipeline_mode = #tpu.pipeline_mode<synchronous>, transform_indices = @transform_9, window_bounds = array<i64: 1, 128>}, {pipeline_mode = #tpu.pipeline_mode<synchronous>, transform_indices = @transform_10, window_bounds = array<i64: 1, 128>}, {pipeline_mode = #tpu.pipeline_mode<synchronous>, transform_indices = @transform_11, window_bounds = array<i64: 1, 128>}, {pipeline_mode = #tpu.pipeline_mode<synchronous>, transform_indices = @transform_12, window_bounds = array<i64: 1, 128>}, {pipeline_mode = #tpu.pipeline_mode<synchronous>, transform_indices = @transform_13, window_bounds = array<i64: 128, 128>}, {pipeline_mode = #tpu.pipeline_mode<synchronous>, transform_indices = @transform_14, window_bounds = array<i64: 128, 128>}, {pipeline_mode = #tpu.pipeline_mode<synchronous>, transform_indices = @transform_15, window_bounds = array<i64: 128, 256>}, {pipeline_mode = #tpu.pipeline_mode<synchronous>, transform_indices = @transform_16, window_bounds = array<i64: 256, 128>}, {pipeline_mode = #tpu.pipeline_mode<synchronous>, transform_indices = @transform_17, window_bounds = array<i64: 128, 128>}, {pipeline_mode = #tpu.pipeline_mode<synchronous>, transform_indices = @transform_18, window_bounds = array<i64: 128, 128>}, {pipeline_mode = #tpu.pipeline_mode<synchronous>, transform_indices = @transform_19, window_bounds = array<i64: 128, 128>}, {pipeline_mode = #tpu.pipeline_mode<synchronous>, transform_indices = @transform_20, window_bounds = array<i64: 1, 128>}, {pipeline_mode = #tpu.pipeline_mode<synchronous>, transform_indices = @transform_21, window_bounds = array<i64: 1, 128>}, {pipeline_mode = #tpu.pipeline_mode<synchronous>, transform_indices = @transform_22, window_bounds = array<i64: 1, 256>}, {pipeline_mode = #tpu.pipeline_mode<synchronous>, transform_indices = @transform_23, window_bounds = array<i64: 1, 128>}, {pipeline_mode = #tpu.pipeline_mode<synchronous>, transform_indices = @transform_24, window_bounds = array<i64: 1, 128>}, {pipeline_mode = #tpu.pipeline_mode<synchronous>, transform_indices = @transform_25, window_bounds = array<i64: 1, 128>}, {pipeline_mode = #tpu.pipeline_mode<synchronous>, transform_indices = @transform_26, window_bounds = array<i64: 1, 128>}, {transform_indices = @transform_27, window_bounds = array<i64: 1, 1, 128>}, {transform_indices = @transform_28, window_bounds = array<i64: 8, 128>}]} {
    %c0 = arith.constant 0 : index
    %c0_0 = arith.constant 0 : index
    %0 = vector.load %arg1[%c0, %c0_0] : memref<8x128xbf16, #tpu.memory_space<vmem>>, vector<8x128xbf16>
    %c0_1 = arith.constant 0 : index
    %c0_2 = arith.constant 0 : index
    %1 = vector.load %arg2[%c0_1, %c0_2] : memref<128x256xbf16, #tpu.memory_space<vmem>>, vector<128x256xbf16>
    %cst = arith.constant dense<0.000000e+00> : vector<8x256xf32>
    %2 = tpu.matmul %0, %1, %cst {dimension_numbers = #tpu.dot_dimension_numbers<[1], [0], [0], [1], [0, 0, 1, 1], [], []>} : vector<8x128xbf16>, vector<128x256xbf16>, vector<8x256xf32> -> vector<8x256xf32>
    %c0_3 = arith.constant 0 : index
    %c0_4 = arith.constant 0 : index
    %3 = vector.load %arg3[%c0_3, %c0_4] : memref<1x256xf32, #tpu.memory_space<vmem>>, vector<1x256xf32>
    %4 = vector.broadcast %3 : vector<1x256xf32> to vector<8x256xf32>
    %5 = arith.addf %2, %4 : vector<8x256xf32>
    %cst_5 = arith.constant 0.000000e+00 : f32
    %6 = vector.broadcast %cst_5 : f32 to vector<8x256xf32>
    %7 = arith.maximumf %5, %6 : vector<8x256xf32>
    %8 = vector.extract_strided_slice %7 {offsets = [0, 0], sizes = [8, 128], strides = [1, 1]} : vector<8x256xf32> to vector<8x128xf32>
    %9 = arith.truncf %8 : vector<8x128xf32> to vector<8x128xbf16>
    %10 = vector.extract_strided_slice %7 {offsets = [0, 128], sizes = [8, 128], strides = [1, 1]} : vector<8x256xf32> to vector<8x128xf32>
    %11 = arith.truncf %10 : vector<8x128xf32> to vector<8x128xbf16>
    %c0_6 = arith.constant 0 : index
    %c0_7 = arith.constant 0 : index
    %12 = vector.load %arg4[%c0_6, %c0_7] : memref<128x128xbf16, #tpu.memory_space<vmem>>, vector<128x128xbf16>
    %cst_8 = arith.constant dense<0.000000e+00> : vector<8x128xf32>
    %13 = tpu.matmul %9, %12, %cst_8 {dimension_numbers = #tpu.dot_dimension_numbers<[1], [0], [0], [1], [0, 0, 1, 1], [], []>} : vector<8x128xbf16>, vector<128x128xbf16>, vector<8x128xf32> -> vector<8x128xf32>
    %c0_9 = arith.constant 0 : index
    %c0_10 = arith.constant 0 : index
    %14 = vector.load %arg9[%c0_9, %c0_10] : memref<1x128xf32, #tpu.memory_space<vmem>>, vector<1x128xf32>
    %15 = vector.broadcast %14 : vector<1x128xf32> to vector<8x128xf32>
    %16 = arith.addf %13, %15 : vector<8x128xf32>
    %cst_11 = arith.constant 0.000000e+00 : f32
    %17 = vector.broadcast %cst_11 : f32 to vector<8x128xf32>
    %18 = arith.maximumf %16, %17 : vector<8x128xf32>
    %19 = arith.truncf %18 : vector<8x128xf32> to vector<8x128xbf16>
    %c0_12 = arith.constant 0 : index
    %c0_13 = arith.constant 0 : index
    %20 = vector.load %arg5[%c0_12, %c0_13] : memref<128x128xbf16, #tpu.memory_space<vmem>>, vector<128x128xbf16>
    %cst_14 = arith.constant dense<0.000000e+00> : vector<8x128xf32>
    %21 = tpu.matmul %19, %20, %cst_14 {dimension_numbers = #tpu.dot_dimension_numbers<[1], [0], [0], [1], [0, 0, 1, 1], [], []>} : vector<8x128xbf16>, vector<128x128xbf16>, vector<8x128xf32> -> vector<8x128xf32>
    %c0_15 = arith.constant 0 : index
    %c0_16 = arith.constant 0 : index
    %22 = vector.load %arg10[%c0_15, %c0_16] : memref<1x128xf32, #tpu.memory_space<vmem>>, vector<1x128xf32>
    %23 = vector.broadcast %22 : vector<1x128xf32> to vector<8x128xf32>
    %24 = arith.addf %21, %23 : vector<8x128xf32>
    %cst_17 = arith.constant 0.000000e+00 : f32
    %25 = vector.broadcast %cst_17 : f32 to vector<8x128xf32>
    %26 = arith.maximumf %24, %25 : vector<8x128xf32>
    %27 = arith.truncf %26 : vector<8x128xf32> to vector<8x128xbf16>
    %c0_18 = arith.constant 0 : index
    %c0_19 = arith.constant 0 : index
    %28 = vector.load %arg6[%c0_18, %c0_19] : memref<128x128xbf16, #tpu.memory_space<vmem>>, vector<128x128xbf16>
    %cst_20 = arith.constant dense<0.000000e+00> : vector<8x128xf32>
    %29 = tpu.matmul %27, %28, %cst_20 {dimension_numbers = #tpu.dot_dimension_numbers<[1], [0], [0], [1], [0, 0, 1, 1], [], []>} : vector<8x128xbf16>, vector<128x128xbf16>, vector<8x128xf32> -> vector<8x128xf32>
    %c0_21 = arith.constant 0 : index
    %c0_22 = arith.constant 0 : index
    %30 = vector.load %arg11[%c0_21, %c0_22] : memref<1x128xf32, #tpu.memory_space<vmem>>, vector<1x128xf32>
    %31 = vector.broadcast %30 : vector<1x128xf32> to vector<8x128xf32>
    %32 = arith.addf %29, %31 : vector<8x128xf32>
    %cst_23 = arith.constant 0.000000e+00 : f32
    %33 = vector.broadcast %cst_23 : f32 to vector<8x128xf32>
    %34 = arith.maximumf %32, %33 : vector<8x128xf32>
    %35 = arith.truncf %34 : vector<8x128xf32> to vector<8x128xbf16>
    %c0_24 = arith.constant 0 : index
    %c0_25 = arith.constant 0 : index
    %36 = vector.load %arg7[%c0_24, %c0_25] : memref<128x128xbf16, #tpu.memory_space<vmem>>, vector<128x128xbf16>
    %cst_26 = arith.constant dense<0.000000e+00> : vector<8x128xf32>
    %37 = tpu.matmul %35, %36, %cst_26 {dimension_numbers = #tpu.dot_dimension_numbers<[1], [0], [0], [1], [0, 0, 1, 1], [], []>} : vector<8x128xbf16>, vector<128x128xbf16>, vector<8x128xf32> -> vector<8x128xf32>
    %c0_27 = arith.constant 0 : index
    %c0_28 = arith.constant 0 : index
    %38 = vector.load %arg12[%c0_27, %c0_28] : memref<1x128xf32, #tpu.memory_space<vmem>>, vector<1x128xf32>
    %39 = vector.broadcast %38 : vector<1x128xf32> to vector<8x128xf32>
    %40 = arith.addf %37, %39 : vector<8x128xf32>
    %cst_29 = arith.constant 0.000000e+00 : f32
    %41 = vector.broadcast %cst_29 : f32 to vector<8x128xf32>
    %42 = arith.maximumf %40, %41 : vector<8x128xf32>
    %43 = arith.truncf %42 : vector<8x128xf32> to vector<8x128xbf16>
    %c0_30 = arith.constant 0 : index
    %c0_31 = arith.constant 0 : index
    %44 = vector.load %arg8[%c0_30, %c0_31] : memref<128x128xbf16, #tpu.memory_space<vmem>>, vector<128x128xbf16>
    %cst_32 = arith.constant dense<0.000000e+00> : vector<8x128xf32>
    %45 = tpu.matmul %43, %44, %cst_32 {dimension_numbers = #tpu.dot_dimension_numbers<[1], [0], [0], [1], [0, 0, 1, 1], [], []>} : vector<8x128xbf16>, vector<128x128xbf16>, vector<8x128xf32> -> vector<8x128xf32>
    %c0_33 = arith.constant 0 : index
    %c0_34 = arith.constant 0 : index
    %46 = vector.load %arg13[%c0_33, %c0_34] : memref<1x128xf32, #tpu.memory_space<vmem>>, vector<1x128xf32>
    %47 = vector.broadcast %46 : vector<1x128xf32> to vector<8x128xf32>
    %48 = arith.addf %45, %47 : vector<8x128xf32>
    %c0_35 = arith.constant 0 : index
    %c0_36 = arith.constant 0 : index
    %49 = vector.load %arg14[%c0_35, %c0_36] : memref<128x128xbf16, #tpu.memory_space<vmem>>, vector<128x128xbf16>
    %cst_37 = arith.constant dense<0.000000e+00> : vector<8x128xf32>
    %50 = tpu.matmul %11, %49, %cst_37 {dimension_numbers = #tpu.dot_dimension_numbers<[1], [0], [0], [1], [0, 0, 1, 1], [], []>} : vector<8x128xbf16>, vector<128x128xbf16>, vector<8x128xf32> -> vector<8x128xf32>
    %c0_38 = arith.constant 0 : index
    %c0_39 = arith.constant 0 : index
    %51 = vector.load %arg21[%c0_38, %c0_39] : memref<1x128xf32, #tpu.memory_space<vmem>>, vector<1x128xf32>
    %52 = vector.broadcast %51 : vector<1x128xf32> to vector<8x128xf32>
    %53 = arith.addf %50, %52 : vector<8x128xf32>
    %cst_40 = arith.constant 0.000000e+00 : f32
    %54 = vector.broadcast %cst_40 : f32 to vector<8x128xf32>
    %55 = arith.maximumf %53, %54 : vector<8x128xf32>
    %56 = arith.truncf %55 : vector<8x128xf32> to vector<8x128xbf16>
    %c0_41 = arith.constant 0 : index
    %c0_42 = arith.constant 0 : index
    %57 = vector.load %arg15[%c0_41, %c0_42] : memref<128x128xbf16, #tpu.memory_space<vmem>>, vector<128x128xbf16>
    %cst_43 = arith.constant dense<0.000000e+00> : vector<8x128xf32>
    %58 = tpu.matmul %56, %57, %cst_43 {dimension_numbers = #tpu.dot_dimension_numbers<[1], [0], [0], [1], [0, 0, 1, 1], [], []>} : vector<8x128xbf16>, vector<128x128xbf16>, vector<8x128xf32> -> vector<8x128xf32>
    %c0_44 = arith.constant 0 : index
    %c0_45 = arith.constant 0 : index
    %59 = vector.load %arg22[%c0_44, %c0_45] : memref<1x128xf32, #tpu.memory_space<vmem>>, vector<1x128xf32>
    %60 = vector.broadcast %59 : vector<1x128xf32> to vector<8x128xf32>
    %61 = arith.addf %58, %60 : vector<8x128xf32>
    %cst_46 = arith.constant 0.000000e+00 : f32
    %62 = vector.broadcast %cst_46 : f32 to vector<8x128xf32>
    %63 = arith.maximumf %61, %62 : vector<8x128xf32>
    %64 = arith.truncf %63 : vector<8x128xf32> to vector<8x128xbf16>
    %c0_47 = arith.constant 0 : index
    %c0_48 = arith.constant 0 : index
    %65 = vector.load %arg16[%c0_47, %c0_48] : memref<128x256xbf16, #tpu.memory_space<vmem>>, vector<128x256xbf16>
    %cst_49 = arith.constant dense<0.000000e+00> : vector<8x256xf32>
    %66 = tpu.matmul %64, %65, %cst_49 {dimension_numbers = #tpu.dot_dimension_numbers<[1], [0], [0], [1], [0, 0, 1, 1], [], []>} : vector<8x128xbf16>, vector<128x256xbf16>, vector<8x256xf32> -> vector<8x256xf32>
    %c0_50 = arith.constant 0 : index
    %c0_51 = arith.constant 0 : index
    %67 = vector.load %arg23[%c0_50, %c0_51] : memref<1x256xf32, #tpu.memory_space<vmem>>, vector<1x256xf32>
    %68 = vector.broadcast %67 : vector<1x256xf32> to vector<8x256xf32>
    %69 = arith.addf %66, %68 : vector<8x256xf32>
    %cst_52 = arith.constant 0.000000e+00 : f32
    %70 = vector.broadcast %cst_52 : f32 to vector<8x256xf32>
    %71 = arith.maximumf %69, %70 : vector<8x256xf32>
    %72 = arith.truncf %71 : vector<8x256xf32> to vector<8x256xbf16>
    %c0_53 = arith.constant 0 : index
    %c0_54 = arith.constant 0 : index
    %73 = vector.load %arg17[%c0_53, %c0_54] : memref<256x128xbf16, #tpu.memory_space<vmem>>, vector<256x128xbf16>
    %cst_55 = arith.constant dense<0.000000e+00> : vector<8x128xf32>
    %74 = tpu.matmul %72, %73, %cst_55 {dimension_numbers = #tpu.dot_dimension_numbers<[1], [0], [0], [1], [0, 0, 1, 1], [], []>} : vector<8x256xbf16>, vector<256x128xbf16>, vector<8x128xf32> -> vector<8x128xf32>
    %c0_56 = arith.constant 0 : index
    %c0_57 = arith.constant 0 : index
    %75 = vector.load %arg24[%c0_56, %c0_57] : memref<1x128xf32, #tpu.memory_space<vmem>>, vector<1x128xf32>
    %76 = vector.broadcast %75 : vector<1x128xf32> to vector<8x128xf32>
    %77 = arith.addf %74, %76 : vector<8x128xf32>
    %cst_58 = arith.constant 0.000000e+00 : f32
    %78 = vector.broadcast %cst_58 : f32 to vector<8x128xf32>
    %79 = arith.maximumf %77, %78 : vector<8x128xf32>
    %80 = arith.truncf %79 : vector<8x128xf32> to vector<8x128xbf16>
    %c0_59 = arith.constant 0 : index
    %c0_60 = arith.constant 0 : index
    %81 = vector.load %arg18[%c0_59, %c0_60] : memref<128x128xbf16, #tpu.memory_space<vmem>>, vector<128x128xbf16>
    %cst_61 = arith.constant dense<0.000000e+00> : vector<8x128xf32>
    %82 = tpu.matmul %80, %81, %cst_61 {dimension_numbers = #tpu.dot_dimension_numbers<[1], [0], [0], [1], [0, 0, 1, 1], [], []>} : vector<8x128xbf16>, vector<128x128xbf16>, vector<8x128xf32> -> vector<8x128xf32>
    %c0_62 = arith.constant 0 : index
    %c0_63 = arith.constant 0 : index
    %83 = vector.load %arg25[%c0_62, %c0_63] : memref<1x128xf32, #tpu.memory_space<vmem>>, vector<1x128xf32>
    %84 = vector.broadcast %83 : vector<1x128xf32> to vector<8x128xf32>
    %85 = arith.addf %82, %84 : vector<8x128xf32>
    %cst_64 = arith.constant 0.000000e+00 : f32
    %86 = vector.broadcast %cst_64 : f32 to vector<8x128xf32>
    %87 = arith.maximumf %85, %86 : vector<8x128xf32>
    %88 = arith.truncf %87 : vector<8x128xf32> to vector<8x128xbf16>
    %c0_65 = arith.constant 0 : index
    %c0_66 = arith.constant 0 : index
    %89 = vector.load %arg19[%c0_65, %c0_66] : memref<128x128xbf16, #tpu.memory_space<vmem>>, vector<128x128xbf16>
    %cst_67 = arith.constant dense<0.000000e+00> : vector<8x128xf32>
    %90 = tpu.matmul %88, %89, %cst_67 {dimension_numbers = #tpu.dot_dimension_numbers<[1], [0], [0], [1], [0, 0, 1, 1], [], []>} : vector<8x128xbf16>, vector<128x128xbf16>, vector<8x128xf32> -> vector<8x128xf32>
    %c0_68 = arith.constant 0 : index
    %c0_69 = arith.constant 0 : index
    %91 = vector.load %arg26[%c0_68, %c0_69] : memref<1x128xf32, #tpu.memory_space<vmem>>, vector<1x128xf32>
    %92 = vector.broadcast %91 : vector<1x128xf32> to vector<8x128xf32>
    %93 = arith.addf %90, %92 : vector<8x128xf32>
    %cst_70 = arith.constant 0.000000e+00 : f32
    %94 = vector.broadcast %cst_70 : f32 to vector<8x128xf32>
    %95 = arith.maximumf %93, %94 : vector<8x128xf32>
    %96 = arith.truncf %95 : vector<8x128xf32> to vector<8x128xbf16>
    %c0_71 = arith.constant 0 : index
    %c0_72 = arith.constant 0 : index
    %97 = vector.load %arg20[%c0_71, %c0_72] : memref<128x128xbf16, #tpu.memory_space<vmem>>, vector<128x128xbf16>
    %cst_73 = arith.constant dense<0.000000e+00> : vector<8x128xf32>
    %98 = tpu.matmul %96, %97, %cst_73 {dimension_numbers = #tpu.dot_dimension_numbers<[1], [0], [0], [1], [0, 0, 1, 1], [], []>} : vector<8x128xbf16>, vector<128x128xbf16>, vector<8x128xf32> -> vector<8x128xf32>
    %c0_74 = arith.constant 0 : index
    %c0_75 = arith.constant 0 : index
    %99 = vector.load %arg27[%c0_74, %c0_75] : memref<1x128xf32, #tpu.memory_space<vmem>>, vector<1x128xf32>
    %100 = vector.broadcast %99 : vector<1x128xf32> to vector<8x128xf32>
    %101 = arith.addf %98, %100 : vector<8x128xf32>
    %102 = tpu.iota {dimensions = array<i32: 1>} : vector<1x8xi32>
    %c8_i32 = arith.constant 8 : i32
    %103 = arith.muli %arg0, %c8_i32 : i32
    %104 = vector.broadcast %103 : i32 to vector<1x8xi32>
    %105 = arith.addi %102, %104 : vector<1x8xi32>
    %c4_i32 = arith.constant 4 : i32
    %106 = vector.broadcast %c4_i32 : i32 to vector<1x8xi32>
    %107 = arith.cmpi slt, %105, %106 : vector<1x8xi32>
    %108 = arith.extui %107 : vector<1x8xi1> to vector<1x8xi32>
    %109 = arith.sitofp %108 : vector<1x8xi32> to vector<1x8xf32>
    %cst_76 = arith.constant dense<0.000000e+00> : vector<1x128xf32>
    %110 = tpu.matmul %109, %48, %cst_76 {dimension_numbers = #tpu.dot_dimension_numbers<[1], [0], [0], [1], [0, 0, 1, 1], [], []>} : vector<1x8xf32>, vector<8x128xf32>, vector<1x128xf32> -> vector<1x128xf32>
    %111 = vector.shape_cast %110 : vector<1x128xf32> to vector<1x1x128xf32>
    %c0_77 = arith.constant 0 : index
    %c0_78 = arith.constant 0 : index
    %c0_79 = arith.constant 0 : index
    %112 = vector.load %arg28[%c0_77, %c0_78, %c0_79] : memref<1x1x128xf32, #tpu.memory_space<vmem>>, vector<1x1x128xf32>
    tpu.vector_store %arg28[%c0_77, %c0_78, %c0_79], %111 {strides = array<i32>} : memref<1x1x128xf32, #tpu.memory_space<vmem>>, vector<1x1x128xf32>,
    %c0_80 = arith.constant 0 : index
    %c0_81 = arith.constant 0 : index
    %113 = vector.load %arg29[%c0_80, %c0_81] : memref<8x128xf32, #tpu.memory_space<vmem>>, vector<8x128xf32>
    tpu.vector_store %arg29[%c0_80, %c0_81], %101 {strides = array<i32>} : memref<8x128xf32, #tpu.memory_space<vmem>>, vector<8x128xf32>,
    return
  }
  func.func @transform_0(%arg0: i32) -> (i32, i32) {
    %c0_i32 = arith.constant 0 : i32
    %c0_i32_0 = arith.constant 0 : i32
    return %arg0, %c0_i32 : i32, i32
  }
  func.func @transform_1(%arg0: i32) -> (i32, i32) {
    %c0_i32 = arith.constant 0 : i32
    %c0_i32_0 = arith.constant 0 : i32
    %c0_i32_1 = arith.constant 0 : i32
    return %c0_i32, %c0_i32_0 : i32, i32
  }
  func.func @transform_2(%arg0: i32) -> (i32, i32) {
    %c0_i32 = arith.constant 0 : i32
    %c0_i32_0 = arith.constant 0 : i32
    %c0_i32_1 = arith.constant 0 : i32
    return %c0_i32, %c0_i32_0 : i32, i32
  }
  func.func @transform_3(%arg0: i32) -> (i32, i32) {
    %c0_i32 = arith.constant 0 : i32
    %c0_i32_0 = arith.constant 0 : i32
    %c0_i32_1 = arith.constant 0 : i32
    return %c0_i32, %c0_i32_0 : i32, i32
  }
  func.func @transform_4(%arg0: i32) -> (i32, i32) {
    %c0_i32 = arith.constant 0 : i32
    %c0_i32_0 = arith.constant 0 : i32
    %c0_i32_1 = arith.constant 0 : i32
    return %c0_i32, %c0_i32_0 : i32, i32
  }
  func.func @transform_5(%arg0: i32) -> (i32, i32) {
    %c0_i32 = arith.constant 0 : i32
    %c0_i32_0 = arith.constant 0 : i32
    %c0_i32_1 = arith.constant 0 : i32
    return %c0_i32, %c0_i32_0 : i32, i32
  }
  func.func @transform_6(%arg0: i32) -> (i32, i32) {
    %c0_i32 = arith.constant 0 : i32
    %c0_i32_0 = arith.constant 0 : i32
    %c0_i32_1 = arith.constant 0 : i32
    return %c0_i32, %c0_i32_0 : i32, i32
  }
  func.func @transform_7(%arg0: i32) -> (i32, i32) {
    %c0_i32 = arith.constant 0 : i32
    %c0_i32_0 = arith.constant 0 : i32
    %c0_i32_1 = arith.constant 0 : i32
    return %c0_i32, %c0_i32_0 : i32, i32
  }
  func.func @transform_8(%arg0: i32) -> (i32, i32) {
    %c0_i32 = arith.constant 0 : i32
    %c0_i32_0 = arith.constant 0 : i32
    %c0_i32_1 = arith.constant 0 : i32
    return %c0_i32, %c0_i32_0 : i32, i32
  }
  func.func @transform_9(%arg0: i32) -> (i32, i32) {
    %c0_i32 = arith.constant 0 : i32
    %c0_i32_0 = arith.constant 0 : i32
    %c0_i32_1 = arith.constant 0 : i32
    return %c0_i32, %c0_i32_0 : i32, i32
  }
  func.func @transform_10(%arg0: i32) -> (i32, i32) {
    %c0_i32 = arith.constant 0 : i32
    %c0_i32_0 = arith.constant 0 : i32
    %c0_i32_1 = arith.constant 0 : i32
    return %c0_i32, %c0_i32_0 : i32, i32
  }
  func.func @transform_11(%arg0: i32) -> (i32, i32) {
    %c0_i32 = arith.constant 0 : i32
    %c0_i32_0 = arith.constant 0 : i32
    %c0_i32_1 = arith.constant 0 : i32
    return %c0_i32, %c0_i32_0 : i32, i32
  }
  func.func @transform_12(%arg0: i32) -> (i32, i32) {
    %c0_i32 = arith.constant 0 : i32
    %c0_i32_0 = arith.constant 0 : i32
    %c0_i32_1 = arith.constant 0 : i32
    return %c0_i32, %c0_i32_0 : i32, i32
  }
  func.func @transform_13(%arg0: i32) -> (i32, i32) {
    %c0_i32 = arith.constant 0 : i32
    %c0_i32_0 = arith.constant 0 : i32
    %c0_i32_1 = arith.constant 0 : i32
    return %c0_i32, %c0_i32_0 : i32, i32
  }
  func.func @transform_14(%arg0: i32) -> (i32, i32) {
    %c0_i32 = arith.constant 0 : i32
    %c0_i32_0 = arith.constant 0 : i32
    %c0_i32_1 = arith.constant 0 : i32
    return %c0_i32, %c0_i32_0 : i32, i32
  }
  func.func @transform_15(%arg0: i32) -> (i32, i32) {
    %c0_i32 = arith.constant 0 : i32
    %c0_i32_0 = arith.constant 0 : i32
    %c0_i32_1 = arith.constant 0 : i32
    return %c0_i32, %c0_i32_0 : i32, i32
  }
  func.func @transform_16(%arg0: i32) -> (i32, i32) {
    %c0_i32 = arith.constant 0 : i32
    %c0_i32_0 = arith.constant 0 : i32
    %c0_i32_1 = arith.constant 0 : i32
    return %c0_i32, %c0_i32_0 : i32, i32
  }
  func.func @transform_17(%arg0: i32) -> (i32, i32) {
    %c0_i32 = arith.constant 0 : i32
    %c0_i32_0 = arith.constant 0 : i32
    %c0_i32_1 = arith.constant 0 : i32
    return %c0_i32, %c0_i32_0 : i32, i32
  }
  func.func @transform_18(%arg0: i32) -> (i32, i32) {
    %c0_i32 = arith.constant 0 : i32
    %c0_i32_0 = arith.constant 0 : i32
    %c0_i32_1 = arith.constant 0 : i32
    return %c0_i32, %c0_i32_0 : i32, i32
  }
  func.func @transform_19(%arg0: i32) -> (i32, i32) {
    %c0_i32 = arith.constant 0 : i32
    %c0_i32_0 = arith.constant 0 : i32
    %c0_i32_1 = arith.constant 0 : i32
    return %c0_i32, %c0_i32_0 : i32, i32
  }
  func.func @transform_20(%arg0: i32) -> (i32, i32) {
    %c0_i32 = arith.constant 0 : i32
    %c0_i32_0 = arith.constant 0 : i32
    %c0_i32_1 = arith.constant 0 : i32
    return %c0_i32, %c0_i32_0 : i32, i32
  }
  func.func @transform_21(%arg0: i32) -> (i32, i32) {
    %c0_i32 = arith.constant 0 : i32
    %c0_i32_0 = arith.constant 0 : i32
    %c0_i32_1 = arith.constant 0 : i32
    return %c0_i32, %c0_i32_0 : i32, i32
  }
  func.func @transform_22(%arg0: i32) -> (i32, i32) {
    %c0_i32 = arith.constant 0 : i32
    %c0_i32_0 = arith.constant 0 : i32
    %c0_i32_1 = arith.constant 0 : i32
    return %c0_i32, %c0_i32_0 : i32, i32
  }
  func.func @transform_23(%arg0: i32) -> (i32, i32) {
    %c0_i32 = arith.constant 0 : i32
    %c0_i32_0 = arith.constant 0 : i32
    %c0_i32_1 = arith.constant 0 : i32
    return %c0_i32, %c0_i32_0 : i32, i32
  }
  func.func @transform_24(%arg0: i32) -> (i32, i32) {
    %c0_i32 = arith.constant 0 : i32
    %c0_i32_0 = arith.constant 0 : i32
    %c0_i32_1 = arith.constant 0 : i32
    return %c0_i32, %c0_i32_0 : i32, i32
  }
  func.func @transform_25(%arg0: i32) -> (i32, i32) {
    %c0_i32 = arith.constant 0 : i32
    %c0_i32_0 = arith.constant 0 : i32
    %c0_i32_1 = arith.constant 0 : i32
    return %c0_i32, %c0_i32_0 : i32, i32
  }
  func.func @transform_26(%arg0: i32) -> (i32, i32) {
    %c0_i32 = arith.constant 0 : i32
    %c0_i32_0 = arith.constant 0 : i32
    %c0_i32_1 = arith.constant 0 : i32
    return %c0_i32, %c0_i32_0 : i32, i32
  }
  func.func @transform_27(%arg0: i32) -> (i32, i32, i32) {
    %c0_i32 = arith.constant 0 : i32
    %c0_i32_0 = arith.constant 0 : i32
    %c0_i32_1 = arith.constant 0 : i32
    return %arg0, %c0_i32, %c0_i32_0 : i32, i32, i32
  }
  func.func @transform_28(%arg0: i32) -> (i32, i32) {
    %c0_i32 = arith.constant 0 : i32
    %c0_i32_0 = arith.constant 0 : i32
    return %arg0, %c0_i32 : i32, i32
  }
}

module attributes {stable_mosaic.version = 11 : i64} {
  func.func @kernel(%arg0: i32, %arg1: memref<8x128xbf16, #tpu.memory_space<vmem>>, %arg2: memref<128x256xbf16, #tpu.memory_space<vmem>>, %arg3: memref<1x256xf32, #tpu.memory_space<vmem>>, %arg4: memref<128x128xbf16, #tpu.memory_space<vmem>>, %arg5: memref<128x128xbf16, #tpu.memory_space<vmem>>, %arg6: memref<128x128xbf16, #tpu.memory_space<vmem>>, %arg7: memref<128x128xbf16, #tpu.memory_space<vmem>>, %arg8: memref<128x128xbf16, #tpu.memory_space<vmem>>, %arg9: memref<1x128xf32, #tpu.memory_space<vmem>>, %arg10: memref<1x128xf32, #tpu.memory_space<vmem>>, %arg11: memref<1x128xf32, #tpu.memory_space<vmem>>, %arg12: memref<1x128xf32, #tpu.memory_space<vmem>>, %arg13: memref<1x128xf32, #tpu.memory_space<vmem>>, %arg14: memref<128x128xbf16, #tpu.memory_space<vmem>>, %arg15: memref<128x128xbf16, #tpu.memory_space<vmem>>, %arg16: memref<128x256xbf16, #tpu.memory_space<vmem>>, %arg17: memref<256x128xbf16, #tpu.memory_space<vmem>>, %arg18: memref<128x128xbf16, #tpu.memory_space<vmem>>, %arg19: memref<128x128xbf16, #tpu.memory_space<vmem>>, %arg20: memref<128x128xbf16, #tpu.memory_space<vmem>>, %arg21: memref<1x128xf32, #tpu.memory_space<vmem>>, %arg22: memref<1x128xf32, #tpu.memory_space<vmem>>, %arg23: memref<1x256xf32, #tpu.memory_space<vmem>>, %arg24: memref<1x128xf32, #tpu.memory_space<vmem>>, %arg25: memref<1x128xf32, #tpu.memory_space<vmem>>, %arg26: memref<1x128xf32, #tpu.memory_space<vmem>>, %arg27: memref<1x128xf32, #tpu.memory_space<vmem>>, %arg28: memref<1x1x128xf32, #tpu.memory_space<vmem>>, %arg29: memref<8x128xf32, #tpu.memory_space<vmem>>) attributes {dimension_semantics = [#tpu.dimension_semantics<parallel>], iteration_bounds = array<i64: 1>, scalar_prefetch = 0 : i64, scratch_operands = 0 : i64, tpu.core_type = #tpu.core_type<tc>, window_params = [{transform_indices = @transform_0, window_bounds = array<i64: 8, 128>}, {pipeline_mode = #tpu.pipeline_mode<synchronous>, transform_indices = @transform_1, window_bounds = array<i64: 128, 256>}, {pipeline_mode = #tpu.pipeline_mode<synchronous>, transform_indices = @transform_2, window_bounds = array<i64: 1, 256>}, {pipeline_mode = #tpu.pipeline_mode<synchronous>, transform_indices = @transform_3, window_bounds = array<i64: 128, 128>}, {pipeline_mode = #tpu.pipeline_mode<synchronous>, transform_indices = @transform_4, window_bounds = array<i64: 128, 128>}, {pipeline_mode = #tpu.pipeline_mode<synchronous>, transform_indices = @transform_5, window_bounds = array<i64: 128, 128>}, {pipeline_mode = #tpu.pipeline_mode<synchronous>, transform_indices = @transform_6, window_bounds = array<i64: 128, 128>}, {pipeline_mode = #tpu.pipeline_mode<synchronous>, transform_indices = @transform_7, window_bounds = array<i64: 128, 128>}, {pipeline_mode = #tpu.pipeline_mode<synchronous>, transform_indices = @transform_8, window_bounds = array<i64: 1, 128>}, {pipeline_mode = #tpu.pipeline_mode<synchronous>, transform_indices = @transform_9, window_bounds = array<i64: 1, 128>}, {pipeline_mode = #tpu.pipeline_mode<synchronous>, transform_indices = @transform_10, window_bounds = array<i64: 1, 128>}, {pipeline_mode = #tpu.pipeline_mode<synchronous>, transform_indices = @transform_11, window_bounds = array<i64: 1, 128>}, {pipeline_mode = #tpu.pipeline_mode<synchronous>, transform_indices = @transform_12, window_bounds = array<i64: 1, 128>}, {pipeline_mode = #tpu.pipeline_mode<synchronous>, transform_indices = @transform_13, window_bounds = array<i64: 128, 128>}, {pipeline_mode = #tpu.pipeline_mode<synchronous>, transform_indices = @transform_14, window_bounds = array<i64: 128, 128>}, {pipeline_mode = #tpu.pipeline_mode<synchronous>, transform_indices = @transform_15, window_bounds = array<i64: 128, 256>}, {pipeline_mode = #tpu.pipeline_mode<synchronous>, transform_indices = @transform_16, window_bounds = array<i64: 256, 128>}, {pipeline_mode = #tpu.pipeline_mode<synchronous>, transform_indices = @transform_17, window_bounds = array<i64: 128, 128>}, {pipeline_mode = #tpu.pipeline_mode<synchronous>, transform_indices = @transform_18, window_bounds = array<i64: 128, 128>}, {pipeline_mode = #tpu.pipeline_mode<synchronous>, transform_indices = @transform_19, window_bounds = array<i64: 128, 128>}, {pipeline_mode = #tpu.pipeline_mode<synchronous>, transform_indices = @transform_20, window_bounds = array<i64: 1, 128>}, {pipeline_mode = #tpu.pipeline_mode<synchronous>, transform_indices = @transform_21, window_bounds = array<i64: 1, 128>}, {pipeline_mode = #tpu.pipeline_mode<synchronous>, transform_indices = @transform_22, window_bounds = array<i64: 1, 256>}, {pipeline_mode = #tpu.pipeline_mode<synchronous>, transform_indices = @transform_23, window_bounds = array<i64: 1, 128>}, {pipeline_mode = #tpu.pipeline_mode<synchronous>, transform_indices = @transform_24, window_bounds = array<i64: 1, 128>}, {pipeline_mode = #tpu.pipeline_mode<synchronous>, transform_indices = @transform_25, window_bounds = array<i64: 1, 128>}, {pipeline_mode = #tpu.pipeline_mode<synchronous>, transform_indices = @transform_26, window_bounds = array<i64: 1, 128>}, {transform_indices = @transform_27, window_bounds = array<i64: 1, 1, 128>}, {transform_indices = @transform_28, window_bounds = array<i64: 8, 128>}]} {
    %c0 = arith.constant 0 : index
    %c0_0 = arith.constant 0 : index
    %0 = vector.load %arg1[%c0, %c0_0] : memref<8x128xbf16, #tpu.memory_space<vmem>>, vector<8x128xbf16>
    %c0_1 = arith.constant 0 : index
    %c0_2 = arith.constant 0 : index
    %1 = vector.load %arg2[%c0_1, %c0_2] : memref<128x256xbf16, #tpu.memory_space<vmem>>, vector<128x256xbf16>
    %cst = arith.constant dense<0.000000e+00> : vector<8x256xf32>
    %2 = tpu.matmul %0, %1, %cst {dimension_numbers = #tpu.dot_dimension_numbers<[1], [0], [0], [1], [0, 0, 1, 1], [], []>} : vector<8x128xbf16>, vector<128x256xbf16>, vector<8x256xf32> -> vector<8x256xf32>
    %c0_3 = arith.constant 0 : index
    %c0_4 = arith.constant 0 : index
    %3 = vector.load %arg3[%c0_3, %c0_4] : memref<1x256xf32, #tpu.memory_space<vmem>>, vector<1x256xf32>
    %4 = vector.broadcast %3 : vector<1x256xf32> to vector<8x256xf32>
    %5 = arith.addf %2, %4 : vector<8x256xf32>
    %cst_5 = arith.constant 0.000000e+00 : f32
    %6 = vector.broadcast %cst_5 : f32 to vector<8x256xf32>
    %7 = arith.maximumf %5, %6 : vector<8x256xf32>
    %8 = vector.extract_strided_slice %7 {offsets = [0, 0], sizes = [8, 128], strides = [1, 1]} : vector<8x256xf32> to vector<8x128xf32>
    %9 = arith.truncf %8 : vector<8x128xf32> to vector<8x128xbf16>
    %10 = vector.extract_strided_slice %7 {offsets = [0, 128], sizes = [8, 128], strides = [1, 1]} : vector<8x256xf32> to vector<8x128xf32>
    %11 = arith.truncf %10 : vector<8x128xf32> to vector<8x128xbf16>
    %c0_6 = arith.constant 0 : index
    %c0_7 = arith.constant 0 : index
    %12 = vector.load %arg4[%c0_6, %c0_7] : memref<128x128xbf16, #tpu.memory_space<vmem>>, vector<128x128xbf16>
    %cst_8 = arith.constant dense<0.000000e+00> : vector<8x128xf32>
    %13 = tpu.matmul %9, %12, %cst_8 {dimension_numbers = #tpu.dot_dimension_numbers<[1], [0], [0], [1], [0, 0, 1, 1], [], []>} : vector<8x128xbf16>, vector<128x128xbf16>, vector<8x128xf32> -> vector<8x128xf32>
    %c0_9 = arith.constant 0 : index
    %c0_10 = arith.constant 0 : index
    %14 = vector.load %arg9[%c0_9, %c0_10] : memref<1x128xf32, #tpu.memory_space<vmem>>, vector<1x128xf32>
    %15 = vector.broadcast %14 : vector<1x128xf32> to vector<8x128xf32>
    %16 = arith.addf %13, %15 : vector<8x128xf32>
    %cst_11 = arith.constant 0.000000e+00 : f32
    %17 = vector.broadcast %cst_11 : f32 to vector<8x128xf32>
    %18 = arith.maximumf %16, %17 : vector<8x128xf32>
    %19 = arith.truncf %18 : vector<8x128xf32> to vector<8x128xbf16>
    %c0_12 = arith.constant 0 : index
    %c0_13 = arith.constant 0 : index
    %20 = vector.load %arg5[%c0_12, %c0_13] : memref<128x128xbf16, #tpu.memory_space<vmem>>, vector<128x128xbf16>
    %cst_14 = arith.constant dense<0.000000e+00> : vector<8x128xf32>
    %21 = tpu.matmul %19, %20, %cst_14 {dimension_numbers = #tpu.dot_dimension_numbers<[1], [0], [0], [1], [0, 0, 1, 1], [], []>} : vector<8x128xbf16>, vector<128x128xbf16>, vector<8x128xf32> -> vector<8x128xf32>
    %c0_15 = arith.constant 0 : index
    %c0_16 = arith.constant 0 : index
    %22 = vector.load %arg10[%c0_15, %c0_16] : memref<1x128xf32, #tpu.memory_space<vmem>>, vector<1x128xf32>
    %23 = vector.broadcast %22 : vector<1x128xf32> to vector<8x128xf32>
    %24 = arith.addf %21, %23 : vector<8x128xf32>
    %cst_17 = arith.constant 0.000000e+00 : f32
    %25 = vector.broadcast %cst_17 : f32 to vector<8x128xf32>
    %26 = arith.maximumf %24, %25 : vector<8x128xf32>
    %27 = arith.truncf %26 : vector<8x128xf32> to vector<8x128xbf16>
    %c0_18 = arith.constant 0 : index
    %c0_19 = arith.constant 0 : index
    %28 = vector.load %arg6[%c0_18, %c0_19] : memref<128x128xbf16, #tpu.memory_space<vmem>>, vector<128x128xbf16>
    %cst_20 = arith.constant dense<0.000000e+00> : vector<8x128xf32>
    %29 = tpu.matmul %27, %28, %cst_20 {dimension_numbers = #tpu.dot_dimension_numbers<[1], [0], [0], [1], [0, 0, 1, 1], [], []>} : vector<8x128xbf16>, vector<128x128xbf16>, vector<8x128xf32> -> vector<8x128xf32>
    %c0_21 = arith.constant 0 : index
    %c0_22 = arith.constant 0 : index
    %30 = vector.load %arg11[%c0_21, %c0_22] : memref<1x128xf32, #tpu.memory_space<vmem>>, vector<1x128xf32>
    %31 = vector.broadcast %30 : vector<1x128xf32> to vector<8x128xf32>
    %32 = arith.addf %29, %31 : vector<8x128xf32>
    %cst_23 = arith.constant 0.000000e+00 : f32
    %33 = vector.broadcast %cst_23 : f32 to vector<8x128xf32>
    %34 = arith.maximumf %32, %33 : vector<8x128xf32>
    %35 = arith.truncf %34 : vector<8x128xf32> to vector<8x128xbf16>
    %c0_24 = arith.constant 0 : index
    %c0_25 = arith.constant 0 : index
    %36 = vector.load %arg7[%c0_24, %c0_25] : memref<128x128xbf16, #tpu.memory_space<vmem>>, vector<128x128xbf16>
    %cst_26 = arith.constant dense<0.000000e+00> : vector<8x128xf32>
    %37 = tpu.matmul %35, %36, %cst_26 {dimension_numbers = #tpu.dot_dimension_numbers<[1], [0], [0], [1], [0, 0, 1, 1], [], []>} : vector<8x128xbf16>, vector<128x128xbf16>, vector<8x128xf32> -> vector<8x128xf32>
    %c0_27 = arith.constant 0 : index
    %c0_28 = arith.constant 0 : index
    %38 = vector.load %arg12[%c0_27, %c0_28] : memref<1x128xf32, #tpu.memory_space<vmem>>, vector<1x128xf32>
    %39 = vector.broadcast %38 : vector<1x128xf32> to vector<8x128xf32>
    %40 = arith.addf %37, %39 : vector<8x128xf32>
    %cst_29 = arith.constant 0.000000e+00 : f32
    %41 = vector.broadcast %cst_29 : f32 to vector<8x128xf32>
    %42 = arith.maximumf %40, %41 : vector<8x128xf32>
    %43 = arith.truncf %42 : vector<8x128xf32> to vector<8x128xbf16>
    %c0_30 = arith.constant 0 : index
    %c0_31 = arith.constant 0 : index
    %44 = vector.load %arg8[%c0_30, %c0_31] : memref<128x128xbf16, #tpu.memory_space<vmem>>, vector<128x128xbf16>
    %cst_32 = arith.constant dense<0.000000e+00> : vector<8x128xf32>
    %45 = tpu.matmul %43, %44, %cst_32 {dimension_numbers = #tpu.dot_dimension_numbers<[1], [0], [0], [1], [0, 0, 1, 1], [], []>} : vector<8x128xbf16>, vector<128x128xbf16>, vector<8x128xf32> -> vector<8x128xf32>
    %c0_33 = arith.constant 0 : index
    %c0_34 = arith.constant 0 : index
    %46 = vector.load %arg13[%c0_33, %c0_34] : memref<1x128xf32, #tpu.memory_space<vmem>>, vector<1x128xf32>
    %47 = vector.broadcast %46 : vector<1x128xf32> to vector<8x128xf32>
    %48 = arith.addf %45, %47 : vector<8x128xf32>
    %c0_35 = arith.constant 0 : index
    %c0_36 = arith.constant 0 : index
    %49 = vector.load %arg14[%c0_35, %c0_36] : memref<128x128xbf16, #tpu.memory_space<vmem>>, vector<128x128xbf16>
    %cst_37 = arith.constant dense<0.000000e+00> : vector<8x128xf32>
    %50 = tpu.matmul %11, %49, %cst_37 {dimension_numbers = #tpu.dot_dimension_numbers<[1], [0], [0], [1], [0, 0, 1, 1], [], []>} : vector<8x128xbf16>, vector<128x128xbf16>, vector<8x128xf32> -> vector<8x128xf32>
    %c0_38 = arith.constant 0 : index
    %c0_39 = arith.constant 0 : index
    %51 = vector.load %arg21[%c0_38, %c0_39] : memref<1x128xf32, #tpu.memory_space<vmem>>, vector<1x128xf32>
    %52 = vector.broadcast %51 : vector<1x128xf32> to vector<8x128xf32>
    %53 = arith.addf %50, %52 : vector<8x128xf32>
    %cst_40 = arith.constant 0.000000e+00 : f32
    %54 = vector.broadcast %cst_40 : f32 to vector<8x128xf32>
    %55 = arith.maximumf %53, %54 : vector<8x128xf32>
    %56 = arith.truncf %55 : vector<8x128xf32> to vector<8x128xbf16>
    %c0_41 = arith.constant 0 : index
    %c0_42 = arith.constant 0 : index
    %57 = vector.load %arg15[%c0_41, %c0_42] : memref<128x128xbf16, #tpu.memory_space<vmem>>, vector<128x128xbf16>
    %cst_43 = arith.constant dense<0.000000e+00> : vector<8x128xf32>
    %58 = tpu.matmul %56, %57, %cst_43 {dimension_numbers = #tpu.dot_dimension_numbers<[1], [0], [0], [1], [0, 0, 1, 1], [], []>} : vector<8x128xbf16>, vector<128x128xbf16>, vector<8x128xf32> -> vector<8x128xf32>
    %c0_44 = arith.constant 0 : index
    %c0_45 = arith.constant 0 : index
    %59 = vector.load %arg22[%c0_44, %c0_45] : memref<1x128xf32, #tpu.memory_space<vmem>>, vector<1x128xf32>
    %60 = vector.broadcast %59 : vector<1x128xf32> to vector<8x128xf32>
    %61 = arith.addf %58, %60 : vector<8x128xf32>
    %cst_46 = arith.constant 0.000000e+00 : f32
    %62 = vector.broadcast %cst_46 : f32 to vector<8x128xf32>
    %63 = arith.maximumf %61, %62 : vector<8x128xf32>
    %64 = arith.truncf %63 : vector<8x128xf32> to vector<8x128xbf16>
    %c0_47 = arith.constant 0 : index
    %c0_48 = arith.constant 0 : index
    %65 = vector.load %arg16[%c0_47, %c0_48] : memref<128x256xbf16, #tpu.memory_space<vmem>>, vector<128x256xbf16>
    %cst_49 = arith.constant dense<0.000000e+00> : vector<8x256xf32>
    %66 = tpu.matmul %64, %65, %cst_49 {dimension_numbers = #tpu.dot_dimension_numbers<[1], [0], [0], [1], [0, 0, 1, 1], [], []>} : vector<8x128xbf16>, vector<128x256xbf16>, vector<8x256xf32> -> vector<8x256xf32>
    %c0_50 = arith.constant 0 : index
    %c0_51 = arith.constant 0 : index
    %67 = vector.load %arg23[%c0_50, %c0_51] : memref<1x256xf32, #tpu.memory_space<vmem>>, vector<1x256xf32>
    %68 = vector.broadcast %67 : vector<1x256xf32> to vector<8x256xf32>
    %69 = arith.addf %66, %68 : vector<8x256xf32>
    %cst_52 = arith.constant 0.000000e+00 : f32
    %70 = vector.broadcast %cst_52 : f32 to vector<8x256xf32>
    %71 = arith.maximumf %69, %70 : vector<8x256xf32>
    %72 = arith.truncf %71 : vector<8x256xf32> to vector<8x256xbf16>
    %c0_53 = arith.constant 0 : index
    %c0_54 = arith.constant 0 : index
    %73 = vector.load %arg17[%c0_53, %c0_54] : memref<256x128xbf16, #tpu.memory_space<vmem>>, vector<256x128xbf16>
    %cst_55 = arith.constant dense<0.000000e+00> : vector<8x128xf32>
    %74 = tpu.matmul %72, %73, %cst_55 {dimension_numbers = #tpu.dot_dimension_numbers<[1], [0], [0], [1], [0, 0, 1, 1], [], []>} : vector<8x256xbf16>, vector<256x128xbf16>, vector<8x128xf32> -> vector<8x128xf32>
    %c0_56 = arith.constant 0 : index
    %c0_57 = arith.constant 0 : index
    %75 = vector.load %arg24[%c0_56, %c0_57] : memref<1x128xf32, #tpu.memory_space<vmem>>, vector<1x128xf32>
    %76 = vector.broadcast %75 : vector<1x128xf32> to vector<8x128xf32>
    %77 = arith.addf %74, %76 : vector<8x128xf32>
    %cst_58 = arith.constant 0.000000e+00 : f32
    %78 = vector.broadcast %cst_58 : f32 to vector<8x128xf32>
    %79 = arith.maximumf %77, %78 : vector<8x128xf32>
    %80 = arith.truncf %79 : vector<8x128xf32> to vector<8x128xbf16>
    %c0_59 = arith.constant 0 : index
    %c0_60 = arith.constant 0 : index
    %81 = vector.load %arg18[%c0_59, %c0_60] : memref<128x128xbf16, #tpu.memory_space<vmem>>, vector<128x128xbf16>
    %cst_61 = arith.constant dense<0.000000e+00> : vector<8x128xf32>
    %82 = tpu.matmul %80, %81, %cst_61 {dimension_numbers = #tpu.dot_dimension_numbers<[1], [0], [0], [1], [0, 0, 1, 1], [], []>} : vector<8x128xbf16>, vector<128x128xbf16>, vector<8x128xf32> -> vector<8x128xf32>
    %c0_62 = arith.constant 0 : index
    %c0_63 = arith.constant 0 : index
    %83 = vector.load %arg25[%c0_62, %c0_63] : memref<1x128xf32, #tpu.memory_space<vmem>>, vector<1x128xf32>
    %84 = vector.broadcast %83 : vector<1x128xf32> to vector<8x128xf32>
    %85 = arith.addf %82, %84 : vector<8x128xf32>
    %cst_64 = arith.constant 0.000000e+00 : f32
    %86 = vector.broadcast %cst_64 : f32 to vector<8x128xf32>
    %87 = arith.maximumf %85, %86 : vector<8x128xf32>
    %88 = arith.truncf %87 : vector<8x128xf32> to vector<8x128xbf16>
    %c0_65 = arith.constant 0 : index
    %c0_66 = arith.constant 0 : index
    %89 = vector.load %arg19[%c0_65, %c0_66] : memref<128x128xbf16, #tpu.memory_space<vmem>>, vector<128x128xbf16>
    %cst_67 = arith.constant dense<0.000000e+00> : vector<8x128xf32>
    %90 = tpu.matmul %88, %89, %cst_67 {dimension_numbers = #tpu.dot_dimension_numbers<[1], [0], [0], [1], [0, 0, 1, 1], [], []>} : vector<8x128xbf16>, vector<128x128xbf16>, vector<8x128xf32> -> vector<8x128xf32>
    %c0_68 = arith.constant 0 : index
    %c0_69 = arith.constant 0 : index
    %91 = vector.load %arg26[%c0_68, %c0_69] : memref<1x128xf32, #tpu.memory_space<vmem>>, vector<1x128xf32>
    %92 = vector.broadcast %91 : vector<1x128xf32> to vector<8x128xf32>
    %93 = arith.addf %90, %92 : vector<8x128xf32>
    %cst_70 = arith.constant 0.000000e+00 : f32
    %94 = vector.broadcast %cst_70 : f32 to vector<8x128xf32>
    %95 = arith.maximumf %93, %94 : vector<8x128xf32>
    %96 = arith.truncf %95 : vector<8x128xf32> to vector<8x128xbf16>
    %c0_71 = arith.constant 0 : index
    %c0_72 = arith.constant 0 : index
    %97 = vector.load %arg20[%c0_71, %c0_72] : memref<128x128xbf16, #tpu.memory_space<vmem>>, vector<128x128xbf16>
    %cst_73 = arith.constant dense<0.000000e+00> : vector<8x128xf32>
    %98 = tpu.matmul %96, %97, %cst_73 {dimension_numbers = #tpu.dot_dimension_numbers<[1], [0], [0], [1], [0, 0, 1, 1], [], []>} : vector<8x128xbf16>, vector<128x128xbf16>, vector<8x128xf32> -> vector<8x128xf32>
    %c0_74 = arith.constant 0 : index
    %c0_75 = arith.constant 0 : index
    %99 = vector.load %arg27[%c0_74, %c0_75] : memref<1x128xf32, #tpu.memory_space<vmem>>, vector<1x128xf32>
    %100 = vector.broadcast %99 : vector<1x128xf32> to vector<8x128xf32>
    %101 = arith.addf %98, %100 : vector<8x128xf32>
    %102 = tpu.iota {dimensions = array<i32: 1>} : vector<1x8xi32>
    %c8_i32 = arith.constant 8 : i32
    %103 = arith.muli %arg0, %c8_i32 : i32
    %104 = vector.broadcast %103 : i32 to vector<1x8xi32>
    %105 = arith.addi %102, %104 : vector<1x8xi32>
    %c4_i32 = arith.constant 4 : i32
    %106 = vector.broadcast %c4_i32 : i32 to vector<1x8xi32>
    %107 = arith.cmpi slt, %105, %106 : vector<1x8xi32>
    %108 = arith.extui %107 : vector<1x8xi1> to vector<1x8xi32>
    %109 = arith.sitofp %108 : vector<1x8xi32> to vector<1x8xf32>
    %cst_76 = arith.constant dense<0.000000e+00> : vector<1x128xf32>
    %110 = tpu.matmul %109, %48, %cst_76 {dimension_numbers = #tpu.dot_dimension_numbers<[1], [0], [0], [1], [0, 0, 1, 1], [], []>} : vector<1x8xf32>, vector<8x128xf32>, vector<1x128xf32> -> vector<1x128xf32>
    %111 = vector.shape_cast %110 : vector<1x128xf32> to vector<1x1x128xf32>
    %c0_77 = arith.constant 0 : index
    %c0_78 = arith.constant 0 : index
    %c0_79 = arith.constant 0 : index
    %112 = vector.load %arg28[%c0_77, %c0_78, %c0_79] : memref<1x1x128xf32, #tpu.memory_space<vmem>>, vector<1x1x128xf32>
    tpu.vector_store %arg28[%c0_77, %c0_78, %c0_79], %111 {strides = array<i32>} : memref<1x1x128xf32, #tpu.memory_space<vmem>>, vector<1x1x128xf32>,
    %c0_80 = arith.constant 0 : index
    %c0_81 = arith.constant 0 : index
    %113 = vector.load %arg29[%c0_80, %c0_81] : memref<8x128xf32, #tpu.memory_space<vmem>>, vector<8x128xf32>
    tpu.vector_store %arg29[%c0_80, %c0_81], %101 {strides = array<i32>} : memref<8x128xf32, #tpu.memory_space<vmem>>, vector<8x128xf32>,
    return
  }
  func.func @transform_0(%arg0: i32) -> (i32, i32) {
    %c0_i32 = arith.constant 0 : i32
    %c0_i32_0 = arith.constant 0 : i32
    return %arg0, %c0_i32 : i32, i32
  }
  func.func @transform_1(%arg0: i32) -> (i32, i32) {
    %c0_i32 = arith.constant 0 : i32
    %c0_i32_0 = arith.constant 0 : i32
    %c0_i32_1 = arith.constant 0 : i32
    return %c0_i32, %c0_i32_0 : i32, i32
  }
  func.func @transform_2(%arg0: i32) -> (i32, i32) {
    %c0_i32 = arith.constant 0 : i32
    %c0_i32_0 = arith.constant 0 : i32
    %c0_i32_1 = arith.constant 0 : i32
    return %c0_i32, %c0_i32_0 : i32, i32
  }
  func.func @transform_3(%arg0: i32) -> (i32, i32) {
    %c0_i32 = arith.constant 0 : i32
    %c0_i32_0 = arith.constant 0 : i32
    %c0_i32_1 = arith.constant 0 : i32
    return %c0_i32, %c0_i32_0 : i32, i32
  }
  func.func @transform_4(%arg0: i32) -> (i32, i32) {
    %c0_i32 = arith.constant 0 : i32
    %c0_i32_0 = arith.constant 0 : i32
    %c0_i32_1 = arith.constant 0 : i32
    return %c0_i32, %c0_i32_0 : i32, i32
  }
  func.func @transform_5(%arg0: i32) -> (i32, i32) {
    %c0_i32 = arith.constant 0 : i32
    %c0_i32_0 = arith.constant 0 : i32
    %c0_i32_1 = arith.constant 0 : i32
    return %c0_i32, %c0_i32_0 : i32, i32
  }
  func.func @transform_6(%arg0: i32) -> (i32, i32) {
    %c0_i32 = arith.constant 0 : i32
    %c0_i32_0 = arith.constant 0 : i32
    %c0_i32_1 = arith.constant 0 : i32
    return %c0_i32, %c0_i32_0 : i32, i32
  }
  func.func @transform_7(%arg0: i32) -> (i32, i32) {
    %c0_i32 = arith.constant 0 : i32
    %c0_i32_0 = arith.constant 0 : i32
    %c0_i32_1 = arith.constant 0 : i32
    return %c0_i32, %c0_i32_0 : i32, i32
  }
  func.func @transform_8(%arg0: i32) -> (i32, i32) {
    %c0_i32 = arith.constant 0 : i32
    %c0_i32_0 = arith.constant 0 : i32
    %c0_i32_1 = arith.constant 0 : i32
    return %c0_i32, %c0_i32_0 : i32, i32
  }
  func.func @transform_9(%arg0: i32) -> (i32, i32) {
    %c0_i32 = arith.constant 0 : i32
    %c0_i32_0 = arith.constant 0 : i32
    %c0_i32_1 = arith.constant 0 : i32
    return %c0_i32, %c0_i32_0 : i32, i32
  }
  func.func @transform_10(%arg0: i32) -> (i32, i32) {
    %c0_i32 = arith.constant 0 : i32
    %c0_i32_0 = arith.constant 0 : i32
    %c0_i32_1 = arith.constant 0 : i32
    return %c0_i32, %c0_i32_0 : i32, i32
  }
  func.func @transform_11(%arg0: i32) -> (i32, i32) {
    %c0_i32 = arith.constant 0 : i32
    %c0_i32_0 = arith.constant 0 : i32
    %c0_i32_1 = arith.constant 0 : i32
    return %c0_i32, %c0_i32_0 : i32, i32
  }
  func.func @transform_12(%arg0: i32) -> (i32, i32) {
    %c0_i32 = arith.constant 0 : i32
    %c0_i32_0 = arith.constant 0 : i32
    %c0_i32_1 = arith.constant 0 : i32
    return %c0_i32, %c0_i32_0 : i32, i32
  }
  func.func @transform_13(%arg0: i32) -> (i32, i32) {
    %c0_i32 = arith.constant 0 : i32
    %c0_i32_0 = arith.constant 0 : i32
    %c0_i32_1 = arith.constant 0 : i32
    return %c0_i32, %c0_i32_0 : i32, i32
  }
  func.func @transform_14(%arg0: i32) -> (i32, i32) {
    %c0_i32 = arith.constant 0 : i32
    %c0_i32_0 = arith.constant 0 : i32
    %c0_i32_1 = arith.constant 0 : i32
    return %c0_i32, %c0_i32_0 : i32, i32
  }
  func.func @transform_15(%arg0: i32) -> (i32, i32) {
    %c0_i32 = arith.constant 0 : i32
    %c0_i32_0 = arith.constant 0 : i32
    %c0_i32_1 = arith.constant 0 : i32
    return %c0_i32, %c0_i32_0 : i32, i32
  }
  func.func @transform_16(%arg0: i32) -> (i32, i32) {
    %c0_i32 = arith.constant 0 : i32
    %c0_i32_0 = arith.constant 0 : i32
    %c0_i32_1 = arith.constant 0 : i32
    return %c0_i32, %c0_i32_0 : i32, i32
  }
  func.func @transform_17(%arg0: i32) -> (i32, i32) {
    %c0_i32 = arith.constant 0 : i32
    %c0_i32_0 = arith.constant 0 : i32
    %c0_i32_1 = arith.constant 0 : i32
    return %c0_i32, %c0_i32_0 : i32, i32
  }
  func.func @transform_18(%arg0: i32) -> (i32, i32) {
    %c0_i32 = arith.constant 0 : i32
    %c0_i32_0 = arith.constant 0 : i32
    %c0_i32_1 = arith.constant 0 : i32
    return %c0_i32, %c0_i32_0 : i32, i32
  }
  func.func @transform_19(%arg0: i32) -> (i32, i32) {
    %c0_i32 = arith.constant 0 : i32
    %c0_i32_0 = arith.constant 0 : i32
    %c0_i32_1 = arith.constant 0 : i32
    return %c0_i32, %c0_i32_0 : i32, i32
  }
  func.func @transform_20(%arg0: i32) -> (i32, i32) {
    %c0_i32 = arith.constant 0 : i32
    %c0_i32_0 = arith.constant 0 : i32
    %c0_i32_1 = arith.constant 0 : i32
    return %c0_i32, %c0_i32_0 : i32, i32
  }
  func.func @transform_21(%arg0: i32) -> (i32, i32) {
    %c0_i32 = arith.constant 0 : i32
    %c0_i32_0 = arith.constant 0 : i32
    %c0_i32_1 = arith.constant 0 : i32
    return %c0_i32, %c0_i32_0 : i32, i32
  }
  func.func @transform_22(%arg0: i32) -> (i32, i32) {
    %c0_i32 = arith.constant 0 : i32
    %c0_i32_0 = arith.constant 0 : i32
    %c0_i32_1 = arith.constant 0 : i32
    return %c0_i32, %c0_i32_0 : i32, i32
  }
  func.func @transform_23(%arg0: i32) -> (i32, i32) {
    %c0_i32 = arith.constant 0 : i32
    %c0_i32_0 = arith.constant 0 : i32
    %c0_i32_1 = arith.constant 0 : i32
    return %c0_i32, %c0_i32_0 : i32, i32
  }
  func.func @transform_24(%arg0: i32) -> (i32, i32) {
    %c0_i32 = arith.constant 0 : i32
    %c0_i32_0 = arith.constant 0 : i32
    %c0_i32_1 = arith.constant 0 : i32
    return %c0_i32, %c0_i32_0 : i32, i32
  }
  func.func @transform_25(%arg0: i32) -> (i32, i32) {
    %c0_i32 = arith.constant 0 : i32
    %c0_i32_0 = arith.constant 0 : i32
    %c0_i32_1 = arith.constant 0 : i32
    return %c0_i32, %c0_i32_0 : i32, i32
  }
  func.func @transform_26(%arg0: i32) -> (i32, i32) {
    %c0_i32 = arith.constant 0 : i32
    %c0_i32_0 = arith.constant 0 : i32
    %c0_i32_1 = arith.constant 0 : i32
    return %c0_i32, %c0_i32_0 : i32, i32
  }
  func.func @transform_27(%arg0: i32) -> (i32, i32, i32) {
    %c0_i32 = arith.constant 0 : i32
    %c0_i32_0 = arith.constant 0 : i32
    %c0_i32_1 = arith.constant 0 : i32
    return %arg0, %c0_i32, %c0_i32_0 : i32, i32, i32
  }
  func.func @transform_28(%arg0: i32) -> (i32, i32) {
    %c0_i32 = arith.constant 0 : i32
    %c0_i32_0 = arith.constant 0 : i32
    return %arg0, %c0_i32 : i32, i32
  }
}

</mosaic_0001>

<bundles_post_ra>
// kernel: tpu_custom_call.1
= control target key start
LH: loop header
LB: loop body
LE: loop exit
PB: predicated region body
PF: predicated region fallthrough
CT: control target
= control target key end

     0   :  { %s3848_s0 = inlined_call_operand.hbm [shape: bf16[8,128], index: 0, kind: input, shape index: {}]   ;;  %s3849_s1 = inlined_call_operand.hbm [shape: bf16[128,256], index: 1, kind: input, shape index: {}]   ;;  %s3850_s2 = inlined_call_operand.hbm [shape: f32[1,256], index: 2, kind: input, shape index: {}]   ;;  %s3851_s3 = inlined_call_operand.hbm [shape: bf16[128,128], index: 3, kind: input, shape index: {}]   ;;  %s3852_s4 = inlined_call_operand.hbm [shape: bf16[128,128], index: 4, kind: input, shape index: {}]   ;;  %s3853_s5 = inlined_call_operand.hbm [shape: bf16[128,128], index: 5, kind: input, shape index: {}]   ;;  %s3854_s6 = inlined_call_operand.hbm [shape: bf16[128,128], index: 6, kind: input, shape index: {}]   ;;  %s3855_s7 = inlined_call_operand.hbm [shape: bf16[128,128], index: 7, kind: input, shape index: {}]   ;;  %s3856_s8 = inlined_call_operand.hbm [shape: f32[1,128], index: 8, kind: input, shape index: {}]   ;;  %s3857_s9 = inlined_call_operand.hbm [shape: f32[1,128], index: 9, kind: input, shape index: {}]   ;;  %s3858_s10 = inlined_call_operand.hbm [shape: f32[1,128], index: 10, kind: input, shape index: {}]   ;;  %s3859_s11 = inlined_call_operand.hbm [shape: f32[1,128], index: 11, kind: input, shape index: {}]   ;;  %s3860_s12 = inlined_call_operand.hbm [shape: f32[1,128], index: 12, kind: input, shape index: {}]   ;;  %s3861_s13 = inlined_call_operand.hbm [shape: bf16[128,128], index: 13, kind: input, shape index: {}]   ;;  %s3862_s14 = inlined_call_operand.hbm [shape: bf16[128,128], index: 14, kind: input, shape index: {}]   ;;  %s3863_s15 = inlined_call_operand.hbm [shape: bf16[128,256], index: 15, kind: input, shape index: {}]   ;;  %s3864_s16 = inlined_call_operand.hbm [shape: bf16[256,128], index: 16, kind: input, shape index: {}]   ;;  %s3865_s17 = inlined_call_operand.vmem [shape: bf16[128,128], index: 17, kind: input, shape index: {}]   ;;  %s3866_s18 = inlined_call_operand.hbm [shape: bf16[128,128], index: 18, kind: input, shape index: {}]   ;;  %s3867_s19 = inlined_call_operand.hbm [shape: bf16[128,128], index: 19, kind: input, shape index: {}]   ;;  %s3868_s20 = inlined_call_operand.vmem [shape: f32[1,128], index: 20, kind: input, shape index: {}]   ;;  %s3869_s21 = inlined_call_operand.vmem [shape: f32[1,128], index: 21, kind: input, shape index: {}]   ;;  %s3870_s22 = inlined_call_operand.vmem [shape: f32[1,256], index: 22, kind: input, shape index: {}]   ;;  %s3871_s23 = inlined_call_operand.vmem [shape: f32[1,128], index: 23, kind: input, shape index: {}]   ;;  %s3872_s24 = inlined_call_operand.vmem [shape: f32[1,128], index: 24, kind: input, shape index: {}]   ;;  %s3873_s25 = inlined_call_operand.vmem [shape: f32[1,128], index: 25, kind: input, shape index: {}]   ;;  %s3874_s26 = inlined_call_operand.vmem [shape: f32[1,128], index: 26, kind: input, shape index: {}]   ;;  %s3875_s27 = inlined_call_operand.hbm [shape: f32[1,1,128], index: 27, kind: output, shape index: {0}]   ;;  %s3876_s28 = inlined_call_operand.hbm [shape: f32[8,128], index: 28, kind: output, shape index: {1}]  }
   0x1   :  { %3894 = sst [smem:[#allocation47_spill]] %s3848_s0 }
   0x2   :  { %3895 = sst [smem:[#allocation48_spill]] %s3849_s1 }
   0x3   :  { %3896 = sst [smem:[#allocation49_spill]] %s3850_s2 }
   0x4   :  { %3897 = sst [smem:[#allocation50_spill]] %s3851_s3 }
   0x5   :  { %3898 = sst [smem:[#allocation51_spill]] %s3852_s4 }
   0x6   :  { %3899 = sst [smem:[#allocation52_spill]] %s3853_s5 }
   0x7   :  { %3900 = sst [smem:[#allocation53_spill]] %s3854_s6 }
   0x8   :  { %3901 = sst [smem:[#allocation54_spill]] %s3855_s7 }
   0x9   :  { %3902 = sst [smem:[#allocation55_spill]] %s3856_s8 }
   0xa   :  { %3903 = sst [smem:[#allocation56_spill]] %s3857_s9 }
   0xb   :  { %3904 = sst [smem:[#allocation57_spill]] %s3858_s10 }
   0xc   :  { %3905 = sst [smem:[#allocation58_spill]] %s3859_s11 }
   0xd   :  { %3906 = sst [smem:[#allocation59_spill]] %s3860_s12 }
   0xe   :  { %3907 = sst [smem:[#allocation60_spill]] %s3874_s26 }
   0xf   :  { %3908 = sst [smem:[#allocation61_spill]] %s3875_s27 }
  0x10   :  { %3909 = sst [smem:[#allocation62_spill]] %s3876_s28 }
  0x11   :  { %34 = vsyncpa [#allocation3], 0 }
  0x12   :  { %35 = vsyncpa [#allocation6], 0 }
  0x13   :  { %36 = vsyncpa [#allocation9], 0 }
  0x14   :  { %37 = vsyncpa [#allocation12], 0 }
  0x15   :  { %38 = vsyncpa [#allocation15], 0 }
  0x16   :  { %39 = vsyncpa [#allocation18], 0 }
  0x17   :  { %40 = vsyncpa [#allocation21], 0 }
  0x18   :  { %41 = vsyncpa [#allocation24], 0 }
  0x19   :  { %42 = vsyncpa [#allocation27], 0 }
  0x1a   :  { %43 = vsyncpa [#allocation30], 0 }
  0x1b   :  { %44 = vsyncpa [#allocation4], 0 }
  0x1c   :  { %45 = vsyncpa [#allocation34], 0  ;;  %s3184_s8 = smov [#allocation5]   ;;  %s3910_s3 = sld [smem:[#allocation48_spill]] }
  0x1d   :  { %s61_s5 = sshll.u32 %s3184_s8, 4  ;;  %s62_s5 = int_to_ptr.vmem [resolvable:$true] %s61_s5 }
  0x22   :  { %s2698_s6 = scalar_lea.hbm %s3910_s3, 2048 }
  0x23   :  { %p2699_p0 = scmp.ne.s32.totalorder %s3910_s3, %s2698_s6  ;;  %p2702_p1 = scmp.lt.u32.totalorder %s2698_s6, %s3910_s3 }
  0x25   :  { %p2704_p2 = pnand %p2702_p1, %p2699_p0 }
  0x27   :  { %2707 = shalt.err (!%p2704_p2)
}
  0x28   :  { %s2708_s2 = scalar_lea.vmem %s62_s5, 2048  ;;  %p2713_p4 = scmp.lt.s32.totalorder %s62_s5, %s62_s5 }
  0x29   :  { %p2709_p3 = scmp.ne.s32.totalorder %s62_s5, %s2708_s2  ;;  %p2714_p5 = scmp.lt.s32.totalorder %s2708_s2, %s2708_s2 }
  0x2b   :  { %p2715_p6 = por %p2714_p5, %p2713_p4 }
  0x2d   :  { %p2716_p7 = pnand %p2715_p6, %p2709_p3 }
  0x2f   :  { %2719 = shalt.err (!%p2716_p7)
}
  0x30   :  { %s3891_s7 = smov 128   ;;  %s3892_s12 = smov 8  }
  0x31   :  { %67 = dma.hbm_to_vmem [thread:$0]  %s3910_s3, 2048, %s62_s5, [#allocation6], %s3891_s7, %s3891_s7, %s3892_s12  }
  0x32   :  { %s3187_s8 = smov [#allocation8]   ;;  %s3911_s10 = sld [smem:[#allocation50_spill]] }
  0x33   :  { %s83_s9 = sshll.u32 %s3187_s8, 4  ;;  %s84_s9 = int_to_ptr.vmem [resolvable:$true] %s83_s9 }
  0x38   :  { %s2720_s0 = scalar_lea.hbm %s3911_s10, 1024 }
  0x39   :  { %p2721_p8 = scmp.ne.s32.totalorder %s3911_s10, %s2720_s0  ;;  %p2724_p9 = scmp.lt.u32.totalorder %s2720_s0, %s3911_s10 }
  0x3b   :  { %p2726_p10 = pnand %p2724_p9, %p2721_p8 }
  0x3d   :  { %2729 = shalt.err (!%p2726_p10)
}
  0x3e   :  { %s2730_s26 = scalar_lea.vmem %s84_s9, 1024  ;;  %p2735_p12 = scmp.lt.s32.totalorder %s84_s9, %s84_s9 }
  0x3f   :  { %p2731_p11 = scmp.ne.s32.totalorder %s84_s9, %s2730_s26  ;;  %p2736_p13 = scmp.lt.s32.totalorder %s2730_s26, %s2730_s26 }
  0x41   :  { %p2737_p0 = por %p2736_p13, %p2735_p12 }
  0x43   :  { %p2738_p1 = pnand %p2737_p0, %p2731_p11 }
  0x45   :  { %2741 = shalt.err (!%p2738_p1)
}
  0x46   :  { %s3188_s5 = smov 64   ;;  %s3189_s3 = smov 4  }
  0x47   :  { %89 = dma.hbm_to_vmem [thread:$0]  %s3911_s10, 1024, %s84_s9, [#allocation9], %s3188_s5, %s3188_s5, %s3189_s3  }
  0x48   :  { %s3190_s28 = smov [#allocation11]   ;;  %s3191_s30 = smov [#allocation14]  }
  0x49   :  { %s107_s8 = sshll.u32 %s3190_s28, 4  ;;  %s131_s6 = sshll.u32 %s3191_s30, 4  ;;  %s108_s8 = int_to_ptr.vmem [resolvable:$true] %s107_s8  ;;  %s3387_s6 = int_to_ptr.vmem [resolvable:$true] %s131_s6 }
  0x4a   :  { %s3912_s11 = sld [smem:[#allocation52_spill]] }
  0x50   :  { %s2742_s29 = scalar_lea.hbm %s3912_s11, 1024 }
  0x51   :  { %p2743_p2 = scmp.ne.s32.totalorder %s3912_s11, %s2742_s29  ;;  %p2746_p3 = scmp.lt.u32.totalorder %s2742_s29, %s3912_s11 }
  0x53   :  { %p2748_p4 = pnand %p2746_p3, %p2743_p2 }
  0x55   :  { %2751 = shalt.err (!%p2748_p4)
}
  0x56   :  { %s2752_s9 = scalar_lea.vmem %s108_s8, 1024  ;;  %p2757_p6 = scmp.lt.s32.totalorder %s108_s8, %s108_s8 }
  0x57   :  { %p2753_p5 = scmp.ne.s32.totalorder %s108_s8, %s2752_s9  ;;  %p2758_p7 = scmp.lt.s32.totalorder %s2752_s9, %s2752_s9 }
  0x59   :  { %p2759_p8 = por %p2758_p7, %p2757_p6 }
  0x5b   :  { %p2760_p9 = pnand %p2759_p8, %p2753_p5 }
  0x5d   :  { %2763 = shalt.err (!%p2760_p9)
}
  0x5e   :  { %113 = dma.hbm_to_vmem [thread:$0]  %s3912_s11, 1024, %s108_s8, [#allocation12], %s3188_s5, %s3188_s5, %s3189_s3  }
  0x5f   :  { %s3913_s27 = sld [smem:[#allocation54_spill]] }
  0x65   :  { %s2764_s12 = scalar_lea.hbm %s3913_s27, 1024 }
  0x66   :  { %p2765_p10 = scmp.ne.s32.totalorder %s3913_s27, %s2764_s12  ;;  %p2768_p11 = scmp.lt.u32.totalorder %s2764_s12, %s3913_s27 }
  0x68   :  { %p2770_p12 = pnand %p2768_p11, %p2765_p10 }
  0x6a   :  { %2773 = shalt.err (!%p2770_p12)
}
  0x6b   :  { %s2774_s29 = scalar_lea.vmem %s3387_s6, 1024  ;;  %p2779_p0 = scmp.lt.s32.totalorder %s3387_s6, %s3387_s6 }
  0x6c   :  { %p2775_p13 = scmp.ne.s32.totalorder %s3387_s6, %s2774_s29  ;;  %p2780_p1 = scmp.lt.s32.totalorder %s2774_s29, %s2774_s29 }
  0x6e   :  { %p2781_p2 = por %p2780_p1, %p2779_p0 }
  0x70   :  { %p2782_p3 = pnand %p2781_p2, %p2775_p13 }
  0x72   :  { %2785 = shalt.err (!%p2782_p3)
}
  0x73   :  { %137 = dma.hbm_to_vmem [thread:$0]  %s3913_s27, 1024, %s3387_s6, [#allocation15], %s3188_s5, %s3188_s5, %s3189_s3  }
  0x74   :  { %s3192_s2 = smov [#allocation17]   ;;  %s3193_s10 = smov [#allocation20]  }
  0x75   :  { %s154_s9 = sshll.u32 %s3192_s2, 4  ;;  %s174_s1 = sshll.u32 %s3193_s10, 4  ;;  %s155_s9 = int_to_ptr.vmem [resolvable:$true] %s154_s9  ;;  %s175_s1 = int_to_ptr.vmem [resolvable:$true] %s174_s1 }
  0x76   :  { %s3914_s12 = sld [smem:[#allocation56_spill]] }
  0x7c   :  { %s2786_s28 = scalar_lea.hbm %s3914_s12, 16 }
  0x7d   :  { %p2787_p4 = scmp.ne.s32.totalorder %s3914_s12, %s2786_s28  ;;  %p2790_p5 = scmp.lt.u32.totalorder %s2786_s28, %s3914_s12 }
  0x7f   :  { %p2792_p6 = pnand %p2790_p5, %p2787_p4 }
  0x81   :  { %2795 = shalt.err (!%p2792_p6)
}
  0x82   :  { %s2796_s6 = scalar_lea.vmem %s155_s9, 16  ;;  %s2800_s27 = scalar_lea.vmem %s155_s9, 32 }
  0x83   :  { %p2797_p7 = scmp.ne.s32.totalorder %s155_s9, %s2796_s6  ;;  %p2801_p8 = scmp.lt.s32.totalorder %s155_s9, %s155_s9 }
  0x84   :  { %p2802_p9 = scmp.lt.s32.totalorder %s2800_s27, %s2796_s6 }
  0x86   :  { %p2803_p10 = por %p2802_p9, %p2801_p8 }
  0x88   :  { %p2804_p11 = pnand %p2803_p10, %p2797_p7 }
  0x8a   :  { %2807 = shalt.err (!%p2804_p11)
}
  0x8b   :  { %157 = dma.hbm_to_vmem [thread:$0]  %s3914_s12, 16, %s155_s9, [#allocation18]  }
  0x8c   :  { %s3915_s7 = sld [smem:[#allocation58_spill]] }
  0x92   :  { %s2808_s4 = scalar_lea.hbm %s3915_s7, 16 }
  0x93   :  { %p2809_p12 = scmp.ne.s32.totalorder %s3915_s7, %s2808_s4  ;;  %p2812_p13 = scmp.lt.u32.totalorder %s2808_s4, %s3915_s7 }
  0x95   :  { %p2814_p0 = pnand %p2812_p13, %p2809_p12 }
  0x97   :  { %2817 = shalt.err (!%p2814_p0)
}
  0x98   :  { %s2818_s29 = scalar_lea.vmem %s175_s1, 16  ;;  %s2822_s6 = scalar_lea.vmem %s175_s1, 32 }
  0x99   :  { %p2819_p1 = scmp.ne.s32.totalorder %s175_s1, %s2818_s29  ;;  %p2823_p2 = scmp.lt.s32.totalorder %s175_s1, %s175_s1 }
  0x9a   :  { %p2824_p3 = scmp.lt.s32.totalorder %s2822_s6, %s2818_s29 }
  0x9c   :  { %p2825_p4 = por %p2824_p3, %p2823_p2 }
  0x9e   :  { %p2826_p5 = pnand %p2825_p4, %p2819_p1 }
  0xa0   :  { %2829 = shalt.err (!%p2826_p5)
}
  0xa1   :  { %177 = dma.hbm_to_vmem [thread:$0]  %s3915_s7, 16, %s175_s1, [#allocation21]  }
  0xa2   :  { %s3194_s27 = smov [#allocation23]   ;;  %s3195_s11 = smov [#allocation26]  }
  0xa3   :  { %s193_s8 = sshll.u32 %s3194_s27, 4  ;;  %s217_s2 = sshll.u32 %s3195_s11, 4  ;;  %s194_s8 = int_to_ptr.vmem [resolvable:$true] %s193_s8  ;;  %s3448_s2 = int_to_ptr.vmem [resolvable:$true] %s217_s2 }
  0xa4   :  { %s2830_s30 = scalar_lea.hbm %s3861_s13, 1024 }
  0xa5   :  { %p2831_p6 = scmp.ne.s32.totalorder %s3861_s13, %s2830_s30  ;;  %p2834_p7 = scmp.lt.u32.totalorder %s2830_s30, %s3861_s13 }
  0xa7   :  { %p2836_p8 = pnand %p2834_p7, %p2831_p6 }
  0xa9   :  { %2839 = shalt.err (!%p2836_p8)
}
  0xaa   :  { %s2840_s1 = scalar_lea.vmem %s194_s8, 1024  ;;  %p2845_p10 = scmp.lt.s32.totalorder %s194_s8, %s194_s8 }
  0xab   :  { %p2841_p9 = scmp.ne.s32.totalorder %s194_s8, %s2840_s1  ;;  %p2846_p11 = scmp.lt.s32.totalorder %s2840_s1, %s2840_s1 }
  0xad   :  { %p2847_p12 = por %p2846_p11, %p2845_p10 }
  0xaf   :  { %p2848_p13 = pnand %p2847_p12, %p2841_p9 }
  0xb1   :  { %2851 = shalt.err (!%p2848_p13)
}
  0xb2   :  { %199 = dma.hbm_to_vmem [thread:$0]  %s3861_s13, 1024, %s194_s8, [#allocation24], %s3188_s5, %s3188_s5, %s3189_s3  }
  0xb3   :  { %s2852_s27 = scalar_lea.hbm %s3863_s15, 2048 }
  0xb4   :  { %p2853_p0 = scmp.ne.s32.totalorder %s3863_s15, %s2852_s27  ;;  %p2856_p1 = scmp.lt.u32.totalorder %s2852_s27, %s3863_s15 }
  0xb6   :  { %p2858_p2 = pnand %p2856_p1, %p2853_p0 }
  0xb8   :  { %2861 = shalt.err (!%p2858_p2)
}
  0xb9   :  { %s2862_s28 = scalar_lea.vmem %s3448_s2, 2048  ;;  %p2867_p4 = scmp.lt.s32.totalorder %s3448_s2, %s3448_s2 }
  0xba   :  { %p2863_p3 = scmp.ne.s32.totalorder %s3448_s2, %s2862_s28  ;;  %p2868_p5 = scmp.lt.s32.totalorder %s2862_s28, %s2862_s28 }
  0xbc   :  { %p2869_p6 = por %p2868_p5, %p2867_p4 }
  0xbe   :  { %p2870_p7 = pnand %p2869_p6, %p2863_p3 }
  0xc0   :  { %2873 = shalt.err (!%p2870_p7)
}
  0xc1   :  { %s3916_s13 = smov 8   ;;  %s3917_s8 = smov 128  }
  0xc2   :  { %223 = dma.hbm_to_vmem [thread:$0]  %s3863_s15, 2048, %s3448_s2, [#allocation27], %s3917_s8, %s3917_s8, %s3916_s13  }
  0xc3   :  { %s3196_s29 = smov [#allocation29]   ;;  %s3197_s7 = smov [#allocation2]  }
  0xc4   :  { %s243_s1 = sshll.u32 %s3196_s29, 4  ;;  %s52_s6 = sshll.u32 %s3197_s7, 4  ;;  %s244_s1 = int_to_ptr.vmem [resolvable:$true] %s243_s1  ;;  %s53_s6 = int_to_ptr.vmem [resolvable:$true] %s52_s6 }
  0xc5   :  { %s2874_s27 = scalar_lea.hbm %s3866_s18, 1024 }
  0xc6   :  { %p2875_p8 = scmp.ne.s32.totalorder %s3866_s18, %s2874_s27  ;;  %p2878_p9 = scmp.lt.u32.totalorder %s2874_s27, %s3866_s18 }
  0xc8   :  { %p2880_p10 = pnand %p2878_p9, %p2875_p8 }
  0xca   :  { %2883 = shalt.err (!%p2880_p10)
}
  0xcb   :  { %s2884_s15 = scalar_lea.vmem %s244_s1, 1024  ;;  %p2889_p12 = scmp.lt.s32.totalorder %s244_s1, %s244_s1 }
  0xcc   :  { %p2885_p11 = scmp.ne.s32.totalorder %s244_s1, %s2884_s15  ;;  %p2890_p13 = scmp.lt.s32.totalorder %s2884_s15, %s2884_s15 }
  0xce   :  { %p2891_p0 = por %p2890_p13, %p2889_p12 }
  0xd0   :  { %p2892_p1 = pnand %p2891_p0, %p2885_p11 }
  0xd2   :  { %2895 = shalt.err (!%p2892_p1)
}
  0xd3   :  { %249 = dma.hbm_to_vmem [thread:$0]  %s3866_s18, 1024, %s244_s1, [#allocation30], %s3188_s5, %s3188_s5, %s3189_s3  }
  0xd4   :  { %s3918_s26 = sld [smem:[#allocation47_spill]] }
  0xda   :  { %s2896_s0 = scalar_lea.hbm %s3918_s26, 64 }
  0xdb   :  { %p2897_p2 = scmp.ne.s32.totalorder %s3918_s26, %s2896_s0  ;;  %p2900_p3 = scmp.lt.u32.totalorder %s2896_s0, %s3918_s26 }
  0xdd   :  { %p2902_p4 = pnand %p2900_p3, %p2897_p2 }
  0xdf   :  { %2905 = shalt.err (!%p2902_p4)
}
  0xe0   :  { %s2906_s27 = scalar_lea.vmem %s53_s6, 64  ;;  %p2911_p6 = scmp.lt.s32.totalorder %s53_s6, %s53_s6 }
  0xe1   :  { %p2907_p5 = scmp.ne.s32.totalorder %s53_s6, %s2906_s27  ;;  %p2912_p7 = scmp.lt.s32.totalorder %s2906_s27, %s2906_s27 }
  0xe3   :  { %p2913_p8 = por %p2912_p7, %p2911_p6 }
  0xe5   :  { %p2914_p9 = pnand %p2913_p8, %p2907_p5 }
  0xe7   :  { %2917 = shalt.err (!%p2914_p9)
}
  0xe8   :  { %55 = dma.hbm_to_vmem [thread:$0]  %s3918_s26, 64, %s53_s6, [#allocation3]  }
  0xe9   :  { %s3198_s11 = smov [#allocation7]   ;;  %s3199_s4 = smov [#allocation10]  }
  0xea   :  { %s74_s10 = sshll.u32 %s3198_s11, 4  ;;  %s95_s30 = sshll.u32 %s3199_s4, 4  ;;  %s75_s10 = int_to_ptr.vmem [resolvable:$true] %s74_s10  ;;  %s3512_s30 = int_to_ptr.vmem [resolvable:$true] %s95_s30 }
  0xeb   :  { %s3919_s28 = sld [smem:[#allocation49_spill]] }
  0xf1   :  { %s2918_s13 = scalar_lea.hbm %s3919_s28, 32 }
  0xf2   :  { %p2919_p10 = scmp.ne.s32.totalorder %s3919_s28, %s2918_s13  ;;  %p2922_p11 = scmp.lt.u32.totalorder %s2918_s13, %s3919_s28 }
  0xf4   :  { %p2924_p12 = pnand %p2922_p11, %p2919_p10 }
  0xf6   :  { %2927 = shalt.err (!%p2924_p12)
}
  0xf7   :  { %s2928_s6 = scalar_lea.vmem %s75_s10, 32  ;;  %p2933_p0 = scmp.lt.s32.totalorder %s75_s10, %s75_s10 }
  0xf8   :  { %p2929_p13 = scmp.ne.s32.totalorder %s75_s10, %s2928_s6  ;;  %p2934_p1 = scmp.lt.s32.totalorder %s2928_s6, %s2928_s6 }
  0xfa   :  { %p2935_p2 = por %p2934_p1, %p2933_p0 }
  0xfc   :  { %p2936_p3 = pnand %p2935_p2, %p2929_p13 }
  0xfe   :  { %2939 = shalt.err (!%p2936_p3)
}
  0xff   :  { %77 = dma.hbm_to_vmem [thread:$0]  %s3919_s28, 32, %s75_s10, [#allocation6]  }
 0x100   :  { %s3920_s18 = sld [smem:[#allocation51_spill]] }
 0x106   :  { %s2940_s1 = scalar_lea.hbm %s3920_s18, 1024 }
 0x107   :  { %p2941_p4 = scmp.ne.s32.totalorder %s3920_s18, %s2940_s1  ;;  %p2944_p5 = scmp.lt.u32.totalorder %s2940_s1, %s3920_s18 }
 0x109   :  { %p2946_p6 = pnand %p2944_p5, %p2941_p4 }
 0x10b   :  { %2949 = shalt.err (!%p2946_p6)
}
 0x10c   :  { %s2950_s13 = scalar_lea.vmem %s3512_s30, 1024  ;;  %p2955_p8 = scmp.lt.s32.totalorder %s3512_s30, %s3512_s30 }
 0x10d   :  { %p2951_p7 = scmp.ne.s32.totalorder %s3512_s30, %s2950_s13  ;;  %p2956_p9 = scmp.lt.s32.totalorder %s2950_s13, %s2950_s13 }
 0x10f   :  { %p2957_p10 = por %p2956_p9, %p2955_p8 }
 0x111   :  { %p2958_p11 = pnand %p2957_p10, %p2951_p7 }
 0x113   :  { %2961 = shalt.err (!%p2958_p11)
}
 0x114   :  { %101 = dma.hbm_to_vmem [thread:$0]  %s3920_s18, 1024, %s3512_s30, [#allocation9], %s3188_s5, %s3188_s5, %s3189_s3  }
 0x115   :  { %s3200_s8 = smov [#allocation13]   ;;  %s3201_s29 = smov [#allocation16]  }
 0x116   :  { %s119_s0 = sshll.u32 %s3200_s8, 4  ;;  %s144_s7 = sshll.u32 %s3201_s29, 4  ;;  %s120_s0 = int_to_ptr.vmem [resolvable:$true] %s119_s0  ;;  %s145_s7 = int_to_ptr.vmem [resolvable:$true] %s144_s7 }
 0x117   :  { %s3921_s9 = sld [smem:[#allocation53_spill]] }
 0x11d   :  { %s2962_s12 = scalar_lea.hbm %s3921_s9, 1024 }
 0x11e   :  { %p2963_p12 = scmp.ne.s32.totalorder %s3921_s9, %s2962_s12  ;;  %p2966_p13 = scmp.lt.u32.totalorder %s2962_s12, %s3921_s9 }
 0x120   :  { %p2968_p0 = pnand %p2966_p13, %p2963_p12 }
 0x122   :  { %2971 = shalt.err (!%p2968_p0)
}
 0x123   :  { %s2972_s30 = scalar_lea.vmem %s120_s0, 1024  ;;  %p2977_p2 = scmp.lt.s32.totalorder %s120_s0, %s120_s0 }
 0x124   :  { %p2973_p1 = scmp.ne.s32.totalorder %s120_s0, %s2972_s30  ;;  %p2978_p3 = scmp.lt.s32.totalorder %s2972_s30, %s2972_s30 }
 0x126   :  { %p2979_p4 = por %p2978_p3, %p2977_p2 }
 0x128   :  { %p2980_p5 = pnand %p2979_p4, %p2973_p1 }
 0x12a   :  { %2983 = shalt.err (!%p2980_p5)
}
 0x12b   :  { %125 = dma.hbm_to_vmem [thread:$0]  %s3921_s9, 1024, %s120_s0, [#allocation12], %s3188_s5, %s3188_s5, %s3189_s3  }
 0x12c   :  { %s3922_s10 = sld [smem:[#allocation55_spill]] }
 0x132   :  { %s2984_s28 = scalar_lea.hbm %s3922_s10, 16 }
 0x133   :  { %p2985_p6 = scmp.ne.s32.totalorder %s3922_s10, %s2984_s28  ;;  %p2988_p7 = scmp.lt.u32.totalorder %s2984_s28, %s3922_s10 }
 0x135   :  { %p2990_p8 = pnand %p2988_p7, %p2985_p6 }
 0x137   :  { %2993 = shalt.err (!%p2990_p8)
}
 0x138   :  { %s2994_s12 = scalar_lea.vmem %s145_s7, 16  ;;  %s2998_s27 = scalar_lea.vmem %s145_s7, 32 }
 0x139   :  { %p2995_p9 = scmp.ne.s32.totalorder %s145_s7, %s2994_s12  ;;  %p2999_p10 = scmp.lt.s32.totalorder %s145_s7, %s145_s7 }
 0x13a   :  { %p3000_p11 = scmp.lt.s32.totalorder %s2998_s27, %s2994_s12 }
 0x13c   :  { %p3001_p12 = por %p3000_p11, %p2999_p10 }
 0x13e   :  { %p3002_p13 = pnand %p3001_p12, %p2995_p9 }
 0x140   :  { %3005 = shalt.err (!%p3002_p13)
}
 0x141   :  { %147 = dma.hbm_to_vmem [thread:$0]  %s3922_s10, 16, %s145_s7, [#allocation15]  }
 0x142   :  { %s3202_s1 = smov [#allocation19]   ;;  %s3203_s4 = smov [#allocation22]  }
 0x143   :  { %s164_s11 = sshll.u32 %s3202_s1, 4  ;;  %s184_s30 = sshll.u32 %s3203_s4, 4  ;;  %s165_s11 = int_to_ptr.vmem [resolvable:$true] %s164_s11  ;;  %s185_s30 = int_to_ptr.vmem [resolvable:$true] %s184_s30 }
 0x144   :  { %s3923_s2 = sld [smem:[#allocation57_spill]] }
 0x14a   :  { %s3006_s13 = scalar_lea.hbm %s3923_s2, 16 }
 0x14b   :  { %p3007_p0 = scmp.ne.s32.totalorder %s3923_s2, %s3006_s13  ;;  %p3010_p1 = scmp.lt.u32.totalorder %s3006_s13, %s3923_s2 }
 0x14d   :  { %p3012_p2 = pnand %p3010_p1, %p3007_p0 }
 0x14f   :  { %3015 = shalt.err (!%p3012_p2)
}
 0x150   :  { %s3016_s7 = scalar_lea.vmem %s165_s11, 16  ;;  %s3020_s10 = scalar_lea.vmem %s165_s11, 32 }
 0x151   :  { %p3017_p3 = scmp.ne.s32.totalorder %s165_s11, %s3016_s7  ;;  %p3021_p4 = scmp.lt.s32.totalorder %s165_s11, %s165_s11 }
 0x152   :  { %p3022_p5 = scmp.lt.s32.totalorder %s3020_s10, %s3016_s7 }
 0x154   :  { %p3023_p6 = por %p3022_p5, %p3021_p4 }
 0x156   :  { %p3024_p7 = pnand %p3023_p6, %p3017_p3 }
 0x158   :  { %3027 = shalt.err (!%p3024_p7)
}
 0x159   :  { %167 = dma.hbm_to_vmem [thread:$0]  %s3923_s2, 16, %s165_s11, [#allocation18]  }
 0x15a   :  { %s3924_s9 = sld [smem:[#allocation59_spill]] }
 0x160   :  { %s3028_s1 = scalar_lea.hbm %s3924_s9, 16 }
 0x161   :  { %p3029_p8 = scmp.ne.s32.totalorder %s3924_s9, %s3028_s1  ;;  %p3032_p9 = scmp.lt.u32.totalorder %s3028_s1, %s3924_s9 }
 0x163   :  { %p3034_p10 = pnand %p3032_p9, %p3029_p8 }
 0x165   :  { %3037 = shalt.err (!%p3034_p10)
}
 0x166   :  { %s3038_s28 = scalar_lea.vmem %s185_s30, 16  ;;  %s3042_s8 = scalar_lea.vmem %s185_s30, 32 }
 0x167   :  { %p3039_p11 = scmp.ne.s32.totalorder %s185_s30, %s3038_s28  ;;  %p3043_p12 = scmp.lt.s32.totalorder %s185_s30, %s185_s30 }
 0x168   :  { %p3044_p13 = scmp.lt.s32.totalorder %s3042_s8, %s3038_s28 }
 0x16a   :  { %p3045_p0 = por %p3044_p13, %p3043_p12 }
 0x16c   :  { %p3046_p1 = pnand %p3045_p0, %p3039_p11 }
 0x16e   :  { %3049 = shalt.err (!%p3046_p1)
}
 0x16f   :  { %187 = dma.hbm_to_vmem [thread:$0]  %s3924_s9, 16, %s185_s30, [#allocation21]  }
 0x170   :  { %s3204_s29 = smov [#allocation25]   ;;  %s3205_s7 = smov [#allocation28]  }
 0x171   :  { %s205_s6 = sshll.u32 %s3204_s29, 4  ;;  %s229_s10 = sshll.u32 %s3205_s7, 4  ;;  %s206_s6 = int_to_ptr.vmem [resolvable:$true] %s205_s6  ;;  %s3597_s10 = int_to_ptr.vmem [resolvable:$true] %s229_s10 }
 0x172   :  { %s3050_s27 = scalar_lea.hbm %s3862_s14, 1024 }
 0x173   :  { %p3051_p2 = scmp.ne.s32.totalorder %s3862_s14, %s3050_s27  ;;  %p3054_p3 = scmp.lt.u32.totalorder %s3050_s27, %s3862_s14 }
 0x175   :  { %p3056_p4 = pnand %p3054_p3, %p3051_p2 }
 0x177   :  { %3059 = shalt.err (!%p3056_p4)
}
 0x178   :  { %s3060_s30 = scalar_lea.vmem %s206_s6, 1024  ;;  %p3065_p6 = scmp.lt.s32.totalorder %s206_s6, %s206_s6 }
 0x179   :  { %p3061_p5 = scmp.ne.s32.totalorder %s206_s6, %s3060_s30  ;;  %p3066_p7 = scmp.lt.s32.totalorder %s3060_s30, %s3060_s30 }
 0x17b   :  { %p3067_p8 = por %p3066_p7, %p3065_p6 }
 0x17d   :  { %p3068_p9 = pnand %p3067_p8, %p3061_p5 }
 0x17f   :  { %3071 = shalt.err (!%p3068_p9)
}
 0x180   :  { %211 = dma.hbm_to_vmem [thread:$0]  %s3862_s14, 1024, %s206_s6, [#allocation24], %s3188_s5, %s3188_s5, %s3189_s3  }
 0x181   :  { %s3072_s8 = scalar_lea.hbm %s3864_s16, 2048 }
 0x182   :  { %p3073_p10 = scmp.ne.s32.totalorder %s3864_s16, %s3072_s8  ;;  %p3076_p11 = scmp.lt.u32.totalorder %s3072_s8, %s3864_s16 }
 0x184   :  { %p3078_p12 = pnand %p3076_p11, %p3073_p10 }
 0x186   :  { %3081 = shalt.err (!%p3078_p12)
}
 0x187   :  { %s3082_s26 = scalar_lea.vmem %s3597_s10, 2048  ;;  %p3087_p0 = scmp.lt.s32.totalorder %s3597_s10, %s3597_s10 }
 0x188   :  { %p3083_p13 = scmp.ne.s32.totalorder %s3597_s10, %s3082_s26  ;;  %p3088_p1 = scmp.lt.s32.totalorder %s3082_s26, %s3082_s26 }
 0x18a   :  { %p3089_p2 = por %p3088_p1, %p3087_p0 }
 0x18c   :  { %p3090_p3 = pnand %p3089_p2, %p3083_p13 }
 0x18e   :  { %3093 = shalt.err (!%p3090_p3)
}
 0x18f   :  { %235 = dma.hbm_to_vmem [thread:$0]  %s3864_s16, 2048, %s3597_s10, [#allocation27], %s3188_s5, %s3188_s5, %s3189_s3  }
 0x190   :  { %s3206_s12 = smov [#allocation31]   ;;  %s3094_s4 = scalar_lea.hbm %s3867_s19, 1024 }
 0x191   :  { %s255_s27 = sshll.u32 %s3206_s12, 4  ;;  %p3095_p4 = scmp.ne.s32.totalorder %s3867_s19, %s3094_s4  ;;  %s256_s27 = int_to_ptr.vmem [resolvable:$true] %s255_s27 }
 0x192   :  { %p3098_p5 = scmp.lt.u32.totalorder %s3094_s4, %s3867_s19 }
 0x194   :  { %p3100_p6 = pnand %p3098_p5, %p3095_p4 }
 0x196   :  { %3103 = shalt.err (!%p3100_p6)
}
 0x197   :  { %s3104_s13 = scalar_lea.vmem %s256_s27, 1024  ;;  %p3109_p8 = scmp.lt.s32.totalorder %s256_s27, %s256_s27 }
 0x198   :  { %p3105_p7 = scmp.ne.s32.totalorder %s256_s27, %s3104_s13  ;;  %p3110_p9 = scmp.lt.s32.totalorder %s3104_s13, %s3104_s13 }
 0x19a   :  { %p3111_p10 = por %p3110_p9, %p3109_p8 }
 0x19c   :  { %p3112_p11 = pnand %p3111_p10, %p3105_p7 }
 0x19e   :  { %3115 = shalt.err (!%p3112_p11)
}
 0x19f   :  { %261 = dma.hbm_to_vmem [thread:$0]  %s3867_s19, 1024, %s256_s27, [#allocation30], %s3188_s5, %s3188_s5, %s3189_s3  }
 0x1a0   :  { %3160 = dma.done.wait [#allocation3], 64  }
 0x1a1   :  { %3161 = vsyncadd [#allocation3], 4294967232 }
 0x1a2   :  { %3162 = dma.done.wait [#allocation6], 2080  }
 0x1a3   :  { %3163 = vsyncadd [#allocation6], 4294965216 }
 0x1a4   :  { %3164 = dma.done.wait [#allocation9], 2048  }
 0x1a5   :  { %3165 = vsyncadd [#allocation9], 4294965248 }
 0x1a6   :  { %3166 = dma.done.wait [#allocation12], 2048  }
 0x1a7   :  { %3167 = vsyncadd [#allocation12], 4294965248 }
 0x1a8   :  { %3168 = dma.done.wait [#allocation15], 1040  }
 0x1a9   :  { %3169 = vsyncadd [#allocation15], 4294966256 }
 0x1aa   :  { %3170 = dma.done.wait [#allocation18], 32  }
 0x1ab   :  { %3171 = vsyncadd [#allocation18], 4294967264 }
 0x1ac   :  { %3172 = dma.done.wait [#allocation21], 32  }
 0x1ad   :  { %3173 = vsyncadd [#allocation21], 4294967264 }
 0x1ae   :  { %3174 = dma.done.wait [#allocation24], 2048  }
 0x1af   :  { %3175 = vsyncadd [#allocation24], 4294965248 }
 0x1b0   :  { %3176 = dma.done.wait [#allocation27], 4096  }
 0x1b1   :  { %3177 = vsyncadd [#allocation27], 4294963200 }
 0x1b2   :  { %3178 = dma.done.wait [#allocation30], 2048  }
 0x1b3   :  { %3179 = vsyncadd [#allocation30], 4294965248  ;;  %v3207_v0 = vmov 0   ;;  %v3208_v1 = vmov 0.0   ;;  %v2554_v2 = vld [vmem:[#allocation5 + $0x4] ss:$8 sps:$4 sm:$0xff]   ;;  %v353_v33 = vlaneseq }
 0x1b4   :  { %475 = vmatprep.mubr.bf16.mxu0 %v3207_v0  ;;  %2321 = vmatprep.subr.bf16.mxu1 %v3208_v1  ;;  %v2556_v3 = vld [vmem:[#allocation5] ss:$8 sps:$4 sm:$0xff]   ;;  %v2557_v4 = vld [vmem:[#allocation5 + $0x14] ss:$8 sps:$4 sm:$0xff]   ;;  %v2559_v5 = vld [vmem:[#allocation5 + $0x10] ss:$8 sps:$4 sm:$0xff]  }
 0x1b5   :  { %443 = vmatprep.subr.bf16.mxu0 %v2554_v2  ;;  %v2560_v6 = vld [vmem:[#allocation5 + $0x24] ss:$8 sps:$4 sm:$0xff]   ;;  %v2562_v7 = vld [vmem:[#allocation5 + $0x20] ss:$8 sps:$4 sm:$0xff]   ;;  %v2563_v8 = vld [vmem:[#allocation5 + $0x34] ss:$8 sps:$4 sm:$0xff]  }
 0x1b6   :  { %444 = vmatpush1.bf16.msra.mxu0 %v2556_v3  ;;  %v2565_v9 = vld [vmem:[#allocation5 + $0x30] ss:$8 sps:$4 sm:$0xff]   ;;  %v2578_v10 = vld [vmem:[#allocation8] sm:$0xff]   ;;  %v2569_v14 = vld [vmem:[#allocation5 + $0x54] ss:$8 sps:$4 sm:$0xff]   ;;  %vm3209_vm0 = vmmov 0  }
 0x1b7   :  { %445 = vmatprep.subr.bf16.mxu0 %v2557_v4  ;;  %v2566_v11 = vld [vmem:[#allocation5 + $0x44] ss:$8 sps:$4 sm:$0xff]   ;;  %2322 = vmatpush3.bf16.msra.mxu1 %v2578_v10  ;;  %v2568_v13 = vld [vmem:[#allocation5 + $0x40] ss:$8 sps:$4 sm:$0xff]   ;;  %v2571_v15 = vld [vmem:[#allocation5 + $0x50] ss:$8 sps:$4 sm:$0xff]  }
 0x1b8   :  { %v2579_v12 = vld [vmem:[#allocation8 + $0x8] sm:$0xff]   ;;  %2323 = vmatprep.subr.bf16.mxu1 %v3208_v1  ;;  %v2580_v16 = vld [vmem:[#allocation8 + $0x10] sm:$0xff]   ;;  %v2581_v18 = vld [vmem:[#allocation8 + $0x18] sm:$0xff]   ;;  %2337 = vmatprep.mubr.msk.bf16.mxu1 %vm3209_vm0, %v3208_v1  ;;  %v3671_v34 = vshrl.u32 %v353_v33, 7  ;;  %vm1952_vm2 = vcmask 64512   ;;  %s3210_s16 = smov [#allocation32]  }
 0x1b9   :  { %v2572_v17 = vld [vmem:[#allocation5 + $0x64] ss:$8 sps:$4 sm:$0xff]   ;;  %v2574_v19 = vld [vmem:[#allocation5 + $0x60] ss:$8 sps:$4 sm:$0xff]   ;;  %v2575_v20 = vld [vmem:[#allocation5 + $0x74] ss:$8 sps:$4 sm:$0xff]  }
 0x1ba   :  { %446 = vmatpush1.bf16.msra.mxu0 %v2559_v5  ;;  %v2582_v21 = vld [vmem:[#allocation8 + $0x20] sm:$0xff]   ;;  %v2577_v22 = vld [vmem:[#allocation5 + $0x70] ss:$8 sps:$4 sm:$0xff]   ;;  %v334_v24 = vld [vmem:[#allocation2] sm:$0xf]  ;;  %v355_v35 = vsub.s32 0, %v3671_v34 }
 0x1bb   :  { %447 = vmatprep.subr.bf16.mxu0 %v2560_v6  ;;  %2324 = vmatpush3.bf16.msra.mxu1 %v2579_v12  ;;  %v2583_v23 = vld [vmem:[#allocation8 + $0x28] sm:$0xff]   ;;  %v2584_v25 = vld [vmem:[#allocation8 + $0x30] sm:$0xff]   ;;  %v2585_v26 = vld [vmem:[#allocation8 + $0x38] sm:$0xff]   ;;  %s2034_s10 = sshll.u32 %s3210_s16, 4  ;;  %s2035_s10 = int_to_ptr.vmem [resolvable:$true] %s2034_s10 }
 0x1bc   :  { %2325 = vmatprep.subr.bf16.mxu1 %v3208_v1  ;;  %v2586_v27 = vld [vmem:[#allocation10] sm:$0xff]   ;;  %v2587_v28 = vld [vmem:[#allocation10 + $0x8] sm:$0xff]   ;;  %v2588_v29 = vld [vmem:[#allocation10 + $0x10] sm:$0xff]   ;;  %s3116_s19 = scalar_lea.vmem %s2035_s10, 16  ;;  %s3120_s5 = scalar_lea.vmem %s2035_s10, 32 }
 0x1bd   :  { %v2589_v30 = vld [vmem:[#allocation10 + $0x18] sm:$0xff]   ;;  %v2590_v31 = vld [vmem:[#allocation10 + $0x20] sm:$0xff]   ;;  %v2591_v32 = vld [vmem:[#allocation10 + $0x28] sm:$0xff]   ;;  %p3117_p12 = scmp.ne.s32.totalorder %s2035_s10, %s3116_s19  ;;  %p3121_p13 = scmp.lt.s32.totalorder %s2035_s10, %s2035_s10 }
 0x1be   :  { %448 = vmatpush1.bf16.msra.mxu0 %v2562_v7  ;;  %v3674_v36 = vld [vmem:[#allocation7] sm:$0x3]  ;;  %v2592_v45 = vld [vmem:[#allocation10 + $0x30] sm:$0xff]   ;;  %v2594_v47 = vld [vmem:[#allocation11] sm:$0xff]   ;;  %p3122_p0 = scmp.lt.s32.totalorder %s3120_s5, %s3116_s19 }
 0x1bf   :  { %449 = vmatprep.subr.bf16.mxu0 %v2563_v8  ;;  %2326 = vmatpush3.bf16.msra.mxu1 %v2580_v16  ;;  %v356_v37 = vrot.slane %v3674_v36, %v355_v35  ;;  %v2593_v46 = vld [vmem:[#allocation10 + $0x38] sm:$0xff]   ;;  %v2595_v48 = vld [vmem:[#allocation11 + $0x8] sm:$0xff]   ;;  %v2596_v49 = vld [vmem:[#allocation11 + $0x10] sm:$0xff]  }
 0x1c0   :  { %2327 = vmatprep.subr.bf16.mxu1 %v3208_v1  ;;  %v2597_v50 = vld [vmem:[#allocation11 + $0x18] sm:$0xff]   ;;  %v2598_v51 = vld [vmem:[#allocation11 + $0x20] sm:$0xff]   ;;  %v2599_v52 = vld [vmem:[#allocation11 + $0x28] sm:$0xff]   ;;  %p3123_p1 = por %p3122_p0, %p3121_p13 }
 0x1c1   :  { %v2082_v53 = vld [vmem:[#allocation16] ss:$0 sm:$0xff]  ;;  %v2600_v61 = vld [vmem:[#allocation11 + $0x30] sm:$0xff]   ;;  %v2601_v62 = vld [vmem:[#allocation11 + $0x38] sm:$0xff]  }
 0x1c2   :  { %450 = vmatpush1.bf16.msra.mxu0 %v2565_v9  ;;  %v2602_v63 = vld [vmem:[#allocation13] sm:$0xff]   ;;  %v2603_v2 = vld [vmem:[#allocation13 + $0x8] sm:$0xff]   ;;  %v2604_v3 = vld [vmem:[#allocation13 + $0x10] sm:$0xff]   ;;  %p3124_p2 = pnand %p3123_p1, %p3117_p12 }
 0x1c3   :  { %451 = vmatprep.subr.bf16.mxu0 %v2566_v11  ;;  %2328 = vmatpush3.bf16.msra.mxu1 %v2581_v18  ;;  %v2605_v4 = vld [vmem:[#allocation13 + $0x18] sm:$0xff]   ;;  %v2606_v5 = vld [vmem:[#allocation13 + $0x20] sm:$0xff]   ;;  %v2607_v6 = vld [vmem:[#allocation13 + $0x28] sm:$0xff]  }
 0x1c4   :  { %2329 = vmatprep.subr.bf16.mxu1 %v3208_v1  ;;  %v2608_v7 = vld [vmem:[#allocation13 + $0x30] sm:$0xff]   ;;  %v2091_v8 = vld [vmem:[#allocation17] ss:$0 sm:$0xff]  ;;  %v2609_v16 = vld [vmem:[#allocation13 + $0x38] sm:$0xff]  }
 0x1c5   :  { %v2619_v18 = vld [vmem:[#allocation14 + $0x8] sm:$0xff]  }
 0x1c6   :  { %452 = vmatpush1.bf16.msra.mxu0 %v2568_v13 }
 0x1c7   :  { %453 = vmatprep.subr.bf16.mxu0 %v2569_v14  ;;  %2330 = vmatpush3.bf16.msra.mxu1 %v2582_v21  ;;  %v2622_v21 = vld [vmem:[#allocation14 + $0x20] sm:$0xff]  }
 0x1c8   :  { %2331 = vmatprep.subr.bf16.mxu1 %v3208_v1 }
 0x1ca   :  { %454 = vmatpush1.bf16.msra.mxu0 %v2571_v15 }
 0x1cb   :  { %455 = vmatprep.subr.bf16.mxu0 %v2572_v17  ;;  %2332 = vmatpush3.bf16.msra.mxu1 %v2583_v23  ;;  %v2618_v17 = vld [vmem:[#allocation14] sm:$0xff]   ;;  %v2624_v23 = vld [vmem:[#allocation14 + $0x30] sm:$0xff]  }
 0x1cc   :  { %2333 = vmatprep.subr.bf16.mxu1 %v3208_v1 }
 0x1ce   :  { %456 = vmatpush1.bf16.msra.mxu0 %v2574_v19  ;;  %v2620_v19 = vld [vmem:[#allocation14 + $0x10] sm:$0xff]  }
 0x1cf   :  { %457 = vmatprep.subr.bf16.mxu0 %v2575_v20  ;;  %2334 = vmatpush3.bf16.msra.mxu1 %v2584_v25  ;;  %v2621_v20 = vld [vmem:[#allocation14 + $0x18] sm:$0xff]  }
 0x1d0   :  { %2335 = vmatprep.subr.bf16.mxu1 %v3208_v1 }
 0x1d2   :  { %458 = vmatpush1.bf16.msra.mxu0 %v2577_v22  ;;  %v2623_v22 = vld [vmem:[#allocation14 + $0x28] sm:$0xff]  }
 0x1d3   :  { %2341 = vmatprep.subr.bf16.mxu0 %v3208_v1  ;;  %2336 = vmatpush3.bf16.msra.mxu1 %v2585_v26 }
 0x1d4   :  { %2361 = vmatprep.subr.bf16.mxu1 %v3208_v1 }
 0x1d5   :  { %476 = vmatmul.mubr.bf16.vlgmr.msra.gmra.mrb[0].mxu0 %v334_v24  ;;  %v2100_v24 = vld [vmem:[#allocation19] ss:$0 sm:$0xff] }
 0x1d6   :  { %2357 = vmatprep.mubr.msk.bf16.mxu0 %vm3209_vm0, %v3208_v1  ;;  %2342 = vmatpush3.bf16.msra.mxu0 %v2586_v27 }
 0x1d7   :  { %2343 = vmatprep.subr.bf16.mxu0 %v3208_v1 }
 0x1da   :  { %2344 = vmatpush3.bf16.msra.mxu0 %v2587_v28 }
 0x1db   :  { %2345 = vmatprep.subr.bf16.mxu0 %v3208_v1 }
 0x1de   :  { %2346 = vmatpush3.bf16.msra.mxu0 %v2588_v29 }
 0x1df   :  { %2347 = vmatprep.subr.bf16.mxu0 %v3208_v1 }
 0x1e2   :  { %2348 = vmatpush3.bf16.msra.mxu0 %v2589_v30 }
 0x1e3   :  { %2349 = vmatprep.subr.bf16.mxu0 %v3208_v1 }
 0x1e6   :  { %2350 = vmatpush3.bf16.msra.mxu0 %v2590_v31  ;;  %v2610_v31 = vld [vmem:[#allocation23] sm:$0xff]  }
 0x1e7   :  { %2351 = vmatprep.subr.bf16.mxu0 %v3208_v1 }
 0x1ea   :  { %2352 = vmatpush3.bf16.msra.mxu0 %v2591_v32 }
 0x1eb   :  { %2353 = vmatprep.subr.bf16.mxu0 %v3208_v1 }
 0x1ee   :  { %2354 = vmatpush3.bf16.msra.mxu0 %v2592_v45  ;;  %v2616_v45 = vld [vmem:[#allocation23 + $0x30] sm:$0xff]  }
 0x1ef   :  { %2355 = vmatprep.subr.bf16.mxu0 %v3208_v1 }
 0x1f2   :  { %2356 = vmatpush3.bf16.msra.mxu0 %v2593_v46 }
 0x1f3   :  { %2381 = vmatprep.subr.bf16.mxu0 %v3208_v1 }
 0x2a8   :  { %v477_v38 = vpop.f32.mrb[0].mxu0 }
 0x2a9   :  { %v478_v39 = vadd.f32 %v477_v38, %v356_v37  ;;  %v3679_v40 = vpop.f32.mrb[1].mxu0  ;;  %v2611_v37 = vld [vmem:[#allocation23 + $0x8] sm:$0xff]   ;;  %v2612_v38 = vld [vmem:[#allocation23 + $0x10] sm:$0xff]  }
 0x2aa   :  { %v481_v41 = vpop.f32.mrb[2].mxu0 }
 0x2ab   :  { %v484_v42 = vmax.f32 %v478_v39, 0.0  ;;  %v482_v43 = vpop.f32.mrb[3].mxu0  ;;  %v2613_v39 = vld [vmem:[#allocation23 + $0x18] sm:$0xff]   ;;  %v2614_v41 = vld [vmem:[#allocation23 + $0x20] sm:$0xff]  }
 0x2ac   :  { %v2615_v43 = vld [vmem:[#allocation23 + $0x28] sm:$0xff]  }
 0x2ad   :  { %v486_v44 = vpack.c.bf16 %v484_v42, %v484_v42  ;;  %v359_v42 = vsub.s32 1, %v3671_v34  ;;  %v2680_v34 = vld [vmem:[%s3865_s17 + $0x30] sm:$0xff]  }
 0x2af   :  { %2338 = vmatmul.mubr.bf16.vlgmr.msra.gmra.mrb[0].mxu1 %v486_v44  ;;  %v360_v44 = vrot.slane %v3674_v36, %v359_v42  ;;  %v2109_v36 = vld [vmem:[#allocation20] ss:$0 sm:$0xff] }
 0x2b0   :  { %2377 = vmatprep.mubr.msk.bf16.mxu1 %vm3209_vm0, %v3208_v1  ;;  %2362 = vmatpush3.bf16.msra.mxu1 %v2594_v47  ;;  %v2617_v47 = vld [vmem:[#allocation23 + $0x38] sm:$0xff]  }
 0x2b1   :  { %2363 = vmatprep.subr.bf16.mxu1 %v3208_v1  ;;  %v480_v46 = vadd.f32 %v3679_v40, %v360_v44 }
 0x2b4   :  { %2364 = vmatpush3.bf16.msra.mxu1 %v2595_v48  ;;  %v485_v48 = vmax.f32 %v480_v46, 0.0 }
 0x2b5   :  { %2365 = vmatprep.subr.bf16.mxu1 %v3208_v1 }
 0x2b8   :  { %2366 = vmatpush3.bf16.msra.mxu1 %v2596_v49  ;;  %v487_v49 = vpack.c.bf16 %v485_v48, %v485_v48  ;;  %v2136_v48 = vld [vmem:[%s3869_s21] ss:$0 sm:$0xff] }
 0x2b9   :  { %2367 = vmatprep.subr.bf16.mxu1 %v3208_v1 }
 0x2bc   :  { %2368 = vmatpush3.bf16.msra.mxu1 %v2597_v50  ;;  %v2625_v50 = vld [vmem:[#allocation14 + $0x38] sm:$0xff]  }
 0x2bd   :  { %2369 = vmatprep.subr.bf16.mxu1 %v3208_v1 }
 0x2c0   :  { %2370 = vmatpush3.bf16.msra.mxu1 %v2598_v51 }
 0x2c1   :  { %2371 = vmatprep.subr.bf16.mxu1 %v3208_v1 }
 0x2c4   :  { %2372 = vmatpush3.bf16.msra.mxu1 %v2599_v52 }
 0x2c5   :  { %2373 = vmatprep.subr.bf16.mxu1 %v3208_v1 }
 0x2c8   :  { %2374 = vmatpush3.bf16.msra.mxu1 %v2600_v61  ;;  %v2631_v61 = vld [vmem:[#allocation25 + $0x28] sm:$0xff]  }
 0x2c9   :  { %2375 = vmatprep.subr.bf16.mxu1 %v3208_v1 }
 0x2cc   :  { %2376 = vmatpush3.bf16.msra.mxu1 %v2601_v62  ;;  %v2632_v62 = vld [vmem:[#allocation25 + $0x30] sm:$0xff]  }
 0x2cd   :  { %2401 = vmatprep.subr.bf16.mxu1 %v3208_v1 }
 0x382   :  { %v593_v54 = vpop.f32.mrb[0].mxu1 }
 0x383   :  { %v594_v55 = vadd.f32 %v2082_v53, %v593_v54  ;;  %v2339_v56 = vpop.f32.mrb[1].mxu1 }
 0x384   :  { %v596_v57 = vpop.f32.mrb[2].mxu1  ;;  %v2626_v56 = vld [vmem:[#allocation25] sm:$0xff]  }
 0x385   :  { %v599_v58 = vmax.f32 %v594_v55, 0.0  ;;  %v2340_v59 = vpop.f32.mrb[3].mxu1 }
 0x386   :  { %v2629_v59 = vld [vmem:[#allocation25 + $0x18] sm:$0xff]  }
 0x387   :  { %v600_v60 = vpack.c.bf16 %v599_v58, %v599_v58  ;;  %v2627_v58 = vld [vmem:[#allocation25 + $0x8] sm:$0xff]  }
 0x389   :  { %2358 = vmatmul.mubr.bf16.vlgmr.msra.gmra.mrb[4].mxu0 %v600_v60  ;;  %v2630_v60 = vld [vmem:[#allocation25 + $0x20] sm:$0xff]  }
 0x38a   :  { %2397 = vmatprep.mubr.msk.bf16.mxu0 %vm3209_vm0, %v3208_v1  ;;  %2382 = vmatpush3.bf16.msra.mxu0 %v2602_v63  ;;  %v2127_v63 = vld [vmem:[%s3868_s20] ss:$0 sm:$0xff] }
 0x38b   :  { %2383 = vmatprep.subr.bf16.mxu0 %v3208_v1 }
 0x38e   :  { %2384 = vmatpush3.bf16.msra.mxu0 %v2603_v2 }
 0x38f   :  { %2385 = vmatprep.subr.bf16.mxu0 %v3208_v1 }
 0x392   :  { %2386 = vmatpush3.bf16.msra.mxu0 %v2604_v3  ;;  %v2633_v3 = vld [vmem:[#allocation25 + $0x38] sm:$0xff]  }
 0x393   :  { %2387 = vmatprep.subr.bf16.mxu0 %v3208_v1 }
 0x396   :  { %2388 = vmatpush3.bf16.msra.mxu0 %v2605_v4 }
 0x397   :  { %2389 = vmatprep.subr.bf16.mxu0 %v3208_v1 }
 0x39a   :  { %2390 = vmatpush3.bf16.msra.mxu0 %v2606_v5 }
 0x39b   :  { %2391 = vmatprep.subr.bf16.mxu0 %v3208_v1 }
 0x39e   :  { %2392 = vmatpush3.bf16.msra.mxu0 %v2607_v6 }
 0x39f   :  { %2393 = vmatprep.subr.bf16.mxu0 %v3208_v1 }
 0x3a2   :  { %2394 = vmatpush3.bf16.msra.mxu0 %v2608_v7 }
 0x3a3   :  { %2395 = vmatprep.subr.bf16.mxu0 %v3208_v1 }
 0x3a6   :  { %2396 = vmatpush3.bf16.msra.mxu0 %v2609_v16  ;;  %v2645_v16 = vld [vmem:[#allocation26 + $0x34] ss:$8 sps:$4 sm:$0xff]  }
 0x3a7   :  { %2421 = vmatprep.subr.bf16.mxu0 %v3208_v1 }
 0x45c   :  { %v706_v9 = vpop.f32.mrb[4].mxu0 }
 0x45d   :  { %v707_v10 = vadd.f32 %v2091_v8, %v706_v9  ;;  %v2359_v11 = vpop.f32.mrb[5].mxu0 }
 0x45e   :  { %v709_v12 = vpop.f32.mrb[6].mxu0  ;;  %v2636_v11 = vld [vmem:[#allocation26 + $0x4] ss:$8 sps:$4 sm:$0xff]  }
 0x45f   :  { %v712_v13 = vmax.f32 %v707_v10, 0.0  ;;  %v2360_v14 = vpop.f32.mrb[7].mxu0  ;;  %v2634_v10 = vld [vmem:[#allocation26] ss:$8 sps:$4 sm:$0xff]   ;;  %v2639_v12 = vld [vmem:[#allocation26 + $0x14] ss:$8 sps:$4 sm:$0xff]  }
 0x460   :  { %v2642_v14 = vld [vmem:[#allocation26 + $0x24] ss:$8 sps:$4 sm:$0xff]  }
 0x461   :  { %v713_v15 = vpack.c.bf16 %v712_v13, %v712_v13  ;;  %v2637_v13 = vld [vmem:[#allocation26 + $0x10] ss:$8 sps:$4 sm:$0xff]  }
 0x463   :  { %2378 = vmatmul.mubr.bf16.vlgmr.msra.gmra.mrb[4].mxu1 %v713_v15  ;;  %v2640_v15 = vld [vmem:[#allocation26 + $0x20] ss:$8 sps:$4 sm:$0xff]  }
 0x464   :  { %2417 = vmatprep.mubr.msk.bf16.mxu1 %vm3209_vm0, %v3208_v1  ;;  %2402 = vmatpush3.bf16.msra.mxu1 %v2618_v17  ;;  %v2643_v17 = vld [vmem:[#allocation26 + $0x30] ss:$8 sps:$4 sm:$0xff]  }
 0x465   :  { %2403 = vmatprep.subr.bf16.mxu1 %v3208_v1 }
 0x468   :  { %2404 = vmatpush3.bf16.msra.mxu1 %v2619_v18  ;;  %v2648_v18 = vld [vmem:[#allocation26 + $0x44] ss:$8 sps:$4 sm:$0xff]  }
 0x469   :  { %2405 = vmatprep.subr.bf16.mxu1 %v3208_v1 }
 0x46c   :  { %2406 = vmatpush3.bf16.msra.mxu1 %v2620_v19  ;;  %v2646_v19 = vld [vmem:[#allocation26 + $0x40] ss:$8 sps:$4 sm:$0xff]  }
 0x46d   :  { %2407 = vmatprep.subr.bf16.mxu1 %v3208_v1 }
 0x470   :  { %2408 = vmatpush3.bf16.msra.mxu1 %v2621_v20  ;;  %v2651_v20 = vld [vmem:[#allocation26 + $0x54] ss:$8 sps:$4 sm:$0xff]  }
 0x471   :  { %2409 = vmatprep.subr.bf16.mxu1 %v3208_v1 }
 0x474   :  { %2410 = vmatpush3.bf16.msra.mxu1 %v2622_v21  ;;  %v2649_v21 = vld [vmem:[#allocation26 + $0x50] ss:$8 sps:$4 sm:$0xff]  }
 0x475   :  { %2411 = vmatprep.subr.bf16.mxu1 %v3208_v1 }
 0x478   :  { %2412 = vmatpush3.bf16.msra.mxu1 %v2623_v22  ;;  %v2654_v22 = vld [vmem:[#allocation26 + $0x64] ss:$8 sps:$4 sm:$0xff]  }
 0x479   :  { %2413 = vmatprep.subr.bf16.mxu1 %v3208_v1 }
 0x47c   :  { %2414 = vmatpush3.bf16.msra.mxu1 %v2624_v23  ;;  %v2652_v23 = vld [vmem:[#allocation26 + $0x60] ss:$8 sps:$4 sm:$0xff]  }
 0x47d   :  { %2415 = vmatprep.subr.bf16.mxu1 %v3208_v1 }
 0x480   :  { %2416 = vmatpush3.bf16.msra.mxu1 %v2625_v50 }
 0x481   :  { %2441 = vmatprep.subr.bf16.mxu1 %v3208_v1 }
 0x536   :  { %v819_v25 = vpop.f32.mrb[4].mxu1 }
 0x537   :  { %v820_v26 = vadd.f32 %v2100_v24, %v819_v25  ;;  %v2379_v27 = vpop.f32.mrb[5].mxu1  ;;  %v2657_v24 = vld [vmem:[#allocation26 + $0x74] ss:$8 sps:$4 sm:$0xff]   ;;  %v2655_v25 = vld [vmem:[#allocation26 + $0x70] ss:$8 sps:$4 sm:$0xff]  }
 0x538   :  { %v822_v28 = vpop.f32.mrb[6].mxu1  ;;  %v2659_v27 = vld [vmem:[#allocation28] sm:$0xff]  }
 0x539   :  { %v825_v29 = vmax.f32 %v820_v26, 0.0  ;;  %v2380_v30 = vpop.f32.mrb[7].mxu1  ;;  %v2658_v26 = vld [vmem:[#allocation28 + $0x40] sm:$0xff]   ;;  %v2660_v28 = vld [vmem:[#allocation28 + $0x48] sm:$0xff]  }
 0x53a   :  { %v2662_v30 = vld [vmem:[#allocation28 + $0x50] sm:$0xff]  }
 0x53b   :  { %v826_v32 = vpack.c.bf16 %v825_v29, %v825_v29  ;;  %v2661_v29 = vld [vmem:[#allocation28 + $0x8] sm:$0xff]  }
 0x53d   :  { %2398 = vmatmul.mubr.bf16.vlgmr.msra.gmra.mrb[8].mxu0 %v826_v32  ;;  %v2664_v32 = vld [vmem:[#allocation28 + $0x58] sm:$0xff]  }
 0x53e   :  { %2422 = vmatpush3.bf16.msra.mxu0 %v2610_v31  ;;  %2437 = vmatprep.mubr.msk.bf16.mxu0 %vm3209_vm0, %v3208_v1  ;;  %v2663_v31 = vld [vmem:[#allocation28 + $0x10] sm:$0xff]  }
 0x53f   :  { %2423 = vmatprep.subr.bf16.mxu0 %v3208_v1 }
 0x542   :  { %2424 = vmatpush3.bf16.msra.mxu0 %v2611_v37  ;;  %v2665_v37 = vld [vmem:[#allocation28 + $0x18] sm:$0xff]  }
 0x543   :  { %2425 = vmatprep.subr.bf16.mxu0 %v3208_v1 }
 0x546   :  { %2426 = vmatpush3.bf16.msra.mxu0 %v2612_v38  ;;  %v2666_v38 = vld [vmem:[#allocation28 + $0x60] sm:$0xff]  }
 0x547   :  { %2427 = vmatprep.subr.bf16.mxu0 %v3208_v1 }
 0x54a   :  { %2428 = vmatpush3.bf16.msra.mxu0 %v2613_v39  ;;  %v2667_v39 = vld [vmem:[#allocation28 + $0x20] sm:$0xff]  }
 0x54b   :  { %2429 = vmatprep.subr.bf16.mxu0 %v3208_v1 }
 0x54e   :  { %2430 = vmatpush3.bf16.msra.mxu0 %v2614_v41  ;;  %v2668_v41 = vld [vmem:[#allocation28 + $0x68] sm:$0xff]  }
 0x54f   :  { %2431 = vmatprep.subr.bf16.mxu0 %v3208_v1 }
 0x552   :  { %2432 = vmatpush3.bf16.msra.mxu0 %v2615_v43  ;;  %v2669_v43 = vld [vmem:[#allocation28 + $0x28] sm:$0xff]  }
 0x553   :  { %2433 = vmatprep.subr.bf16.mxu0 %v3208_v1 }
 0x556   :  { %2434 = vmatpush3.bf16.msra.mxu0 %v2616_v45 }
 0x557   :  { %2435 = vmatprep.subr.bf16.mxu0 %v3208_v1 }
 0x55a   :  { %2436 = vmatpush3.bf16.msra.mxu0 %v2617_v47 }
 0x55b   :  { %1385 = vmatprep.subr.bf16.mxu0 %v2636_v11 }
 0x55d   :  { %2438 = vmatmul.mubr.bf16.vlgmr.msra.gmra.mrb[12].mxu0 %v487_v49 }
 0x55e   :  { %1417 = vmatprep.mubr.bf16.mxu0 %v3207_v0  ;;  %v2628_v0 = vld [vmem:[#allocation25 + $0x10] sm:$0xff]   ;;  %1386 = vmatpush1.bf16.msra.mxu0 %v2634_v10 }
 0x55f   :  { %1387 = vmatprep.subr.bf16.mxu0 %v2639_v12 }
 0x562   :  { %1388 = vmatpush1.bf16.msra.mxu0 %v2637_v13 }
 0x563   :  { %1389 = vmatprep.subr.bf16.mxu0 %v2642_v14  ;;  %v2683_v14 = vld [vmem:[#allocation29 + $0x8] sm:$0xff]  }
 0x566   :  { %1390 = vmatpush1.bf16.msra.mxu0 %v2640_v15  ;;  %v2684_v15 = vld [vmem:[#allocation29 + $0x10] sm:$0xff]  }
 0x567   :  { %1391 = vmatprep.subr.bf16.mxu0 %v2645_v16  ;;  %v2685_v16 = vld [vmem:[#allocation29 + $0x18] sm:$0xff]  }
 0x56a   :  { %1392 = vmatpush1.bf16.msra.mxu0 %v2643_v17  ;;  %v2686_v17 = vld [vmem:[#allocation29 + $0x20] sm:$0xff]  }
 0x56b   :  { %1393 = vmatprep.subr.bf16.mxu0 %v2648_v18  ;;  %v2687_v18 = vld [vmem:[#allocation29 + $0x28] sm:$0xff]  }
 0x56e   :  { %1394 = vmatpush1.bf16.msra.mxu0 %v2646_v19  ;;  %v2688_v19 = vld [vmem:[#allocation29 + $0x30] sm:$0xff]  }
 0x56f   :  { %1395 = vmatprep.subr.bf16.mxu0 %v2651_v20 }
 0x572   :  { %1396 = vmatpush1.bf16.msra.mxu0 %v2649_v21  ;;  %v2161_v21 = vld [vmem:[%s3871_s23] ss:$0 sm:$0xff] }
 0x573   :  { %1397 = vmatprep.subr.bf16.mxu0 %v2654_v22 }
 0x576   :  { %1398 = vmatpush1.bf16.msra.mxu0 %v2652_v23 }
 0x577   :  { %1399 = vmatprep.subr.bf16.mxu0 %v2657_v24 }
 0x57a   :  { %1400 = vmatpush1.bf16.msra.mxu0 %v2655_v25 }
 0x57b   :  { %2461 = vmatprep.subr.bf16.mxu0 %v3208_v1 }
 0x610   :  { %v932_v51 = vpop.f32.mrb[8].mxu0 }
 0x611   :  { %v933_v52 = vadd.f32 %v2109_v36, %v932_v51  ;;  %v2399_v40 = vpop.f32.mrb[9].mxu0 }
 0x612   :  { %v935_v53 = vpop.f32.mrb[10].mxu0 }
 0x613   :  { %v938_v54 = vmax.f32 %v933_v52, 0.0  ;;  %v2400_v55 = vpop.f32.mrb[11].mxu0 }
 0x614   :  { %v2671_v55 = vld [vmem:[#allocation28 + $0x30] sm:$0xff]  }
 0x615   :  { %v939_v57 = vpack.c.bf16 %v938_v54, %v938_v54  ;;  %v2670_v54 = vld [vmem:[#allocation28 + $0x70] sm:$0xff]  }
 0x617   :  { %2418 = vmatmul.mubr.bf16.vlgmr.msra.gmra.mrb[8].mxu1 %v939_v57  ;;  %v2673_v57 = vld [vmem:[#allocation28 + $0x38] sm:$0xff]  }
 0x618   :  { %2442 = vmatpush3.bf16.msra.mxu1 %v2626_v56  ;;  %2457 = vmatprep.mubr.msk.bf16.mxu1 %vm3209_vm0, %v3208_v1  ;;  %v2672_v56 = vld [vmem:[#allocation28 + $0x78] sm:$0xff]  }
 0x619   :  { %2443 = vmatprep.subr.bf16.mxu1 %v3208_v1 }
 0x61c   :  { %2444 = vmatpush3.bf16.msra.mxu1 %v2627_v58  ;;  %v2674_v58 = vld [vmem:[%s3865_s17] sm:$0xff]  }
 0x61d   :  { %2445 = vmatprep.subr.bf16.mxu1 %v3208_v1 }
 0x620   :  { %2446 = vmatpush3.bf16.msra.mxu1 %v2628_v0  ;;  %v2675_v0 = vld [vmem:[%s3865_s17 + $0x8] sm:$0xff]  }
 0x621   :  { %2447 = vmatprep.subr.bf16.mxu1 %v3208_v1 }
 0x624   :  { %2448 = vmatpush3.bf16.msra.mxu1 %v2629_v59  ;;  %v2676_v59 = vld [vmem:[%s3865_s17 + $0x10] sm:$0xff]  }
 0x625   :  { %2449 = vmatprep.subr.bf16.mxu1 %v3208_v1 }
 0x628   :  { %2450 = vmatpush3.bf16.msra.mxu1 %v2630_v60  ;;  %v2677_v60 = vld [vmem:[%s3865_s17 + $0x18] sm:$0xff]  }
 0x629   :  { %2451 = vmatprep.subr.bf16.mxu1 %v3208_v1 }
 0x62c   :  { %2452 = vmatpush3.bf16.msra.mxu1 %v2631_v61  ;;  %v2678_v61 = vld [vmem:[%s3865_s17 + $0x20] sm:$0xff]  }
 0x62d   :  { %2453 = vmatprep.subr.bf16.mxu1 %v3208_v1 }
 0x630   :  { %v1156_v2 = vpop.f32.mrb[12].mxu0  ;;  %2454 = vmatpush3.bf16.msra.mxu1 %v2632_v62  ;;  %v2679_v62 = vld [vmem:[%s3865_s17 + $0x28] sm:$0xff]  }
 0x631   :  { %v1157_v4 = vadd.f32 %v2127_v63, %v1156_v2  ;;  %v2439_v5 = vpop.f32.mrb[13].mxu0  ;;  %2455 = vmatprep.subr.bf16.mxu1 %v3208_v1  ;;  %v1293_v63 = vld [vmem:[%s3870_s22] sm:$0x3] }
 0x632   :  { %v1159_v6 = vpop.f32.mrb[14].mxu0  ;;  %v1298_v2 = vrot.slane %v1293_v63, %v355_v35  ;;  %v2681_v35 = vld [vmem:[%s3865_s17 + $0x38] sm:$0xff]  }
 0x633   :  { %v1162_v7 = vmax.f32 %v1157_v4, 0.0  ;;  %v2440_v8 = vpop.f32.mrb[15].mxu0 }
 0x634   :  { %2456 = vmatpush3.bf16.msra.mxu1 %v2633_v3  ;;  %v1302_v3 = vrot.slane %v1293_v63, %v359_v42  ;;  %v2682_v42 = vld [vmem:[#allocation29] sm:$0xff]  }
 0x635   :  { %v1163_v9 = vpack.c.bf16 %v1162_v7, %v1162_v7  ;;  %2270 = vmatprep.subr.bf16.mxu1 %v2658_v26 }
 0x637   :  { %2458 = vmatmul.mubr.bf16.vlgmr.msra.gmra.mrb[12].mxu1 %v1163_v9 }
 0x638   :  { %2271 = vmatpush3.bf16.msra.mxu1 %v2659_v27 }
 0x639   :  { %2272 = vmatprep.subr.bf16.mxu1 %v2660_v28 }
 0x63c   :  { %2273 = vmatpush3.bf16.msra.mxu1 %v2661_v29  ;;  %v2689_v29 = vld [vmem:[#allocation29 + $0x38] sm:$0xff]  }
 0x63d   :  { %2274 = vmatprep.subr.bf16.mxu1 %v2662_v30  ;;  %v2690_v30 = vld [vmem:[#allocation31] sm:$0xff]  }
 0x640   :  { %2275 = vmatpush3.bf16.msra.mxu1 %v2663_v31  ;;  %v2691_v31 = vld [vmem:[#allocation31 + $0x8] sm:$0xff]  }
 0x641   :  { %2276 = vmatprep.subr.bf16.mxu1 %v2664_v32  ;;  %v2692_v32 = vld [vmem:[#allocation31 + $0x10] sm:$0xff]  }
 0x644   :  { %2277 = vmatpush3.bf16.msra.mxu1 %v2665_v37  ;;  %v2693_v37 = vld [vmem:[#allocation31 + $0x18] sm:$0xff]  }
 0x645   :  { %2278 = vmatprep.subr.bf16.mxu1 %v2666_v38  ;;  %v2694_v38 = vld [vmem:[#allocation31 + $0x20] sm:$0xff]  }
 0x648   :  { %2279 = vmatpush3.bf16.msra.mxu1 %v2667_v39  ;;  %v2695_v39 = vld [vmem:[#allocation31 + $0x28] sm:$0xff]  }
 0x649   :  { %2280 = vmatprep.subr.bf16.mxu1 %v2668_v41  ;;  %v2178_v41 = vld [vmem:[%s3872_s24] ss:$0 sm:$0xff] }
 0x64c   :  { %2281 = vmatpush3.bf16.msra.mxu1 %v2669_v43 }
 0x64d   :  { %2282 = vmatprep.subr.bf16.mxu1 %v2670_v54 }
 0x650   :  { %2283 = vmatpush3.bf16.msra.mxu1 %v2671_v55 }
 0x651   :  { %2284 = vmatprep.subr.bf16.mxu1 %v2672_v56 }
 0x654   :  { %2285 = vmatpush3.bf16.msra.mxu1 %v2673_v57 }
 0x655   :  { %2481 = vmatprep.subr.bf16.mxu1 %v3208_v1 }
 0x6ea   :  { %v3741_v44 = vpop.f32.mrb[8].mxu1 }
 0x6eb   :  { %v2419_v45 = vpop.f32.mrb[9].mxu1 }
 0x6ec   :  { %v1048_v46 = vpop.f32.mrb[10].mxu1 }
 0x6ed   :  { %v2420_v47 = vpop.f32.mrb[11].mxu1 }
 0x70a   :  { %v1269_v49 = vpop.f32.mrb[12].mxu1 }
 0x70b   :  { %v1270_v50 = vadd.f32 %v2136_v48, %v1269_v49  ;;  %v2459_v36 = vpop.f32.mrb[13].mxu1  ;;  %v2118_v48 = vld [vmem:[#allocation22] ss:$0 sm:$0xff] }
 0x70c   :  { %v1272_v51 = vpop.f32.mrb[14].mxu1 }
 0x70d   :  { %v1275_v52 = vmax.f32 %v1270_v50, 0.0  ;;  %v2460_v40 = vpop.f32.mrb[15].mxu1  ;;  %v1046_v51 = vadd.f32 %v2118_v48, %v3741_v44  ;;  %v2187_v44 = vld [vmem:[%s3873_s25] ss:$0 sm:$0xff] }
 0x70e   :  { %v2697_v40 = vld [vmem:[#allocation31 + $0x38] sm:$0xff]  }
 0x70f   :  { %v1276_v53 = vpack.c.bf16 %v1275_v52, %v1275_v52  ;;  %v2696_v52 = vld [vmem:[#allocation31 + $0x30] sm:$0xff]  }
 0x711   :  { %1418 = vmatmul.mubr.bf16.vlgmr.msra.gmra.mrb[16].mxu0 %v1276_v53  ;;  %v1945_v53 = vand.u32 127, %v353_v33 }
 0x712   :  { %2477 = vmatprep.mubr.msk.bf16.mxu0 %vm3209_vm0, %v3208_v1  ;;  %2462 = vmatpush3.bf16.msra.mxu0 %v2674_v58 }
 0x713   :  { %2463 = vmatprep.subr.bf16.mxu0 %v3208_v1  ;;  %vm1949_vm1 = vcmp.lt.s32.totalorder %v1945_v53, 4 }
 0x714   :  { %v2205_v54 = vsel %vm1949_vm1, 1.0, %v3208_v1 }
 0x716   :  { %2464 = vmatpush3.bf16.msra.mxu0 %v2675_v0 }
 0x717   :  { %2465 = vmatprep.subr.bf16.mxu0 %v3208_v1 }
 0x71a   :  { %2466 = vmatpush3.bf16.msra.mxu0 %v2676_v59 }
 0x71b   :  { %2467 = vmatprep.subr.bf16.mxu0 %v3208_v1 }
 0x71e   :  { %2468 = vmatpush3.bf16.msra.mxu0 %v2677_v60 }
 0x71f   :  { %2469 = vmatprep.subr.bf16.mxu0 %v3208_v1 }
 0x722   :  { %2470 = vmatpush3.bf16.msra.mxu0 %v2678_v61 }
 0x723   :  { %2471 = vmatprep.subr.bf16.mxu0 %v3208_v1 }
 0x726   :  { %2472 = vmatpush3.bf16.msra.mxu0 %v2679_v62 }
 0x727   :  { %2473 = vmatprep.subr.bf16.mxu0 %v3208_v1 }
 0x72a   :  { %2474 = vmatpush3.bf16.msra.mxu0 %v2680_v34 }
 0x72b   :  { %2475 = vmatprep.subr.bf16.mxu0 %v3208_v1 }
 0x72e   :  { %2476 = vmatpush3.bf16.msra.mxu0 %v2681_v35 }
 0x72f   :  { %2501 = vmatprep.subr.bf16.mxu0 %v3208_v1 }
 0x7e4   :  { %v1419_v4 = vpop.f32.mrb[16].mxu0 }
 0x7e5   :  { %v1420_v5 = vadd.f32 %v1419_v4, %v1298_v2  ;;  %v1421_v6 = vpop.f32.mrb[17].mxu0 }
 0x7e6   :  { %v1422_v7 = vadd.f32 %v1421_v6, %v1302_v3  ;;  %v1423_v8 = vpop.f32.mrb[18].mxu0 }
 0x7e7   :  { %v1426_v9 = vmax.f32 %v1420_v5, 0.0  ;;  %v1424_v10 = vpop.f32.mrb[19].mxu0 }
 0x7e8   :  { %v1427_v11 = vmax.f32 %v1422_v7, 0.0 }
 0x7e9   :  { %v1428_v13 = vpack.c.bf16 %v1426_v9, %v1426_v9 }
 0x7ea   :  { %v1429_v12 = vpack.c.bf16 %v1427_v11, %v1427_v11 }
 0x7ec   :  { %1597 = vmatprep.mubr.bf16.mxu1 %v1429_v12 }
 0x7ed   :  { %1598 = vmatmul.mubr.bf16.vlgmr.msra.gmra.mrb[16].mxu1 %v1428_v13 }
 0x7ee   :  { %2497 = vmatprep.mubr.msk.bf16.mxu1 %vm3209_vm0, %v3208_v1  ;;  %2482 = vmatpush3.bf16.msra.mxu1 %v2682_v42 }
 0x7ef   :  { %2483 = vmatprep.subr.bf16.mxu1 %v3208_v1 }
 0x7f2   :  { %2484 = vmatpush3.bf16.msra.mxu1 %v2683_v14 }
 0x7f3   :  { %2485 = vmatprep.subr.bf16.mxu1 %v3208_v1 }
 0x7f6   :  { %2486 = vmatpush3.bf16.msra.mxu1 %v2684_v15 }
 0x7f7   :  { %2487 = vmatprep.subr.bf16.mxu1 %v3208_v1 }
 0x7fa   :  { %2488 = vmatpush3.bf16.msra.mxu1 %v2685_v16 }
 0x7fb   :  { %2489 = vmatprep.subr.bf16.mxu1 %v3208_v1 }
 0x7fe   :  { %2490 = vmatpush3.bf16.msra.mxu1 %v2686_v17 }
 0x7ff   :  { %2491 = vmatprep.subr.bf16.mxu1 %v3208_v1 }
 0x802   :  { %2492 = vmatpush3.bf16.msra.mxu1 %v2687_v18 }
 0x803   :  { %2493 = vmatprep.subr.bf16.mxu1 %v3208_v1 }
 0x806   :  { %2494 = vmatpush3.bf16.msra.mxu1 %v2688_v19 }
 0x807   :  { %2495 = vmatprep.subr.bf16.mxu1 %v3208_v1 }
 0x80a   :  { %2496 = vmatpush3.bf16.msra.mxu1 %v2689_v29 }
 0x80b   :  { %2521 = vmatprep.subr.mxu1 %v3208_v1 }
 0x8c0   :  { %v2286_v20 = vpop.f32.mrb[16].mxu1 }
 0x8c1   :  { %v2287_v22 = vpop.f32.mrb[17].mxu1 }
 0x8c2   :  { %v2288_v23 = vadd.f32 %v2287_v22, %v2286_v20  ;;  %v2289_v24 = vpop.f32.mrb[18].mxu1 }
 0x8c3   :  { %v2290_v25 = vpop.f32.mrb[19].mxu1 }
 0x8c4   :  { %v1600_v26 = vadd.f32 %v2288_v23, %v2161_v21 }
 0x8c6   :  { %v1605_v27 = vmax.f32 %v1600_v26, 0.0 }
 0x8c8   :  { %v1606_v28 = vpack.c.bf16 %v1605_v27, %v1605_v27 }
 0x8ca   :  { %2478 = vmatmul.mubr.bf16.vlgmr.msra.gmra.mrb[20].mxu0 %v1606_v28 }
 0x8cb   :  { %2517 = vmatprep.mubr.msk.bf16.mxu0 %vm3209_vm0, %v3208_v1  ;;  %2502 = vmatpush3.bf16.msra.mxu0 %v2690_v30 }
 0x8cc   :  { %2503 = vmatprep.subr.bf16.mxu0 %v3208_v1 }
 0x8cf   :  { %2504 = vmatpush3.bf16.msra.mxu0 %v2691_v31 }
 0x8d0   :  { %2505 = vmatprep.subr.bf16.mxu0 %v3208_v1 }
 0x8d3   :  { %2506 = vmatpush3.bf16.msra.mxu0 %v2692_v32 }
 0x8d4   :  { %2507 = vmatprep.subr.bf16.mxu0 %v3208_v1 }
 0x8d7   :  { %2508 = vmatpush3.bf16.msra.mxu0 %v2693_v37 }
 0x8d8   :  { %2509 = vmatprep.subr.bf16.mxu0 %v3208_v1 }
 0x8db   :  { %2510 = vmatpush3.bf16.msra.mxu0 %v2694_v38 }
 0x8dc   :  { %2511 = vmatprep.subr.bf16.mxu0 %v3208_v1 }
 0x8df   :  { %2512 = vmatpush3.bf16.msra.mxu0 %v2695_v39 }
 0x8e0   :  { %2513 = vmatprep.subr.bf16.mxu0 %v3208_v1 }
 0x8e3   :  { %2514 = vmatpush3.bf16.msra.mxu0 %v2696_v52 }
 0x8e4   :  { %2515 = vmatprep.subr.bf16.mxu0 %v3208_v1 }
 0x8e7   :  { %2516 = vmatpush3.bf16.msra.mxu0 %v2697_v40 }
 0x99d   :  { %v1712_v43 = vpop.f32.mrb[20].mxu0 }
 0x99e   :  { %v1713_v45 = vadd.f32 %v2178_v41, %v1712_v43  ;;  %v2479_v46 = vpop.f32.mrb[21].mxu0 }
 0x99f   :  { %v1715_v47 = vpop.f32.mrb[22].mxu0 }
 0x9a0   :  { %v1718_v49 = vmax.f32 %v1713_v45, 0.0  ;;  %v2480_v50 = vpop.f32.mrb[23].mxu0 }
 0x9a2   :  { %v1719_v36 = vpack.c.bf16 %v1718_v49, %v1718_v49 }
 0x9a4   :  { %2498 = vmatmul.mubr.bf16.vlgmr.msra.gmra.mrb[20].mxu1 %v1719_v36 }
 0x9a5   :  { %2522 = vmatpush3.msra.mxu1 %v1046_v51  ;;  %2523 = vmatprep.mubr.msk.f32.mxu1 %vm3209_vm0, %v3208_v1 }
 0x9ac   :  { %2524 = vmatmul.mubr.msk.f32.vlgmr.msra.gmra.mrb[24].mxu1 %vm1952_vm2, %v2205_v54 }
 0xa77   :  { %v1825_v55 = vpop.f32.mrb[20].mxu1 }
 0xa78   :  { %v1826_v56 = vadd.f32 %v2187_v44, %v1825_v55  ;;  %v2499_v57 = vpop.f32.mrb[21].mxu1 }
 0xa79   :  { %v1828_v58 = vpop.f32.mrb[22].mxu1 }
 0xa7a   :  { %v1831_v0 = vmax.f32 %v1826_v56, 0.0  ;;  %v2500_v59 = vpop.f32.mrb[23].mxu1 }
 0xa7c   :  { %v1832_v60 = vpack.c.bf16 %v1831_v0, %v1831_v0 }
 0xa7e   :  { %2518 = vmatmul.mubr.bf16.vlgmr.msra.gmra.mrb[24].mxu0 %v1832_v60 }
 0xa7f   :  { %v2022_v61 = vpop.f32.mrb[24].mxu1 }
 0xa80   :  { %2026 = vst [vmem:[#allocation32] sm:$0x1] %v2022_v61  ;;  %v2525_v33 = vpop.f32.mrb[25].mxu1 }
 0xa81   :  { %3127 = shalt.err (!%p3124_p2)
}
 0xa82   :  { %s3925_s3 = sld [smem:[#allocation61_spill]] }
 0xa88   :  { %s3128_s21 = scalar_lea.hbm %s3925_s3, 16 }
 0xa89   :  { %p3129_p3 = scmp.ne.s32.totalorder %s3925_s3, %s3128_s21  ;;  %p3132_p4 = scmp.lt.u32.totalorder %s3128_s21, %s3925_s3 }
 0xa8b   :  { %p3134_p5 = pnand %p3132_p4, %p3129_p3 }
 0xa8d   :  { %3137 = shalt.err (!%p3134_p5)
}
 0xa8e   :  { %2037 = dma.vmem_to_hbm [thread:$0]  %s2035_s10, 16, %s3925_s3, [#allocation4]  }
 0xa8f   :  { %s3926_s6 = sld [smem:[#allocation60_spill]]  ;;  %s3211_s12 = smov [#allocation33]  }
 0xa90   :  { %s2044_s27 = sshll.u32 %s3211_s12, 4  ;;  %s2045_s27 = int_to_ptr.vmem [resolvable:$true] %s2044_s27 }
 0xa91   :  { %s3138_s0 = scalar_lea.vmem %s2045_s27, 128  ;;  %p3143_p7 = scmp.lt.s32.totalorder %s2045_s27, %s2045_s27 }
 0xa92   :  { %p3139_p6 = scmp.ne.s32.totalorder %s2045_s27, %s3138_s0  ;;  %p3144_p8 = scmp.lt.s32.totalorder %s3138_s0, %s3138_s0 }
 0xa94   :  { %p3145_p9 = por %p3144_p8, %p3143_p7 }
 0xa95   :  { %v2196_v1 = vld [vmem:[%s3926_s6] ss:$0 sm:$0xff] }
 0xa96   :  { %p3146_p10 = pnand %p3145_p9, %p3139_p6 }
 0xb51   :  { %v1938_v62 = vpop.f32.mrb[24].mxu0 }
 0xb52   :  { %v1939_v63 = vadd.f32 %v2196_v1, %v1938_v62  ;;  %v2519_v2 = vpop.f32.mrb[25].mxu0 }
 0xb53   :  { %v1941_v3 = vpop.f32.mrb[26].mxu0 }
 0xb54   :  { %2027 = vst [vmem:[#allocation33] sm:$0xff] %v1939_v63  ;;  %v2520_v4 = vpop.f32.mrb[27].mxu0 }
 0xb55   :  { %3149 = shalt.err (!%p3146_p10)
}
 0xb56   :  { %s3927_s4 = sld [smem:[#allocation62_spill]] }
 0xb5c   :  { %s3150_s18 = scalar_lea.hbm %s3927_s4, 128 }
 0xb5d   :  { %p3151_p11 = scmp.ne.s32.totalorder %s3927_s4, %s3150_s18  ;;  %p3154_p12 = scmp.lt.u32.totalorder %s3150_s18, %s3927_s4 }
 0xb5f   :  { %p3156_p13 = pnand %p3154_p12, %p3151_p11 }
 0xb61   :  { %3159 = shalt.err (!%p3156_p13)
}
 0xb62   :  { %2047 = dma.vmem_to_hbm [thread:$0]  %s2045_s27, 128, %s3927_s4, [#allocation34]  }
 0xb63   :  { %3180 = dma.done.wait [#allocation4], 16  }
 0xb64   :  { %3181 = vsyncadd [#allocation4], 4294967280 }
 0xb65   :  { %3182 = dma.done.wait [#allocation34], 128  }
 0xb66   :  { %3183 = vsyncadd [#allocation34], 4294967168 }
 0xb67   :  { %2054 = vsyncpa [#allocation3], 1 }
 0xb68   :  { %2055 = vsyncpa [#allocation6], 1 }
 0xb69   :  { %2056 = vsyncpa [#allocation9], 1 }
 0xb6a   :  { %2057 = vsyncpa [#allocation12], 1 }
 0xb6b   :  { %2058 = vsyncpa [#allocation15], 1 }
 0xb6c   :  { %2059 = vsyncpa [#allocation18], 1 }
 0xb6d   :  { %2060 = vsyncpa [#allocation21], 1 }
 0xb6e   :  { %2061 = vsyncpa [#allocation24], 1 }
 0xb6f   :  { %2062 = vsyncpa [#allocation27], 1 }
 0xb70   :  { %2063 = vsyncpa [#allocation30], 1 }
 0xb71   :  { %2064 = vsyncpa [#allocation4], 1 }
 0xb72   :  { %2065 = vsyncpa [#allocation34], 1 }

// kernel: tpu_custom_call.1
= control target key start
LH: loop header
LB: loop body
LE: loop exit
PB: predicated region body
PF: predicated region fallthrough
CT: control target
= control target key end

     0   :  { %s3848_s0 = inlined_call_operand.hbm [shape: bf16[8,128], index: 0, kind: input, shape index: {}]   ;;  %s3849_s1 = inlined_call_operand.hbm [shape: bf16[128,256], index: 1, kind: input, shape index: {}]   ;;  %s3850_s2 = inlined_call_operand.hbm [shape: f32[1,256], index: 2, kind: input, shape index: {}]   ;;  %s3851_s3 = inlined_call_operand.hbm [shape: bf16[128,128], index: 3, kind: input, shape index: {}]   ;;  %s3852_s4 = inlined_call_operand.hbm [shape: bf16[128,128], index: 4, kind: input, shape index: {}]   ;;  %s3853_s5 = inlined_call_operand.hbm [shape: bf16[128,128], index: 5, kind: input, shape index: {}]   ;;  %s3854_s6 = inlined_call_operand.hbm [shape: bf16[128,128], index: 6, kind: input, shape index: {}]   ;;  %s3855_s7 = inlined_call_operand.hbm [shape: bf16[128,128], index: 7, kind: input, shape index: {}]   ;;  %s3856_s8 = inlined_call_operand.hbm [shape: f32[1,128], index: 8, kind: input, shape index: {}]   ;;  %s3857_s9 = inlined_call_operand.hbm [shape: f32[1,128], index: 9, kind: input, shape index: {}]   ;;  %s3858_s10 = inlined_call_operand.hbm [shape: f32[1,128], index: 10, kind: input, shape index: {}]   ;;  %s3859_s11 = inlined_call_operand.hbm [shape: f32[1,128], index: 11, kind: input, shape index: {}]   ;;  %s3860_s12 = inlined_call_operand.hbm [shape: f32[1,128], index: 12, kind: input, shape index: {}]   ;;  %s3861_s13 = inlined_call_operand.hbm [shape: bf16[128,128], index: 13, kind: input, shape index: {}]   ;;  %s3862_s14 = inlined_call_operand.hbm [shape: bf16[128,128], index: 14, kind: input, shape index: {}]   ;;  %s3863_s15 = inlined_call_operand.hbm [shape: bf16[128,256], index: 15, kind: input, shape index: {}]   ;;  %s3864_s16 = inlined_call_operand.hbm [shape: bf16[256,128], index: 16, kind: input, shape index: {}]   ;;  %s3865_s17 = inlined_call_operand.vmem [shape: bf16[128,128], index: 17, kind: input, shape index: {}]   ;;  %s3866_s18 = inlined_call_operand.hbm [shape: bf16[128,128], index: 18, kind: input, shape index: {}]   ;;  %s3867_s19 = inlined_call_operand.hbm [shape: bf16[128,128], index: 19, kind: input, shape index: {}]   ;;  %s3868_s20 = inlined_call_operand.vmem [shape: f32[1,128], index: 20, kind: input, shape index: {}]   ;;  %s3869_s21 = inlined_call_operand.vmem [shape: f32[1,128], index: 21, kind: input, shape index: {}]   ;;  %s3870_s22 = inlined_call_operand.vmem [shape: f32[1,256], index: 22, kind: input, shape index: {}]   ;;  %s3871_s23 = inlined_call_operand.vmem [shape: f32[1,128], index: 23, kind: input, shape index: {}]   ;;  %s3872_s24 = inlined_call_operand.vmem [shape: f32[1,128], index: 24, kind: input, shape index: {}]   ;;  %s3873_s25 = inlined_call_operand.vmem [shape: f32[1,128], index: 25, kind: input, shape index: {}]   ;;  %s3874_s26 = inlined_call_operand.vmem [shape: f32[1,128], index: 26, kind: input, shape index: {}]   ;;  %s3875_s27 = inlined_call_operand.hbm [shape: f32[1,1,128], index: 27, kind: output, shape index: {0}]   ;;  %s3876_s28 = inlined_call_operand.hbm [shape: f32[8,128], index: 28, kind: output, shape index: {1}]  }
   0x1   :  { %3894 = sst [smem:[#allocation47_spill]] %s3848_s0 }
   0x2   :  { %3895 = sst [smem:[#allocation48_spill]] %s3849_s1 }
   0x3   :  { %3896 = sst [smem:[#allocation49_spill]] %s3850_s2 }
   0x4   :  { %3897 = sst [smem:[#allocation50_spill]] %s3851_s3 }
   0x5   :  { %3898 = sst [smem:[#allocation51_spill]] %s3852_s4 }
   0x6   :  { %3899 = sst [smem:[#allocation52_spill]] %s3853_s5 }
   0x7   :  { %3900 = sst [smem:[#allocation53_spill]] %s3854_s6 }
   0x8   :  { %3901 = sst [smem:[#allocation54_spill]] %s3855_s7 }
   0x9   :  { %3902 = sst [smem:[#allocation55_spill]] %s3856_s8 }
   0xa   :  { %3903 = sst [smem:[#allocation56_spill]] %s3857_s9 }
   0xb   :  { %3904 = sst [smem:[#allocation57_spill]] %s3858_s10 }
   0xc   :  { %3905 = sst [smem:[#allocation58_spill]] %s3859_s11 }
   0xd   :  { %3906 = sst [smem:[#allocation59_spill]] %s3860_s12 }
   0xe   :  { %3907 = sst [smem:[#allocation60_spill]] %s3874_s26 }
   0xf   :  { %3908 = sst [smem:[#allocation61_spill]] %s3875_s27 }
  0x10   :  { %3909 = sst [smem:[#allocation62_spill]] %s3876_s28 }
  0x11   :  { %34 = vsyncpa [#allocation3], 0 }
  0x12   :  { %35 = vsyncpa [#allocation6], 0 }
  0x13   :  { %36 = vsyncpa [#allocation9], 0 }
  0x14   :  { %37 = vsyncpa [#allocation12], 0 }
  0x15   :  { %38 = vsyncpa [#allocation15], 0 }
  0x16   :  { %39 = vsyncpa [#allocation18], 0 }
  0x17   :  { %40 = vsyncpa [#allocation21], 0 }
  0x18   :  { %41 = vsyncpa [#allocation24], 0 }
  0x19   :  { %42 = vsyncpa [#allocation27], 0 }
  0x1a   :  { %43 = vsyncpa [#allocation30], 0 }
  0x1b   :  { %44 = vsyncpa [#allocation4], 0 }
  0x1c   :  { %45 = vsyncpa [#allocation34], 0  ;;  %s3184_s8 = smov [#allocation5]   ;;  %s3910_s3 = sld [smem:[#allocation48_spill]] }
  0x1d   :  { %s61_s5 = sshll.u32 %s3184_s8, 4  ;;  %s62_s5 = int_to_ptr.vmem [resolvable:$true] %s61_s5 }
  0x22   :  { %s2698_s6 = scalar_lea.hbm %s3910_s3, 2048 }
  0x23   :  { %p2699_p0 = scmp.ne.s32.totalorder %s3910_s3, %s2698_s6  ;;  %p2702_p1 = scmp.lt.u32.totalorder %s2698_s6, %s3910_s3 }
  0x25   :  { %p2704_p2 = pnand %p2702_p1, %p2699_p0 }
  0x27   :  { %2707 = shalt.err (!%p2704_p2)
}
  0x28   :  { %s2708_s2 = scalar_lea.vmem %s62_s5, 2048  ;;  %p2713_p4 = scmp.lt.s32.totalorder %s62_s5, %s62_s5 }
  0x29   :  { %p2709_p3 = scmp.ne.s32.totalorder %s62_s5, %s2708_s2  ;;  %p2714_p5 = scmp.lt.s32.totalorder %s2708_s2, %s2708_s2 }
  0x2b   :  { %p2715_p6 = por %p2714_p5, %p2713_p4 }
  0x2d   :  { %p2716_p7 = pnand %p2715_p6, %p2709_p3 }
  0x2f   :  { %2719 = shalt.err (!%p2716_p7)
}
  0x30   :  { %s3891_s7 = smov 128   ;;  %s3892_s12 = smov 8  }
  0x31   :  { %67 = dma.hbm_to_vmem [thread:$0]  %s3910_s3, 2048, %s62_s5, [#allocation6], %s3891_s7, %s3891_s7, %s3892_s12  }
  0x32   :  { %s3187_s8 = smov [#allocation8]   ;;  %s3911_s10 = sld [smem:[#allocation50_spill]] }
  0x33   :  { %s83_s9 = sshll.u32 %s3187_s8, 4  ;;  %s84_s9 = int_to_ptr.vmem [resolvable:$true] %s83_s9 }
  0x38   :  { %s2720_s0 = scalar_lea.hbm %s3911_s10, 1024 }
  0x39   :  { %p2721_p8 = scmp.ne.s32.totalorder %s3911_s10, %s2720_s0  ;;  %p2724_p9 = scmp.lt.u32.totalorder %s2720_s0, %s3911_s10 }
  0x3b   :  { %p2726_p10 = pnand %p2724_p9, %p2721_p8 }
  0x3d   :  { %2729 = shalt.err (!%p2726_p10)
}
  0x3e   :  { %s2730_s26 = scalar_lea.vmem %s84_s9, 1024  ;;  %p2735_p12 = scmp.lt.s32.totalorder %s84_s9, %s84_s9 }
  0x3f   :  { %p2731_p11 = scmp.ne.s32.totalorder %s84_s9, %s2730_s26  ;;  %p2736_p13 = scmp.lt.s32.totalorder %s2730_s26, %s2730_s26 }
  0x41   :  { %p2737_p0 = por %p2736_p13, %p2735_p12 }
  0x43   :  { %p2738_p1 = pnand %p2737_p0, %p2731_p11 }
  0x45   :  { %2741 = shalt.err (!%p2738_p1)
}
  0x46   :  { %s3188_s5 = smov 64   ;;  %s3189_s3 = smov 4  }
  0x47   :  { %89 = dma.hbm_to_vmem [thread:$0]  %s3911_s10, 1024, %s84_s9, [#allocation9], %s3188_s5, %s3188_s5, %s3189_s3  }
  0x48   :  { %s3190_s28 = smov [#allocation11]   ;;  %s3191_s30 = smov [#allocation14]  }
  0x49   :  { %s107_s8 = sshll.u32 %s3190_s28, 4  ;;  %s131_s6 = sshll.u32 %s3191_s30, 4  ;;  %s108_s8 = int_to_ptr.vmem [resolvable:$true] %s107_s8  ;;  %s3387_s6 = int_to_ptr.vmem [resolvable:$true] %s131_s6 }
  0x4a   :  { %s3912_s11 = sld [smem:[#allocation52_spill]] }
  0x50   :  { %s2742_s29 = scalar_lea.hbm %s3912_s11, 1024 }
  0x51   :  { %p2743_p2 = scmp.ne.s32.totalorder %s3912_s11, %s2742_s29  ;;  %p2746_p3 = scmp.lt.u32.totalorder %s2742_s29, %s3912_s11 }
  0x53   :  { %p2748_p4 = pnand %p2746_p3, %p2743_p2 }
  0x55   :  { %2751 = shalt.err (!%p2748_p4)
}
  0x56   :  { %s2752_s9 = scalar_lea.vmem %s108_s8, 1024  ;;  %p2757_p6 = scmp.lt.s32.totalorder %s108_s8, %s108_s8 }
  0x57   :  { %p2753_p5 = scmp.ne.s32.totalorder %s108_s8, %s2752_s9  ;;  %p2758_p7 = scmp.lt.s32.totalorder %s2752_s9, %s2752_s9 }
  0x59   :  { %p2759_p8 = por %p2758_p7, %p2757_p6 }
  0x5b   :  { %p2760_p9 = pnand %p2759_p8, %p2753_p5 }
  0x5d   :  { %2763 = shalt.err (!%p2760_p9)
}
  0x5e   :  { %113 = dma.hbm_to_vmem [thread:$0]  %s3912_s11, 1024, %s108_s8, [#allocation12], %s3188_s5, %s3188_s5, %s3189_s3  }
  0x5f   :  { %s3913_s27 = sld [smem:[#allocation54_spill]] }
  0x65   :  { %s2764_s12 = scalar_lea.hbm %s3913_s27, 1024 }
  0x66   :  { %p2765_p10 = scmp.ne.s32.totalorder %s3913_s27, %s2764_s12  ;;  %p2768_p11 = scmp.lt.u32.totalorder %s2764_s12, %s3913_s27 }
  0x68   :  { %p2770_p12 = pnand %p2768_p11, %p2765_p10 }
  0x6a   :  { %2773 = shalt.err (!%p2770_p12)
}
  0x6b   :  { %s2774_s29 = scalar_lea.vmem %s3387_s6, 1024  ;;  %p2779_p0 = scmp.lt.s32.totalorder %s3387_s6, %s3387_s6 }
  0x6c   :  { %p2775_p13 = scmp.ne.s32.totalorder %s3387_s6, %s2774_s29  ;;  %p2780_p1 = scmp.lt.s32.totalorder %s2774_s29, %s2774_s29 }
  0x6e   :  { %p2781_p2 = por %p2780_p1, %p2779_p0 }
  0x70   :  { %p2782_p3 = pnand %p2781_p2, %p2775_p13 }
  0x72   :  { %2785 = shalt.err (!%p2782_p3)
}
  0x73   :  { %137 = dma.hbm_to_vmem [thread:$0]  %s3913_s27, 1024, %s3387_s6, [#allocation15], %s3188_s5, %s3188_s5, %s3189_s3  }
  0x74   :  { %s3192_s2 = smov [#allocation17]   ;;  %s3193_s10 = smov [#allocation20]  }
  0x75   :  { %s154_s9 = sshll.u32 %s3192_s2, 4  ;;  %s174_s1 = sshll.u32 %s3193_s10, 4  ;;  %s155_s9 = int_to_ptr.vmem [resolvable:$true] %s154_s9  ;;  %s175_s1 = int_to_ptr.vmem [resolvable:$true] %s174_s1 }
  0x76   :  { %s3914_s12 = sld [smem:[#allocation56_spill]] }
  0x7c   :  { %s2786_s28 = scalar_lea.hbm %s3914_s12, 16 }
  0x7d   :  { %p2787_p4 = scmp.ne.s32.totalorder %s3914_s12, %s2786_s28  ;;  %p2790_p5 = scmp.lt.u32.totalorder %s2786_s28, %s3914_s12 }
  0x7f   :  { %p2792_p6 = pnand %p2790_p5, %p2787_p4 }
  0x81   :  { %2795 = shalt.err (!%p2792_p6)
}
  0x82   :  { %s2796_s6 = scalar_lea.vmem %s155_s9, 16  ;;  %s2800_s27 = scalar_lea.vmem %s155_s9, 32 }
  0x83   :  { %p2797_p7 = scmp.ne.s32.totalorder %s155_s9, %s2796_s6  ;;  %p2801_p8 = scmp.lt.s32.totalorder %s155_s9, %s155_s9 }
  0x84   :  { %p2802_p9 = scmp.lt.s32.totalorder %s2800_s27, %s2796_s6 }
  0x86   :  { %p2803_p10 = por %p2802_p9, %p2801_p8 }
  0x88   :  { %p2804_p11 = pnand %p2803_p10, %p2797_p7 }
  0x8a   :  { %2807 = shalt.err (!%p2804_p11)
}
  0x8b   :  { %157 = dma.hbm_to_vmem [thread:$0]  %s3914_s12, 16, %s155_s9, [#allocation18]  }
  0x8c   :  { %s3915_s7 = sld [smem:[#allocation58_spill]] }
  0x92   :  { %s2808_s4 = scalar_lea.hbm %s3915_s7, 16 }
  0x93   :  { %p2809_p12 = scmp.ne.s32.totalorder %s3915_s7, %s2808_s4  ;;  %p2812_p13 = scmp.lt.u32.totalorder %s2808_s4, %s3915_s7 }
  0x95   :  { %p2814_p0 = pnand %p2812_p13, %p2809_p12 }
  0x97   :  { %2817 = shalt.err (!%p2814_p0)
}
  0x98   :  { %s2818_s29 = scalar_lea.vmem %s175_s1, 16  ;;  %s2822_s6 = scalar_lea.vmem %s175_s1, 32 }
  0x99   :  { %p2819_p1 = scmp.ne.s32.totalorder %s175_s1, %s2818_s29  ;;  %p2823_p2 = scmp.lt.s32.totalorder %s175_s1, %s175_s1 }
  0x9a   :  { %p2824_p3 = scmp.lt.s32.totalorder %s2822_s6, %s2818_s29 }
  0x9c   :  { %p2825_p4 = por %p2824_p3, %p2823_p2 }
  0x9e   :  { %p2826_p5 = pnand %p2825_p4, %p2819_p1 }
  0xa0   :  { %2829 = shalt.err (!%p2826_p5)
}
  0xa1   :  { %177 = dma.hbm_to_vmem [thread:$0]  %s3915_s7, 16, %s175_s1, [#allocation21]  }
  0xa2   :  { %s3194_s27 = smov [#allocation23]   ;;  %s3195_s11 = smov [#allocation26]  }
  0xa3   :  { %s193_s8 = sshll.u32 %s3194_s27, 4  ;;  %s217_s2 = sshll.u32 %s3195_s11, 4  ;;  %s194_s8 = int_to_ptr.vmem [resolvable:$true] %s193_s8  ;;  %s3448_s2 = int_to_ptr.vmem [resolvable:$true] %s217_s2 }
  0xa4   :  { %s2830_s30 = scalar_lea.hbm %s3861_s13, 1024 }
  0xa5   :  { %p2831_p6 = scmp.ne.s32.totalorder %s3861_s13, %s2830_s30  ;;  %p2834_p7 = scmp.lt.u32.totalorder %s2830_s30, %s3861_s13 }
  0xa7   :  { %p2836_p8 = pnand %p2834_p7, %p2831_p6 }
  0xa9   :  { %2839 = shalt.err (!%p2836_p8)
}
  0xaa   :  { %s2840_s1 = scalar_lea.vmem %s194_s8, 1024  ;;  %p2845_p10 = scmp.lt.s32.totalorder %s194_s8, %s194_s8 }
  0xab   :  { %p2841_p9 = scmp.ne.s32.totalorder %s194_s8, %s2840_s1  ;;  %p2846_p11 = scmp.lt.s32.totalorder %s2840_s1, %s2840_s1 }
  0xad   :  { %p2847_p12 = por %p2846_p11, %p2845_p10 }
  0xaf   :  { %p2848_p13 = pnand %p2847_p12, %p2841_p9 }
  0xb1   :  { %2851 = shalt.err (!%p2848_p13)
}
  0xb2   :  { %199 = dma.hbm_to_vmem [thread:$0]  %s3861_s13, 1024, %s194_s8, [#allocation24], %s3188_s5, %s3188_s5, %s3189_s3  }
  0xb3   :  { %s2852_s27 = scalar_lea.hbm %s3863_s15, 2048 }
  0xb4   :  { %p2853_p0 = scmp.ne.s32.totalorder %s3863_s15, %s2852_s27  ;;  %p2856_p1 = scmp.lt.u32.totalorder %s2852_s27, %s3863_s15 }
  0xb6   :  { %p2858_p2 = pnand %p2856_p1, %p2853_p0 }
  0xb8   :  { %2861 = shalt.err (!%p2858_p2)
}
  0xb9   :  { %s2862_s28 = scalar_lea.vmem %s3448_s2, 2048  ;;  %p2867_p4 = scmp.lt.s32.totalorder %s3448_s2, %s3448_s2 }
  0xba   :  { %p2863_p3 = scmp.ne.s32.totalorder %s3448_s2, %s2862_s28  ;;  %p2868_p5 = scmp.lt.s32.totalorder %s2862_s28, %s2862_s28 }
  0xbc   :  { %p2869_p6 = por %p2868_p5, %p2867_p4 }
  0xbe   :  { %p2870_p7 = pnand %p2869_p6, %p2863_p3 }
  0xc0   :  { %2873 = shalt.err (!%p2870_p7)
}
  0xc1   :  { %s3916_s13 = smov 8   ;;  %s3917_s8 = smov 128  }
  0xc2   :  { %223 = dma.hbm_to_vmem [thread:$0]  %s3863_s15, 2048, %s3448_s2, [#allocation27], %s3917_s8, %s3917_s8, %s3916_s13  }
  0xc3   :  { %s3196_s29 = smov [#allocation29]   ;;  %s3197_s7 = smov [#allocation2]  }
  0xc4   :  { %s243_s1 = sshll.u32 %s3196_s29, 4  ;;  %s52_s6 = sshll.u32 %s3197_s7, 4  ;;  %s244_s1 = int_to_ptr.vmem [resolvable:$true] %s243_s1  ;;  %s53_s6 = int_to_ptr.vmem [resolvable:$true] %s52_s6 }
  0xc5   :  { %s2874_s27 = scalar_lea.hbm %s3866_s18, 1024 }
  0xc6   :  { %p2875_p8 = scmp.ne.s32.totalorder %s3866_s18, %s2874_s27  ;;  %p2878_p9 = scmp.lt.u32.totalorder %s2874_s27, %s3866_s18 }
  0xc8   :  { %p2880_p10 = pnand %p2878_p9, %p2875_p8 }
  0xca   :  { %2883 = shalt.err (!%p2880_p10)
}
  0xcb   :  { %s2884_s15 = scalar_lea.vmem %s244_s1, 1024  ;;  %p2889_p12 = scmp.lt.s32.totalorder %s244_s1, %s244_s1 }
  0xcc   :  { %p2885_p11 = scmp.ne.s32.totalorder %s244_s1, %s2884_s15  ;;  %p2890_p13 = scmp.lt.s32.totalorder %s2884_s15, %s2884_s15 }
  0xce   :  { %p2891_p0 = por %p2890_p13, %p2889_p12 }
  0xd0   :  { %p2892_p1 = pnand %p2891_p0, %p2885_p11 }
  0xd2   :  { %2895 = shalt.err (!%p2892_p1)
}
  0xd3   :  { %249 = dma.hbm_to_vmem [thread:$0]  %s3866_s18, 1024, %s244_s1, [#allocation30], %s3188_s5, %s3188_s5, %s3189_s3  }
  0xd4   :  { %s3918_s26 = sld [smem:[#allocation47_spill]] }
  0xda   :  { %s2896_s0 = scalar_lea.hbm %s3918_s26, 64 }
  0xdb   :  { %p2897_p2 = scmp.ne.s32.totalorder %s3918_s26, %s2896_s0  ;;  %p2900_p3 = scmp.lt.u32.totalorder %s2896_s0, %s3918_s26 }
  0xdd   :  { %p2902_p4 = pnand %p2900_p3, %p2897_p2 }
  0xdf   :  { %2905 = shalt.err (!%p2902_p4)
}
  0xe0   :  { %s2906_s27 = scalar_lea.vmem %s53_s6, 64  ;;  %p2911_p6 = scmp.lt.s32.totalorder %s53_s6, %s53_s6 }
  0xe1   :  { %p2907_p5 = scmp.ne.s32.totalorder %s53_s6, %s2906_s27  ;;  %p2912_p7 = scmp.lt.s32.totalorder %s2906_s27, %s2906_s27 }
  0xe3   :  { %p2913_p8 = por %p2912_p7, %p2911_p6 }
  0xe5   :  { %p2914_p9 = pnand %p2913_p8, %p2907_p5 }
  0xe7   :  { %2917 = shalt.err (!%p2914_p9)
}
  0xe8   :  { %55 = dma.hbm_to_vmem [thread:$0]  %s3918_s26, 64, %s53_s6, [#allocation3]  }
  0xe9   :  { %s3198_s11 = smov [#allocation7]   ;;  %s3199_s4 = smov [#allocation10]  }
  0xea   :  { %s74_s10 = sshll.u32 %s3198_s11, 4  ;;  %s95_s30 = sshll.u32 %s3199_s4, 4  ;;  %s75_s10 = int_to_ptr.vmem [resolvable:$true] %s74_s10  ;;  %s3512_s30 = int_to_ptr.vmem [resolvable:$true] %s95_s30 }
  0xeb   :  { %s3919_s28 = sld [smem:[#allocation49_spill]] }
  0xf1   :  { %s2918_s13 = scalar_lea.hbm %s3919_s28, 32 }
  0xf2   :  { %p2919_p10 = scmp.ne.s32.totalorder %s3919_s28, %s2918_s13  ;;  %p2922_p11 = scmp.lt.u32.totalorder %s2918_s13, %s3919_s28 }
  0xf4   :  { %p2924_p12 = pnand %p2922_p11, %p2919_p10 }
  0xf6   :  { %2927 = shalt.err (!%p2924_p12)
}
  0xf7   :  { %s2928_s6 = scalar_lea.vmem %s75_s10, 32  ;;  %p2933_p0 = scmp.lt.s32.totalorder %s75_s10, %s75_s10 }
  0xf8   :  { %p2929_p13 = scmp.ne.s32.totalorder %s75_s10, %s2928_s6  ;;  %p2934_p1 = scmp.lt.s32.totalorder %s2928_s6, %s2928_s6 }
  0xfa   :  { %p2935_p2 = por %p2934_p1, %p2933_p0 }
  0xfc   :  { %p2936_p3 = pnand %p2935_p2, %p2929_p13 }
  0xfe   :  { %2939 = shalt.err (!%p2936_p3)
}
  0xff   :  { %77 = dma.hbm_to_vmem [thread:$0]  %s3919_s28, 32, %s75_s10, [#allocation6]  }
 0x100   :  { %s3920_s18 = sld [smem:[#allocation51_spill]] }
 0x106   :  { %s2940_s1 = scalar_lea.hbm %s3920_s18, 1024 }
 0x107   :  { %p2941_p4 = scmp.ne.s32.totalorder %s3920_s18, %s2940_s1  ;;  %p2944_p5 = scmp.lt.u32.totalorder %s2940_s1, %s3920_s18 }
 0x109   :  { %p2946_p6 = pnand %p2944_p5, %p2941_p4 }
 0x10b   :  { %2949 = shalt.err (!%p2946_p6)
}
 0x10c   :  { %s2950_s13 = scalar_lea.vmem %s3512_s30, 1024  ;;  %p2955_p8 = scmp.lt.s32.totalorder %s3512_s30, %s3512_s30 }
 0x10d   :  { %p2951_p7 = scmp.ne.s32.totalorder %s3512_s30, %s2950_s13  ;;  %p2956_p9 = scmp.lt.s32.totalorder %s2950_s13, %s2950_s13 }
 0x10f   :  { %p2957_p10 = por %p2956_p9, %p2955_p8 }
 0x111   :  { %p2958_p11 = pnand %p2957_p10, %p2951_p7 }
 0x113   :  { %2961 = shalt.err (!%p2958_p11)
}
 0x114   :  { %101 = dma.hbm_to_vmem [thread:$0]  %s3920_s18, 1024, %s3512_s30, [#allocation9], %s3188_s5, %s3188_s5, %s3189_s3  }
 0x115   :  { %s3200_s8 = smov [#allocation13]   ;;  %s3201_s29 = smov [#allocation16]  }
 0x116   :  { %s119_s0 = sshll.u32 %s3200_s8, 4  ;;  %s144_s7 = sshll.u32 %s3201_s29, 4  ;;  %s120_s0 = int_to_ptr.vmem [resolvable:$true] %s119_s0  ;;  %s145_s7 = int_to_ptr.vmem [resolvable:$true] %s144_s7 }
 0x117   :  { %s3921_s9 = sld [smem:[#allocation53_spill]] }
 0x11d   :  { %s2962_s12 = scalar_lea.hbm %s3921_s9, 1024 }
 0x11e   :  { %p2963_p12 = scmp.ne.s32.totalorder %s3921_s9, %s2962_s12  ;;  %p2966_p13 = scmp.lt.u32.totalorder %s2962_s12, %s3921_s9 }
 0x120   :  { %p2968_p0 = pnand %p2966_p13, %p2963_p12 }
 0x122   :  { %2971 = shalt.err (!%p2968_p0)
}
 0x123   :  { %s2972_s30 = scalar_lea.vmem %s120_s0, 1024  ;;  %p2977_p2 = scmp.lt.s32.totalorder %s120_s0, %s120_s0 }
 0x124   :  { %p2973_p1 = scmp.ne.s32.totalorder %s120_s0, %s2972_s30  ;;  %p2978_p3 = scmp.lt.s32.totalorder %s2972_s30, %s2972_s30 }
 0x126   :  { %p2979_p4 = por %p2978_p3, %p2977_p2 }
 0x128   :  { %p2980_p5 = pnand %p2979_p4, %p2973_p1 }
 0x12a   :  { %2983 = shalt.err (!%p2980_p5)
}
 0x12b   :  { %125 = dma.hbm_to_vmem [thread:$0]  %s3921_s9, 1024, %s120_s0, [#allocation12], %s3188_s5, %s3188_s5, %s3189_s3  }
 0x12c   :  { %s3922_s10 = sld [smem:[#allocation55_spill]] }
 0x132   :  { %s2984_s28 = scalar_lea.hbm %s3922_s10, 16 }
 0x133   :  { %p2985_p6 = scmp.ne.s32.totalorder %s3922_s10, %s2984_s28  ;;  %p2988_p7 = scmp.lt.u32.totalorder %s2984_s28, %s3922_s10 }
 0x135   :  { %p2990_p8 = pnand %p2988_p7, %p2985_p6 }
 0x137   :  { %2993 = shalt.err (!%p2990_p8)
}
 0x138   :  { %s2994_s12 = scalar_lea.vmem %s145_s7, 16  ;;  %s2998_s27 = scalar_lea.vmem %s145_s7, 32 }
 0x139   :  { %p2995_p9 = scmp.ne.s32.totalorder %s145_s7, %s2994_s12  ;;  %p2999_p10 = scmp.lt.s32.totalorder %s145_s7, %s145_s7 }
 0x13a   :  { %p3000_p11 = scmp.lt.s32.totalorder %s2998_s27, %s2994_s12 }
 0x13c   :  { %p3001_p12 = por %p3000_p11, %p2999_p10 }
 0x13e   :  { %p3002_p13 = pnand %p3001_p12, %p2995_p9 }
 0x140   :  { %3005 = shalt.err (!%p3002_p13)
}
 0x141   :  { %147 = dma.hbm_to_vmem [thread:$0]  %s3922_s10, 16, %s145_s7, [#allocation15]  }
 0x142   :  { %s3202_s1 = smov [#allocation19]   ;;  %s3203_s4 = smov [#allocation22]  }
 0x143   :  { %s164_s11 = sshll.u32 %s3202_s1, 4  ;;  %s184_s30 = sshll.u32 %s3203_s4, 4  ;;  %s165_s11 = int_to_ptr.vmem [resolvable:$true] %s164_s11  ;;  %s185_s30 = int_to_ptr.vmem [resolvable:$true] %s184_s30 }
 0x144   :  { %s3923_s2 = sld [smem:[#allocation57_spill]] }
 0x14a   :  { %s3006_s13 = scalar_lea.hbm %s3923_s2, 16 }
 0x14b   :  { %p3007_p0 = scmp.ne.s32.totalorder %s3923_s2, %s3006_s13  ;;  %p3010_p1 = scmp.lt.u32.totalorder %s3006_s13, %s3923_s2 }
 0x14d   :  { %p3012_p2 = pnand %p3010_p1, %p3007_p0 }
 0x14f   :  { %3015 = shalt.err (!%p3012_p2)
}
 0x150   :  { %s3016_s7 = scalar_lea.vmem %s165_s11, 16  ;;  %s3020_s10 = scalar_lea.vmem %s165_s11, 32 }
 0x151   :  { %p3017_p3 = scmp.ne.s32.totalorder %s165_s11, %s3016_s7  ;;  %p3021_p4 = scmp.lt.s32.totalorder %s165_s11, %s165_s11 }
 0x152   :  { %p3022_p5 = scmp.lt.s32.totalorder %s3020_s10, %s3016_s7 }
 0x154   :  { %p3023_p6 = por %p3022_p5, %p3021_p4 }
 0x156   :  { %p3024_p7 = pnand %p3023_p6, %p3017_p3 }
 0x158   :  { %3027 = shalt.err (!%p3024_p7)
}
 0x159   :  { %167 = dma.hbm_to_vmem [thread:$0]  %s3923_s2, 16, %s165_s11, [#allocation18]  }
 0x15a   :  { %s3924_s9 = sld [smem:[#allocation59_spill]] }
 0x160   :  { %s3028_s1 = scalar_lea.hbm %s3924_s9, 16 }
 0x161   :  { %p3029_p8 = scmp.ne.s32.totalorder %s3924_s9, %s3028_s1  ;;  %p3032_p9 = scmp.lt.u32.totalorder %s3028_s1, %s3924_s9 }
 0x163   :  { %p3034_p10 = pnand %p3032_p9, %p3029_p8 }
 0x165   :  { %3037 = shalt.err (!%p3034_p10)
}
 0x166   :  { %s3038_s28 = scalar_lea.vmem %s185_s30, 16  ;;  %s3042_s8 = scalar_lea.vmem %s185_s30, 32 }
 0x167   :  { %p3039_p11 = scmp.ne.s32.totalorder %s185_s30, %s3038_s28  ;;  %p3043_p12 = scmp.lt.s32.totalorder %s185_s30, %s185_s30 }
 0x168   :  { %p3044_p13 = scmp.lt.s32.totalorder %s3042_s8, %s3038_s28 }
 0x16a   :  { %p3045_p0 = por %p3044_p13, %p3043_p12 }
 0x16c   :  { %p3046_p1 = pnand %p3045_p0, %p3039_p11 }
 0x16e   :  { %3049 = shalt.err (!%p3046_p1)
}
 0x16f   :  { %187 = dma.hbm_to_vmem [thread:$0]  %s3924_s9, 16, %s185_s30, [#allocation21]  }
 0x170   :  { %s3204_s29 = smov [#allocation25]   ;;  %s3205_s7 = smov [#allocation28]  }
 0x171   :  { %s205_s6 = sshll.u32 %s3204_s29, 4  ;;  %s229_s10 = sshll.u32 %s3205_s7, 4  ;;  %s206_s6 = int_to_ptr.vmem [resolvable:$true] %s205_s6  ;;  %s3597_s10 = int_to_ptr.vmem [resolvable:$true] %s229_s10 }
 0x172   :  { %s3050_s27 = scalar_lea.hbm %s3862_s14, 1024 }
 0x173   :  { %p3051_p2 = scmp.ne.s32.totalorder %s3862_s14, %s3050_s27  ;;  %p3054_p3 = scmp.lt.u32.totalorder %s3050_s27, %s3862_s14 }
 0x175   :  { %p3056_p4 = pnand %p3054_p3, %p3051_p2 }
 0x177   :  { %3059 = shalt.err (!%p3056_p4)
}
 0x178   :  { %s3060_s30 = scalar_lea.vmem %s206_s6, 1024  ;;  %p3065_p6 = scmp.lt.s32.totalorder %s206_s6, %s206_s6 }
 0x179   :  { %p3061_p5 = scmp.ne.s32.totalorder %s206_s6, %s3060_s30  ;;  %p3066_p7 = scmp.lt.s32.totalorder %s3060_s30, %s3060_s30 }
 0x17b   :  { %p3067_p8 = por %p3066_p7, %p3065_p6 }
 0x17d   :  { %p3068_p9 = pnand %p3067_p8, %p3061_p5 }
 0x17f   :  { %3071 = shalt.err (!%p3068_p9)
}
 0x180   :  { %211 = dma.hbm_to_vmem [thread:$0]  %s3862_s14, 1024, %s206_s6, [#allocation24], %s3188_s5, %s3188_s5, %s3189_s3  }
 0x181   :  { %s3072_s8 = scalar_lea.hbm %s3864_s16, 2048 }
 0x182   :  { %p3073_p10 = scmp.ne.s32.totalorder %s3864_s16, %s3072_s8  ;;  %p3076_p11 = scmp.lt.u32.totalorder %s3072_s8, %s3864_s16 }
 0x184   :  { %p3078_p12 = pnand %p3076_p11, %p3073_p10 }
 0x186   :  { %3081 = shalt.err (!%p3078_p12)
}
 0x187   :  { %s3082_s26 = scalar_lea.vmem %s3597_s10, 2048  ;;  %p3087_p0 = scmp.lt.s32.totalorder %s3597_s10, %s3597_s10 }
 0x188   :  { %p3083_p13 = scmp.ne.s32.totalorder %s3597_s10, %s3082_s26  ;;  %p3088_p1 = scmp.lt.s32.totalorder %s3082_s26, %s3082_s26 }
 0x18a   :  { %p3089_p2 = por %p3088_p1, %p3087_p0 }
 0x18c   :  { %p3090_p3 = pnand %p3089_p2, %p3083_p13 }
 0x18e   :  { %3093 = shalt.err (!%p3090_p3)
}
 0x18f   :  { %235 = dma.hbm_to_vmem [thread:$0]  %s3864_s16, 2048, %s3597_s10, [#allocation27], %s3188_s5, %s3188_s5, %s3189_s3  }
 0x190   :  { %s3206_s12 = smov [#allocation31]   ;;  %s3094_s4 = scalar_lea.hbm %s3867_s19, 1024 }
 0x191   :  { %s255_s27 = sshll.u32 %s3206_s12, 4  ;;  %p3095_p4 = scmp.ne.s32.totalorder %s3867_s19, %s3094_s4  ;;  %s256_s27 = int_to_ptr.vmem [resolvable:$true] %s255_s27 }
 0x192   :  { %p3098_p5 = scmp.lt.u32.totalorder %s3094_s4, %s3867_s19 }
 0x194   :  { %p3100_p6 = pnand %p3098_p5, %p3095_p4 }
 0x196   :  { %3103 = shalt.err (!%p3100_p6)
}
 0x197   :  { %s3104_s13 = scalar_lea.vmem %s256_s27, 1024  ;;  %p3109_p8 = scmp.lt.s32.totalorder %s256_s27, %s256_s27 }
 0x198   :  { %p3105_p7 = scmp.ne.s32.totalorder %s256_s27, %s3104_s13  ;;  %p3110_p9 = scmp.lt.s32.totalorder %s3104_s13, %s3104_s13 }
 0x19a   :  { %p3111_p10 = por %p3110_p9, %p3109_p8 }
 0x19c   :  { %p3112_p11 = pnand %p3111_p10, %p3105_p7 }
 0x19e   :  { %3115 = shalt.err (!%p3112_p11)
}
 0x19f   :  { %261 = dma.hbm_to_vmem [thread:$0]  %s3867_s19, 1024, %s256_s27, [#allocation30], %s3188_s5, %s3188_s5, %s3189_s3  }
 0x1a0   :  { %3160 = dma.done.wait [#allocation3], 64  }
 0x1a1   :  { %3161 = vsyncadd [#allocation3], 4294967232 }
 0x1a2   :  { %3162 = dma.done.wait [#allocation6], 2080  }
 0x1a3   :  { %3163 = vsyncadd [#allocation6], 4294965216 }
 0x1a4   :  { %3164 = dma.done.wait [#allocation9], 2048  }
 0x1a5   :  { %3165 = vsyncadd [#allocation9], 4294965248 }
 0x1a6   :  { %3166 = dma.done.wait [#allocation12], 2048  }
 0x1a7   :  { %3167 = vsyncadd [#allocation12], 4294965248 }
 0x1a8   :  { %3168 = dma.done.wait [#allocation15], 1040  }
 0x1a9   :  { %3169 = vsyncadd [#allocation15], 4294966256 }
 0x1aa   :  { %3170 = dma.done.wait [#allocation18], 32  }
 0x1ab   :  { %3171 = vsyncadd [#allocation18], 4294967264 }
 0x1ac   :  { %3172 = dma.done.wait [#allocation21], 32  }
 0x1ad   :  { %3173 = vsyncadd [#allocation21], 4294967264 }
 0x1ae   :  { %3174 = dma.done.wait [#allocation24], 2048  }
 0x1af   :  { %3175 = vsyncadd [#allocation24], 4294965248 }
 0x1b0   :  { %3176 = dma.done.wait [#allocation27], 4096  }
 0x1b1   :  { %3177 = vsyncadd [#allocation27], 4294963200 }
 0x1b2   :  { %3178 = dma.done.wait [#allocation30], 2048  }
 0x1b3   :  { %3179 = vsyncadd [#allocation30], 4294965248  ;;  %v3207_v0 = vmov 0   ;;  %v3208_v1 = vmov 0.0   ;;  %v2554_v2 = vld [vmem:[#allocation5 + $0x4] ss:$8 sps:$4 sm:$0xff]   ;;  %v353_v33 = vlaneseq }
 0x1b4   :  { %475 = vmatprep.mubr.bf16.mxu0 %v3207_v0  ;;  %2321 = vmatprep.subr.bf16.mxu1 %v3208_v1  ;;  %v2556_v3 = vld [vmem:[#allocation5] ss:$8 sps:$4 sm:$0xff]   ;;  %v2557_v4 = vld [vmem:[#allocation5 + $0x14] ss:$8 sps:$4 sm:$0xff]   ;;  %v2559_v5 = vld [vmem:[#allocation5 + $0x10] ss:$8 sps:$4 sm:$0xff]  }
 0x1b5   :  { %443 = vmatprep.subr.bf16.mxu0 %v2554_v2  ;;  %v2560_v6 = vld [vmem:[#allocation5 + $0x24] ss:$8 sps:$4 sm:$0xff]   ;;  %v2562_v7 = vld [vmem:[#allocation5 + $0x20] ss:$8 sps:$4 sm:$0xff]   ;;  %v2563_v8 = vld [vmem:[#allocation5 + $0x34] ss:$8 sps:$4 sm:$0xff]  }
 0x1b6   :  { %444 = vmatpush1.bf16.msra.mxu0 %v2556_v3  ;;  %v2565_v9 = vld [vmem:[#allocation5 + $0x30] ss:$8 sps:$4 sm:$0xff]   ;;  %v2578_v10 = vld [vmem:[#allocation8] sm:$0xff]   ;;  %v2569_v14 = vld [vmem:[#allocation5 + $0x54] ss:$8 sps:$4 sm:$0xff]   ;;  %vm3209_vm0 = vmmov 0  }
 0x1b7   :  { %445 = vmatprep.subr.bf16.mxu0 %v2557_v4  ;;  %v2566_v11 = vld [vmem:[#allocation5 + $0x44] ss:$8 sps:$4 sm:$0xff]   ;;  %2322 = vmatpush3.bf16.msra.mxu1 %v2578_v10  ;;  %v2568_v13 = vld [vmem:[#allocation5 + $0x40] ss:$8 sps:$4 sm:$0xff]   ;;  %v2571_v15 = vld [vmem:[#allocation5 + $0x50] ss:$8 sps:$4 sm:$0xff]  }
 0x1b8   :  { %v2579_v12 = vld [vmem:[#allocation8 + $0x8] sm:$0xff]   ;;  %2323 = vmatprep.subr.bf16.mxu1 %v3208_v1  ;;  %v2580_v16 = vld [vmem:[#allocation8 + $0x10] sm:$0xff]   ;;  %v2581_v18 = vld [vmem:[#allocation8 + $0x18] sm:$0xff]   ;;  %2337 = vmatprep.mubr.msk.bf16.mxu1 %vm3209_vm0, %v3208_v1  ;;  %v3671_v34 = vshrl.u32 %v353_v33, 7  ;;  %vm1952_vm2 = vcmask 64512   ;;  %s3210_s16 = smov [#allocation32]  }
 0x1b9   :  { %v2572_v17 = vld [vmem:[#allocation5 + $0x64] ss:$8 sps:$4 sm:$0xff]   ;;  %v2574_v19 = vld [vmem:[#allocation5 + $0x60] ss:$8 sps:$4 sm:$0xff]   ;;  %v2575_v20 = vld [vmem:[#allocation5 + $0x74] ss:$8 sps:$4 sm:$0xff]  }
 0x1ba   :  { %446 = vmatpush1.bf16.msra.mxu0 %v2559_v5  ;;  %v2582_v21 = vld [vmem:[#allocation8 + $0x20] sm:$0xff]   ;;  %v2577_v22 = vld [vmem:[#allocation5 + $0x70] ss:$8 sps:$4 sm:$0xff]   ;;  %v334_v24 = vld [vmem:[#allocation2] sm:$0xf]  ;;  %v355_v35 = vsub.s32 0, %v3671_v34 }
 0x1bb   :  { %447 = vmatprep.subr.bf16.mxu0 %v2560_v6  ;;  %2324 = vmatpush3.bf16.msra.mxu1 %v2579_v12  ;;  %v2583_v23 = vld [vmem:[#allocation8 + $0x28] sm:$0xff]   ;;  %v2584_v25 = vld [vmem:[#allocation8 + $0x30] sm:$0xff]   ;;  %v2585_v26 = vld [vmem:[#allocation8 + $0x38] sm:$0xff]   ;;  %s2034_s10 = sshll.u32 %s3210_s16, 4  ;;  %s2035_s10 = int_to_ptr.vmem [resolvable:$true] %s2034_s10 }
 0x1bc   :  { %2325 = vmatprep.subr.bf16.mxu1 %v3208_v1  ;;  %v2586_v27 = vld [vmem:[#allocation10] sm:$0xff]   ;;  %v2587_v28 = vld [vmem:[#allocation10 + $0x8] sm:$0xff]   ;;  %v2588_v29 = vld [vmem:[#allocation10 + $0x10] sm:$0xff]   ;;  %s3116_s19 = scalar_lea.vmem %s2035_s10, 16  ;;  %s3120_s5 = scalar_lea.vmem %s2035_s10, 32 }
 0x1bd   :  { %v2589_v30 = vld [vmem:[#allocation10 + $0x18] sm:$0xff]   ;;  %v2590_v31 = vld [vmem:[#allocation10 + $0x20] sm:$0xff]   ;;  %v2591_v32 = vld [vmem:[#allocation10 + $0x28] sm:$0xff]   ;;  %p3117_p12 = scmp.ne.s32.totalorder %s2035_s10, %s3116_s19  ;;  %p3121_p13 = scmp.lt.s32.totalorder %s2035_s10, %s2035_s10 }
 0x1be   :  { %448 = vmatpush1.bf16.msra.mxu0 %v2562_v7  ;;  %v3674_v36 = vld [vmem:[#allocation7] sm:$0x3]  ;;  %v2592_v45 = vld [vmem:[#allocation10 + $0x30] sm:$0xff]   ;;  %v2594_v47 = vld [vmem:[#allocation11] sm:$0xff]   ;;  %p3122_p0 = scmp.lt.s32.totalorder %s3120_s5, %s3116_s19 }
 0x1bf   :  { %449 = vmatprep.subr.bf16.mxu0 %v2563_v8  ;;  %2326 = vmatpush3.bf16.msra.mxu1 %v2580_v16  ;;  %v356_v37 = vrot.slane %v3674_v36, %v355_v35  ;;  %v2593_v46 = vld [vmem:[#allocation10 + $0x38] sm:$0xff]   ;;  %v2595_v48 = vld [vmem:[#allocation11 + $0x8] sm:$0xff]   ;;  %v2596_v49 = vld [vmem:[#allocation11 + $0x10] sm:$0xff]  }
 0x1c0   :  { %2327 = vmatprep.subr.bf16.mxu1 %v3208_v1  ;;  %v2597_v50 = vld [vmem:[#allocation11 + $0x18] sm:$0xff]   ;;  %v2598_v51 = vld [vmem:[#allocation11 + $0x20] sm:$0xff]   ;;  %v2599_v52 = vld [vmem:[#allocation11 + $0x28] sm:$0xff]   ;;  %p3123_p1 = por %p3122_p0, %p3121_p13 }
 0x1c1   :  { %v2082_v53 = vld [vmem:[#allocation16] ss:$0 sm:$0xff]  ;;  %v2600_v61 = vld [vmem:[#allocation11 + $0x30] sm:$0xff]   ;;  %v2601_v62 = vld [vmem:[#allocation11 + $0x38] sm:$0xff]  }
 0x1c2   :  { %450 = vmatpush1.bf16.msra.mxu0 %v2565_v9  ;;  %v2602_v63 = vld [vmem:[#allocation13] sm:$0xff]   ;;  %v2603_v2 = vld [vmem:[#allocation13 + $0x8] sm:$0xff]   ;;  %v2604_v3 = vld [vmem:[#allocation13 + $0x10] sm:$0xff]   ;;  %p3124_p2 = pnand %p3123_p1, %p3117_p12 }
 0x1c3   :  { %451 = vmatprep.subr.bf16.mxu0 %v2566_v11  ;;  %2328 = vmatpush3.bf16.msra.mxu1 %v2581_v18  ;;  %v2605_v4 = vld [vmem:[#allocation13 + $0x18] sm:$0xff]   ;;  %v2606_v5 = vld [vmem:[#allocation13 + $0x20] sm:$0xff]   ;;  %v2607_v6 = vld [vmem:[#allocation13 + $0x28] sm:$0xff]  }
 0x1c4   :  { %2329 = vmatprep.subr.bf16.mxu1 %v3208_v1  ;;  %v2608_v7 = vld [vmem:[#allocation13 + $0x30] sm:$0xff]   ;;  %v2091_v8 = vld [vmem:[#allocation17] ss:$0 sm:$0xff]  ;;  %v2609_v16 = vld [vmem:[#allocation13 + $0x38] sm:$0xff]  }
 0x1c5   :  { %v2619_v18 = vld [vmem:[#allocation14 + $0x8] sm:$0xff]  }
 0x1c6   :  { %452 = vmatpush1.bf16.msra.mxu0 %v2568_v13 }
 0x1c7   :  { %453 = vmatprep.subr.bf16.mxu0 %v2569_v14  ;;  %2330 = vmatpush3.bf16.msra.mxu1 %v2582_v21  ;;  %v2622_v21 = vld [vmem:[#allocation14 + $0x20] sm:$0xff]  }
 0x1c8   :  { %2331 = vmatprep.subr.bf16.mxu1 %v3208_v1 }
 0x1ca   :  { %454 = vmatpush1.bf16.msra.mxu0 %v2571_v15 }
 0x1cb   :  { %455 = vmatprep.subr.bf16.mxu0 %v2572_v17  ;;  %2332 = vmatpush3.bf16.msra.mxu1 %v2583_v23  ;;  %v2618_v17 = vld [vmem:[#allocation14] sm:$0xff]   ;;  %v2624_v23 = vld [vmem:[#allocation14 + $0x30] sm:$0xff]  }
 0x1cc   :  { %2333 = vmatprep.subr.bf16.mxu1 %v3208_v1 }
 0x1ce   :  { %456 = vmatpush1.bf16.msra.mxu0 %v2574_v19  ;;  %v2620_v19 = vld [vmem:[#allocation14 + $0x10] sm:$0xff]  }
 0x1cf   :  { %457 = vmatprep.subr.bf16.mxu0 %v2575_v20  ;;  %2334 = vmatpush3.bf16.msra.mxu1 %v2584_v25  ;;  %v2621_v20 = vld [vmem:[#allocation14 + $0x18] sm:$0xff]  }
 0x1d0   :  { %2335 = vmatprep.subr.bf16.mxu1 %v3208_v1 }
 0x1d2   :  { %458 = vmatpush1.bf16.msra.mxu0 %v2577_v22  ;;  %v2623_v22 = vld [vmem:[#allocation14 + $0x28] sm:$0xff]  }
 0x1d3   :  { %2341 = vmatprep.subr.bf16.mxu0 %v3208_v1  ;;  %2336 = vmatpush3.bf16.msra.mxu1 %v2585_v26 }
 0x1d4   :  { %2361 = vmatprep.subr.bf16.mxu1 %v3208_v1 }
 0x1d5   :  { %476 = vmatmul.mubr.bf16.vlgmr.msra.gmra.mrb[0].mxu0 %v334_v24  ;;  %v2100_v24 = vld [vmem:[#allocation19] ss:$0 sm:$0xff] }
 0x1d6   :  { %2357 = vmatprep.mubr.msk.bf16.mxu0 %vm3209_vm0, %v3208_v1  ;;  %2342 = vmatpush3.bf16.msra.mxu0 %v2586_v27 }
 0x1d7   :  { %2343 = vmatprep.subr.bf16.mxu0 %v3208_v1 }
 0x1da   :  { %2344 = vmatpush3.bf16.msra.mxu0 %v2587_v28 }
 0x1db   :  { %2345 = vmatprep.subr.bf16.mxu0 %v3208_v1 }
 0x1de   :  { %2346 = vmatpush3.bf16.msra.mxu0 %v2588_v29 }
 0x1df   :  { %2347 = vmatprep.subr.bf16.mxu0 %v3208_v1 }
 0x1e2   :  { %2348 = vmatpush3.bf16.msra.mxu0 %v2589_v30 }
 0x1e3   :  { %2349 = vmatprep.subr.bf16.mxu0 %v3208_v1 }
 0x1e6   :  { %2350 = vmatpush3.bf16.msra.mxu0 %v2590_v31  ;;  %v2610_v31 = vld [vmem:[#allocation23] sm:$0xff]  }
 0x1e7   :  { %2351 = vmatprep.subr.bf16.mxu0 %v3208_v1 }
 0x1ea   :  { %2352 = vmatpush3.bf16.msra.mxu0 %v2591_v32 }
 0x1eb   :  { %2353 = vmatprep.subr.bf16.mxu0 %v3208_v1 }
 0x1ee   :  { %2354 = vmatpush3.bf16.msra.mxu0 %v2592_v45  ;;  %v2616_v45 = vld [vmem:[#allocation23 + $0x30] sm:$0xff]  }
 0x1ef   :  { %2355 = vmatprep.subr.bf16.mxu0 %v3208_v1 }
 0x1f2   :  { %2356 = vmatpush3.bf16.msra.mxu0 %v2593_v46 }
 0x1f3   :  { %2381 = vmatprep.subr.bf16.mxu0 %v3208_v1 }
 0x2a8   :  { %v477_v38 = vpop.f32.mrb[0].mxu0 }
 0x2a9   :  { %v478_v39 = vadd.f32 %v477_v38, %v356_v37  ;;  %v3679_v40 = vpop.f32.mrb[1].mxu0  ;;  %v2611_v37 = vld [vmem:[#allocation23 + $0x8] sm:$0xff]   ;;  %v2612_v38 = vld [vmem:[#allocation23 + $0x10] sm:$0xff]  }
 0x2aa   :  { %v481_v41 = vpop.f32.mrb[2].mxu0 }
 0x2ab   :  { %v484_v42 = vmax.f32 %v478_v39, 0.0  ;;  %v482_v43 = vpop.f32.mrb[3].mxu0  ;;  %v2613_v39 = vld [vmem:[#allocation23 + $0x18] sm:$0xff]   ;;  %v2614_v41 = vld [vmem:[#allocation23 + $0x20] sm:$0xff]  }
 0x2ac   :  { %v2615_v43 = vld [vmem:[#allocation23 + $0x28] sm:$0xff]  }
 0x2ad   :  { %v486_v44 = vpack.c.bf16 %v484_v42, %v484_v42  ;;  %v359_v42 = vsub.s32 1, %v3671_v34  ;;  %v2680_v34 = vld [vmem:[%s3865_s17 + $0x30] sm:$0xff]  }
 0x2af   :  { %2338 = vmatmul.mubr.bf16.vlgmr.msra.gmra.mrb[0].mxu1 %v486_v44  ;;  %v360_v44 = vrot.slane %v3674_v36, %v359_v42  ;;  %v2109_v36 = vld [vmem:[#allocation20] ss:$0 sm:$0xff] }
 0x2b0   :  { %2377 = vmatprep.mubr.msk.bf16.mxu1 %vm3209_vm0, %v3208_v1  ;;  %2362 = vmatpush3.bf16.msra.mxu1 %v2594_v47  ;;  %v2617_v47 = vld [vmem:[#allocation23 + $0x38] sm:$0xff]  }
 0x2b1   :  { %2363 = vmatprep.subr.bf16.mxu1 %v3208_v1  ;;  %v480_v46 = vadd.f32 %v3679_v40, %v360_v44 }
 0x2b4   :  { %2364 = vmatpush3.bf16.msra.mxu1 %v2595_v48  ;;  %v485_v48 = vmax.f32 %v480_v46, 0.0 }
 0x2b5   :  { %2365 = vmatprep.subr.bf16.mxu1 %v3208_v1 }
 0x2b8   :  { %2366 = vmatpush3.bf16.msra.mxu1 %v2596_v49  ;;  %v487_v49 = vpack.c.bf16 %v485_v48, %v485_v48  ;;  %v2136_v48 = vld [vmem:[%s3869_s21] ss:$0 sm:$0xff] }
 0x2b9   :  { %2367 = vmatprep.subr.bf16.mxu1 %v3208_v1 }
 0x2bc   :  { %2368 = vmatpush3.bf16.msra.mxu1 %v2597_v50  ;;  %v2625_v50 = vld [vmem:[#allocation14 + $0x38] sm:$0xff]  }
 0x2bd   :  { %2369 = vmatprep.subr.bf16.mxu1 %v3208_v1 }
 0x2c0   :  { %2370 = vmatpush3.bf16.msra.mxu1 %v2598_v51 }
 0x2c1   :  { %2371 = vmatprep.subr.bf16.mxu1 %v3208_v1 }
 0x2c4   :  { %2372 = vmatpush3.bf16.msra.mxu1 %v2599_v52 }
 0x2c5   :  { %2373 = vmatprep.subr.bf16.mxu1 %v3208_v1 }
 0x2c8   :  { %2374 = vmatpush3.bf16.msra.mxu1 %v2600_v61  ;;  %v2631_v61 = vld [vmem:[#allocation25 + $0x28] sm:$0xff]  }
 0x2c9   :  { %2375 = vmatprep.subr.bf16.mxu1 %v3208_v1 }
 0x2cc   :  { %2376 = vmatpush3.bf16.msra.mxu1 %v2601_v62  ;;  %v2632_v62 = vld [vmem:[#allocation25 + $0x30] sm:$0xff]  }
 0x2cd   :  { %2401 = vmatprep.subr.bf16.mxu1 %v3208_v1 }
 0x382   :  { %v593_v54 = vpop.f32.mrb[0].mxu1 }
 0x383   :  { %v594_v55 = vadd.f32 %v2082_v53, %v593_v54  ;;  %v2339_v56 = vpop.f32.mrb[1].mxu1 }
 0x384   :  { %v596_v57 = vpop.f32.mrb[2].mxu1  ;;  %v2626_v56 = vld [vmem:[#allocation25] sm:$0xff]  }
 0x385   :  { %v599_v58 = vmax.f32 %v594_v55, 0.0  ;;  %v2340_v59 = vpop.f32.mrb[3].mxu1 }
 0x386   :  { %v2629_v59 = vld [vmem:[#allocation25 + $0x18] sm:$0xff]  }
 0x387   :  { %v600_v60 = vpack.c.bf16 %v599_v58, %v599_v58  ;;  %v2627_v58 = vld [vmem:[#allocation25 + $0x8] sm:$0xff]  }
 0x389   :  { %2358 = vmatmul.mubr.bf16.vlgmr.msra.gmra.mrb[4].mxu0 %v600_v60  ;;  %v2630_v60 = vld [vmem:[#allocation25 + $0x20] sm:$0xff]  }
 0x38a   :  { %2397 = vmatprep.mubr.msk.bf16.mxu0 %vm3209_vm0, %v3208_v1  ;;  %2382 = vmatpush3.bf16.msra.mxu0 %v2602_v63  ;;  %v2127_v63 = vld [vmem:[%s3868_s20] ss:$0 sm:$0xff] }
 0x38b   :  { %2383 = vmatprep.subr.bf16.mxu0 %v3208_v1 }
 0x38e   :  { %2384 = vmatpush3.bf16.msra.mxu0 %v2603_v2 }
 0x38f   :  { %2385 = vmatprep.subr.bf16.mxu0 %v3208_v1 }
 0x392   :  { %2386 = vmatpush3.bf16.msra.mxu0 %v2604_v3  ;;  %v2633_v3 = vld [vmem:[#allocation25 + $0x38] sm:$0xff]  }
 0x393   :  { %2387 = vmatprep.subr.bf16.mxu0 %v3208_v1 }
 0x396   :  { %2388 = vmatpush3.bf16.msra.mxu0 %v2605_v4 }
 0x397   :  { %2389 = vmatprep.subr.bf16.mxu0 %v3208_v1 }
 0x39a   :  { %2390 = vmatpush3.bf16.msra.mxu0 %v2606_v5 }
 0x39b   :  { %2391 = vmatprep.subr.bf16.mxu0 %v3208_v1 }
 0x39e   :  { %2392 = vmatpush3.bf16.msra.mxu0 %v2607_v6 }
 0x39f   :  { %2393 = vmatprep.subr.bf16.mxu0 %v3208_v1 }
 0x3a2   :  { %2394 = vmatpush3.bf16.msra.mxu0 %v2608_v7 }
 0x3a3   :  { %2395 = vmatprep.subr.bf16.mxu0 %v3208_v1 }
 0x3a6   :  { %2396 = vmatpush3.bf16.msra.mxu0 %v2609_v16  ;;  %v2645_v16 = vld [vmem:[#allocation26 + $0x34] ss:$8 sps:$4 sm:$0xff]  }
 0x3a7   :  { %2421 = vmatprep.subr.bf16.mxu0 %v3208_v1 }
 0x45c   :  { %v706_v9 = vpop.f32.mrb[4].mxu0 }
 0x45d   :  { %v707_v10 = vadd.f32 %v2091_v8, %v706_v9  ;;  %v2359_v11 = vpop.f32.mrb[5].mxu0 }
 0x45e   :  { %v709_v12 = vpop.f32.mrb[6].mxu0  ;;  %v2636_v11 = vld [vmem:[#allocation26 + $0x4] ss:$8 sps:$4 sm:$0xff]  }
 0x45f   :  { %v712_v13 = vmax.f32 %v707_v10, 0.0  ;;  %v2360_v14 = vpop.f32.mrb[7].mxu0  ;;  %v2634_v10 = vld [vmem:[#allocation26] ss:$8 sps:$4 sm:$0xff]   ;;  %v2639_v12 = vld [vmem:[#allocation26 + $0x14] ss:$8 sps:$4 sm:$0xff]  }
 0x460   :  { %v2642_v14 = vld [vmem:[#allocation26 + $0x24] ss:$8 sps:$4 sm:$0xff]  }
 0x461   :  { %v713_v15 = vpack.c.bf16 %v712_v13, %v712_v13  ;;  %v2637_v13 = vld [vmem:[#allocation26 + $0x10] ss:$8 sps:$4 sm:$0xff]  }
 0x463   :  { %2378 = vmatmul.mubr.bf16.vlgmr.msra.gmra.mrb[4].mxu1 %v713_v15  ;;  %v2640_v15 = vld [vmem:[#allocation26 + $0x20] ss:$8 sps:$4 sm:$0xff]  }
 0x464   :  { %2417 = vmatprep.mubr.msk.bf16.mxu1 %vm3209_vm0, %v3208_v1  ;;  %2402 = vmatpush3.bf16.msra.mxu1 %v2618_v17  ;;  %v2643_v17 = vld [vmem:[#allocation26 + $0x30] ss:$8 sps:$4 sm:$0xff]  }
 0x465   :  { %2403 = vmatprep.subr.bf16.mxu1 %v3208_v1 }
 0x468   :  { %2404 = vmatpush3.bf16.msra.mxu1 %v2619_v18  ;;  %v2648_v18 = vld [vmem:[#allocation26 + $0x44] ss:$8 sps:$4 sm:$0xff]  }
 0x469   :  { %2405 = vmatprep.subr.bf16.mxu1 %v3208_v1 }
 0x46c   :  { %2406 = vmatpush3.bf16.msra.mxu1 %v2620_v19  ;;  %v2646_v19 = vld [vmem:[#allocation26 + $0x40] ss:$8 sps:$4 sm:$0xff]  }
 0x46d   :  { %2407 = vmatprep.subr.bf16.mxu1 %v3208_v1 }
 0x470   :  { %2408 = vmatpush3.bf16.msra.mxu1 %v2621_v20  ;;  %v2651_v20 = vld [vmem:[#allocation26 + $0x54] ss:$8 sps:$4 sm:$0xff]  }
 0x471   :  { %2409 = vmatprep.subr.bf16.mxu1 %v3208_v1 }
 0x474   :  { %2410 = vmatpush3.bf16.msra.mxu1 %v2622_v21  ;;  %v2649_v21 = vld [vmem:[#allocation26 + $0x50] ss:$8 sps:$4 sm:$0xff]  }
 0x475   :  { %2411 = vmatprep.subr.bf16.mxu1 %v3208_v1 }
 0x478   :  { %2412 = vmatpush3.bf16.msra.mxu1 %v2623_v22  ;;  %v2654_v22 = vld [vmem:[#allocation26 + $0x64] ss:$8 sps:$4 sm:$0xff]  }
 0x479   :  { %2413 = vmatprep.subr.bf16.mxu1 %v3208_v1 }
 0x47c   :  { %2414 = vmatpush3.bf16.msra.mxu1 %v2624_v23  ;;  %v2652_v23 = vld [vmem:[#allocation26 + $0x60] ss:$8 sps:$4 sm:$0xff]  }
 0x47d   :  { %2415 = vmatprep.subr.bf16.mxu1 %v3208_v1 }
 0x480   :  { %2416 = vmatpush3.bf16.msra.mxu1 %v2625_v50 }
 0x481   :  { %2441 = vmatprep.subr.bf16.mxu1 %v3208_v1 }
 0x536   :  { %v819_v25 = vpop.f32.mrb[4].mxu1 }
 0x537   :  { %v820_v26 = vadd.f32 %v2100_v24, %v819_v25  ;;  %v2379_v27 = vpop.f32.mrb[5].mxu1  ;;  %v2657_v24 = vld [vmem:[#allocation26 + $0x74] ss:$8 sps:$4 sm:$0xff]   ;;  %v2655_v25 = vld [vmem:[#allocation26 + $0x70] ss:$8 sps:$4 sm:$0xff]  }
 0x538   :  { %v822_v28 = vpop.f32.mrb[6].mxu1  ;;  %v2659_v27 = vld [vmem:[#allocation28] sm:$0xff]  }
 0x539   :  { %v825_v29 = vmax.f32 %v820_v26, 0.0  ;;  %v2380_v30 = vpop.f32.mrb[7].mxu1  ;;  %v2658_v26 = vld [vmem:[#allocation28 + $0x40] sm:$0xff]   ;;  %v2660_v28 = vld [vmem:[#allocation28 + $0x48] sm:$0xff]  }
 0x53a   :  { %v2662_v30 = vld [vmem:[#allocation28 + $0x50] sm:$0xff]  }
 0x53b   :  { %v826_v32 = vpack.c.bf16 %v825_v29, %v825_v29  ;;  %v2661_v29 = vld [vmem:[#allocation28 + $0x8] sm:$0xff]  }
 0x53d   :  { %2398 = vmatmul.mubr.bf16.vlgmr.msra.gmra.mrb[8].mxu0 %v826_v32  ;;  %v2664_v32 = vld [vmem:[#allocation28 + $0x58] sm:$0xff]  }
 0x53e   :  { %2422 = vmatpush3.bf16.msra.mxu0 %v2610_v31  ;;  %2437 = vmatprep.mubr.msk.bf16.mxu0 %vm3209_vm0, %v3208_v1  ;;  %v2663_v31 = vld [vmem:[#allocation28 + $0x10] sm:$0xff]  }
 0x53f   :  { %2423 = vmatprep.subr.bf16.mxu0 %v3208_v1 }
 0x542   :  { %2424 = vmatpush3.bf16.msra.mxu0 %v2611_v37  ;;  %v2665_v37 = vld [vmem:[#allocation28 + $0x18] sm:$0xff]  }
 0x543   :  { %2425 = vmatprep.subr.bf16.mxu0 %v3208_v1 }
 0x546   :  { %2426 = vmatpush3.bf16.msra.mxu0 %v2612_v38  ;;  %v2666_v38 = vld [vmem:[#allocation28 + $0x60] sm:$0xff]  }
 0x547   :  { %2427 = vmatprep.subr.bf16.mxu0 %v3208_v1 }
 0x54a   :  { %2428 = vmatpush3.bf16.msra.mxu0 %v2613_v39  ;;  %v2667_v39 = vld [vmem:[#allocation28 + $0x20] sm:$0xff]  }
 0x54b   :  { %2429 = vmatprep.subr.bf16.mxu0 %v3208_v1 }
 0x54e   :  { %2430 = vmatpush3.bf16.msra.mxu0 %v2614_v41  ;;  %v2668_v41 = vld [vmem:[#allocation28 + $0x68] sm:$0xff]  }
 0x54f   :  { %2431 = vmatprep.subr.bf16.mxu0 %v3208_v1 }
 0x552   :  { %2432 = vmatpush3.bf16.msra.mxu0 %v2615_v43  ;;  %v2669_v43 = vld [vmem:[#allocation28 + $0x28] sm:$0xff]  }
 0x553   :  { %2433 = vmatprep.subr.bf16.mxu0 %v3208_v1 }
 0x556   :  { %2434 = vmatpush3.bf16.msra.mxu0 %v2616_v45 }
 0x557   :  { %2435 = vmatprep.subr.bf16.mxu0 %v3208_v1 }
 0x55a   :  { %2436 = vmatpush3.bf16.msra.mxu0 %v2617_v47 }
 0x55b   :  { %1385 = vmatprep.subr.bf16.mxu0 %v2636_v11 }
 0x55d   :  { %2438 = vmatmul.mubr.bf16.vlgmr.msra.gmra.mrb[12].mxu0 %v487_v49 }
 0x55e   :  { %1417 = vmatprep.mubr.bf16.mxu0 %v3207_v0  ;;  %v2628_v0 = vld [vmem:[#allocation25 + $0x10] sm:$0xff]   ;;  %1386 = vmatpush1.bf16.msra.mxu0 %v2634_v10 }
 0x55f   :  { %1387 = vmatprep.subr.bf16.mxu0 %v2639_v12 }
 0x562   :  { %1388 = vmatpush1.bf16.msra.mxu0 %v2637_v13 }
 0x563   :  { %1389 = vmatprep.subr.bf16.mxu0 %v2642_v14  ;;  %v2683_v14 = vld [vmem:[#allocation29 + $0x8] sm:$0xff]  }
 0x566   :  { %1390 = vmatpush1.bf16.msra.mxu0 %v2640_v15  ;;  %v2684_v15 = vld [vmem:[#allocation29 + $0x10] sm:$0xff]  }
 0x567   :  { %1391 = vmatprep.subr.bf16.mxu0 %v2645_v16  ;;  %v2685_v16 = vld [vmem:[#allocation29 + $0x18] sm:$0xff]  }
 0x56a   :  { %1392 = vmatpush1.bf16.msra.mxu0 %v2643_v17  ;;  %v2686_v17 = vld [vmem:[#allocation29 + $0x20] sm:$0xff]  }
 0x56b   :  { %1393 = vmatprep.subr.bf16.mxu0 %v2648_v18  ;;  %v2687_v18 = vld [vmem:[#allocation29 + $0x28] sm:$0xff]  }
 0x56e   :  { %1394 = vmatpush1.bf16.msra.mxu0 %v2646_v19  ;;  %v2688_v19 = vld [vmem:[#allocation29 + $0x30] sm:$0xff]  }
 0x56f   :  { %1395 = vmatprep.subr.bf16.mxu0 %v2651_v20 }
 0x572   :  { %1396 = vmatpush1.bf16.msra.mxu0 %v2649_v21  ;;  %v2161_v21 = vld [vmem:[%s3871_s23] ss:$0 sm:$0xff] }
 0x573   :  { %1397 = vmatprep.subr.bf16.mxu0 %v2654_v22 }
 0x576   :  { %1398 = vmatpush1.bf16.msra.mxu0 %v2652_v23 }
 0x577   :  { %1399 = vmatprep.subr.bf16.mxu0 %v2657_v24 }
 0x57a   :  { %1400 = vmatpush1.bf16.msra.mxu0 %v2655_v25 }
 0x57b   :  { %2461 = vmatprep.subr.bf16.mxu0 %v3208_v1 }
 0x610   :  { %v932_v51 = vpop.f32.mrb[8].mxu0 }
 0x611   :  { %v933_v52 = vadd.f32 %v2109_v36, %v932_v51  ;;  %v2399_v40 = vpop.f32.mrb[9].mxu0 }
 0x612   :  { %v935_v53 = vpop.f32.mrb[10].mxu0 }
 0x613   :  { %v938_v54 = vmax.f32 %v933_v52, 0.0  ;;  %v2400_v55 = vpop.f32.mrb[11].mxu0 }
 0x614   :  { %v2671_v55 = vld [vmem:[#allocation28 + $0x30] sm:$0xff]  }
 0x615   :  { %v939_v57 = vpack.c.bf16 %v938_v54, %v938_v54  ;;  %v2670_v54 = vld [vmem:[#allocation28 + $0x70] sm:$0xff]  }
 0x617   :  { %2418 = vmatmul.mubr.bf16.vlgmr.msra.gmra.mrb[8].mxu1 %v939_v57  ;;  %v2673_v57 = vld [vmem:[#allocation28 + $0x38] sm:$0xff]  }
 0x618   :  { %2442 = vmatpush3.bf16.msra.mxu1 %v2626_v56  ;;  %2457 = vmatprep.mubr.msk.bf16.mxu1 %vm3209_vm0, %v3208_v1  ;;  %v2672_v56 = vld [vmem:[#allocation28 + $0x78] sm:$0xff]  }
 0x619   :  { %2443 = vmatprep.subr.bf16.mxu1 %v3208_v1 }
 0x61c   :  { %2444 = vmatpush3.bf16.msra.mxu1 %v2627_v58  ;;  %v2674_v58 = vld [vmem:[%s3865_s17] sm:$0xff]  }
 0x61d   :  { %2445 = vmatprep.subr.bf16.mxu1 %v3208_v1 }
 0x620   :  { %2446 = vmatpush3.bf16.msra.mxu1 %v2628_v0  ;;  %v2675_v0 = vld [vmem:[%s3865_s17 + $0x8] sm:$0xff]  }
 0x621   :  { %2447 = vmatprep.subr.bf16.mxu1 %v3208_v1 }
 0x624   :  { %2448 = vmatpush3.bf16.msra.mxu1 %v2629_v59  ;;  %v2676_v59 = vld [vmem:[%s3865_s17 + $0x10] sm:$0xff]  }
 0x625   :  { %2449 = vmatprep.subr.bf16.mxu1 %v3208_v1 }
 0x628   :  { %2450 = vmatpush3.bf16.msra.mxu1 %v2630_v60  ;;  %v2677_v60 = vld [vmem:[%s3865_s17 + $0x18] sm:$0xff]  }
 0x629   :  { %2451 = vmatprep.subr.bf16.mxu1 %v3208_v1 }
 0x62c   :  { %2452 = vmatpush3.bf16.msra.mxu1 %v2631_v61  ;;  %v2678_v61 = vld [vmem:[%s3865_s17 + $0x20] sm:$0xff]  }
 0x62d   :  { %2453 = vmatprep.subr.bf16.mxu1 %v3208_v1 }
 0x630   :  { %v1156_v2 = vpop.f32.mrb[12].mxu0  ;;  %2454 = vmatpush3.bf16.msra.mxu1 %v2632_v62  ;;  %v2679_v62 = vld [vmem:[%s3865_s17 + $0x28] sm:$0xff]  }
 0x631   :  { %v1157_v4 = vadd.f32 %v2127_v63, %v1156_v2  ;;  %v2439_v5 = vpop.f32.mrb[13].mxu0  ;;  %2455 = vmatprep.subr.bf16.mxu1 %v3208_v1  ;;  %v1293_v63 = vld [vmem:[%s3870_s22] sm:$0x3] }
 0x632   :  { %v1159_v6 = vpop.f32.mrb[14].mxu0  ;;  %v1298_v2 = vrot.slane %v1293_v63, %v355_v35  ;;  %v2681_v35 = vld [vmem:[%s3865_s17 + $0x38] sm:$0xff]  }
 0x633   :  { %v1162_v7 = vmax.f32 %v1157_v4, 0.0  ;;  %v2440_v8 = vpop.f32.mrb[15].mxu0 }
 0x634   :  { %2456 = vmatpush3.bf16.msra.mxu1 %v2633_v3  ;;  %v1302_v3 = vrot.slane %v1293_v63, %v359_v42  ;;  %v2682_v42 = vld [vmem:[#allocation29] sm:$0xff]  }
 0x635   :  { %v1163_v9 = vpack.c.bf16 %v1162_v7, %v1162_v7  ;;  %2270 = vmatprep.subr.bf16.mxu1 %v2658_v26 }
 0x637   :  { %2458 = vmatmul.mubr.bf16.vlgmr.msra.gmra.mrb[12].mxu1 %v1163_v9 }
 0x638   :  { %2271 = vmatpush3.bf16.msra.mxu1 %v2659_v27 }
 0x639   :  { %2272 = vmatprep.subr.bf16.mxu1 %v2660_v28 }
 0x63c   :  { %2273 = vmatpush3.bf16.msra.mxu1 %v2661_v29  ;;  %v2689_v29 = vld [vmem:[#allocation29 + $0x38] sm:$0xff]  }
 0x63d   :  { %2274 = vmatprep.subr.bf16.mxu1 %v2662_v30  ;;  %v2690_v30 = vld [vmem:[#allocation31] sm:$0xff]  }
 0x640   :  { %2275 = vmatpush3.bf16.msra.mxu1 %v2663_v31  ;;  %v2691_v31 = vld [vmem:[#allocation31 + $0x8] sm:$0xff]  }
 0x641   :  { %2276 = vmatprep.subr.bf16.mxu1 %v2664_v32  ;;  %v2692_v32 = vld [vmem:[#allocation31 + $0x10] sm:$0xff]  }
 0x644   :  { %2277 = vmatpush3.bf16.msra.mxu1 %v2665_v37  ;;  %v2693_v37 = vld [vmem:[#allocation31 + $0x18] sm:$0xff]  }
 0x645   :  { %2278 = vmatprep.subr.bf16.mxu1 %v2666_v38  ;;  %v2694_v38 = vld [vmem:[#allocation31 + $0x20] sm:$0xff]  }
 0x648   :  { %2279 = vmatpush3.bf16.msra.mxu1 %v2667_v39  ;;  %v2695_v39 = vld [vmem:[#allocation31 + $0x28] sm:$0xff]  }
 0x649   :  { %2280 = vmatprep.subr.bf16.mxu1 %v2668_v41  ;;  %v2178_v41 = vld [vmem:[%s3872_s24] ss:$0 sm:$0xff] }
 0x64c   :  { %2281 = vmatpush3.bf16.msra.mxu1 %v2669_v43 }
 0x64d   :  { %2282 = vmatprep.subr.bf16.mxu1 %v2670_v54 }
 0x650   :  { %2283 = vmatpush3.bf16.msra.mxu1 %v2671_v55 }
 0x651   :  { %2284 = vmatprep.subr.bf16.mxu1 %v2672_v56 }
 0x654   :  { %2285 = vmatpush3.bf16.msra.mxu1 %v2673_v57 }
 0x655   :  { %2481 = vmatprep.subr.bf16.mxu1 %v3208_v1 }
 0x6ea   :  { %v3741_v44 = vpop.f32.mrb[8].mxu1 }
 0x6eb   :  { %v2419_v45 = vpop.f32.mrb[9].mxu1 }
 0x6ec   :  { %v1048_v46 = vpop.f32.mrb[10].mxu1 }
 0x6ed   :  { %v2420_v47 = vpop.f32.mrb[11].mxu1 }
 0x70a   :  { %v1269_v49 = vpop.f32.mrb[12].mxu1 }
 0x70b   :  { %v1270_v50 = vadd.f32 %v2136_v48, %v1269_v49  ;;  %v2459_v36 = vpop.f32.mrb[13].mxu1  ;;  %v2118_v48 = vld [vmem:[#allocation22] ss:$0 sm:$0xff] }
 0x70c   :  { %v1272_v51 = vpop.f32.mrb[14].mxu1 }
 0x70d   :  { %v1275_v52 = vmax.f32 %v1270_v50, 0.0  ;;  %v2460_v40 = vpop.f32.mrb[15].mxu1  ;;  %v1046_v51 = vadd.f32 %v2118_v48, %v3741_v44  ;;  %v2187_v44 = vld [vmem:[%s3873_s25] ss:$0 sm:$0xff] }
 0x70e   :  { %v2697_v40 = vld [vmem:[#allocation31 + $0x38] sm:$0xff]  }
 0x70f   :  { %v1276_v53 = vpack.c.bf16 %v1275_v52, %v1275_v52  ;;  %v2696_v52 = vld [vmem:[#allocation31 + $0x30] sm:$0xff]  }
 0x711   :  { %1418 = vmatmul.mubr.bf16.vlgmr.msra.gmra.mrb[16].mxu0 %v1276_v53  ;;  %v1945_v53 = vand.u32 127, %v353_v33 }
 0x712   :  { %2477 = vmatprep.mubr.msk.bf16.mxu0 %vm3209_vm0, %v3208_v1  ;;  %2462 = vmatpush3.bf16.msra.mxu0 %v2674_v58 }
 0x713   :  { %2463 = vmatprep.subr.bf16.mxu0 %v3208_v1  ;;  %vm1949_vm1 = vcmp.lt.s32.totalorder %v1945_v53, 4 }
 0x714   :  { %v2205_v54 = vsel %vm1949_vm1, 1.0, %v3208_v1 }
 0x716   :  { %2464 = vmatpush3.bf16.msra.mxu0 %v2675_v0 }
 0x717   :  { %2465 = vmatprep.subr.bf16.mxu0 %v3208_v1 }
 0x71a   :  { %2466 = vmatpush3.bf16.msra.mxu0 %v2676_v59 }
 0x71b   :  { %2467 = vmatprep.subr.bf16.mxu0 %v3208_v1 }
 0x71e   :  { %2468 = vmatpush3.bf16.msra.mxu0 %v2677_v60 }
 0x71f   :  { %2469 = vmatprep.subr.bf16.mxu0 %v3208_v1 }
 0x722   :  { %2470 = vmatpush3.bf16.msra.mxu0 %v2678_v61 }
 0x723   :  { %2471 = vmatprep.subr.bf16.mxu0 %v3208_v1 }
 0x726   :  { %2472 = vmatpush3.bf16.msra.mxu0 %v2679_v62 }
 0x727   :  { %2473 = vmatprep.subr.bf16.mxu0 %v3208_v1 }
 0x72a   :  { %2474 = vmatpush3.bf16.msra.mxu0 %v2680_v34 }
 0x72b   :  { %2475 = vmatprep.subr.bf16.mxu0 %v3208_v1 }
 0x72e   :  { %2476 = vmatpush3.bf16.msra.mxu0 %v2681_v35 }
 0x72f   :  { %2501 = vmatprep.subr.bf16.mxu0 %v3208_v1 }
 0x7e4   :  { %v1419_v4 = vpop.f32.mrb[16].mxu0 }
 0x7e5   :  { %v1420_v5 = vadd.f32 %v1419_v4, %v1298_v2  ;;  %v1421_v6 = vpop.f32.mrb[17].mxu0 }
 0x7e6   :  { %v1422_v7 = vadd.f32 %v1421_v6, %v1302_v3  ;;  %v1423_v8 = vpop.f32.mrb[18].mxu0 }
 0x7e7   :  { %v1426_v9 = vmax.f32 %v1420_v5, 0.0  ;;  %v1424_v10 = vpop.f32.mrb[19].mxu0 }
 0x7e8   :  { %v1427_v11 = vmax.f32 %v1422_v7, 0.0 }
 0x7e9   :  { %v1428_v13 = vpack.c.bf16 %v1426_v9, %v1426_v9 }
 0x7ea   :  { %v1429_v12 = vpack.c.bf16 %v1427_v11, %v1427_v11 }
 0x7ec   :  { %1597 = vmatprep.mubr.bf16.mxu1 %v1429_v12 }
 0x7ed   :  { %1598 = vmatmul.mubr.bf16.vlgmr.msra.gmra.mrb[16].mxu1 %v1428_v13 }
 0x7ee   :  { %2497 = vmatprep.mubr.msk.bf16.mxu1 %vm3209_vm0, %v3208_v1  ;;  %2482 = vmatpush3.bf16.msra.mxu1 %v2682_v42 }
 0x7ef   :  { %2483 = vmatprep.subr.bf16.mxu1 %v3208_v1 }
 0x7f2   :  { %2484 = vmatpush3.bf16.msra.mxu1 %v2683_v14 }
 0x7f3   :  { %2485 = vmatprep.subr.bf16.mxu1 %v3208_v1 }
 0x7f6   :  { %2486 = vmatpush3.bf16.msra.mxu1 %v2684_v15 }
 0x7f7   :  { %2487 = vmatprep.subr.bf16.mxu1 %v3208_v1 }
 0x7fa   :  { %2488 = vmatpush3.bf16.msra.mxu1 %v2685_v16 }
 0x7fb   :  { %2489 = vmatprep.subr.bf16.mxu1 %v3208_v1 }
 0x7fe   :  { %2490 = vmatpush3.bf16.msra.mxu1 %v2686_v17 }
 0x7ff   :  { %2491 = vmatprep.subr.bf16.mxu1 %v3208_v1 }
 0x802   :  { %2492 = vmatpush3.bf16.msra.mxu1 %v2687_v18 }
 0x803   :  { %2493 = vmatprep.subr.bf16.mxu1 %v3208_v1 }
 0x806   :  { %2494 = vmatpush3.bf16.msra.mxu1 %v2688_v19 }
 0x807   :  { %2495 = vmatprep.subr.bf16.mxu1 %v3208_v1 }
 0x80a   :  { %2496 = vmatpush3.bf16.msra.mxu1 %v2689_v29 }
 0x80b   :  { %2521 = vmatprep.subr.mxu1 %v3208_v1 }
 0x8c0   :  { %v2286_v20 = vpop.f32.mrb[16].mxu1 }
 0x8c1   :  { %v2287_v22 = vpop.f32.mrb[17].mxu1 }
 0x8c2   :  { %v2288_v23 = vadd.f32 %v2287_v22, %v2286_v20  ;;  %v2289_v24 = vpop.f32.mrb[18].mxu1 }
 0x8c3   :  { %v2290_v25 = vpop.f32.mrb[19].mxu1 }
 0x8c4   :  { %v1600_v26 = vadd.f32 %v2288_v23, %v2161_v21 }
 0x8c6   :  { %v1605_v27 = vmax.f32 %v1600_v26, 0.0 }
 0x8c8   :  { %v1606_v28 = vpack.c.bf16 %v1605_v27, %v1605_v27 }
 0x8ca   :  { %2478 = vmatmul.mubr.bf16.vlgmr.msra.gmra.mrb[20].mxu0 %v1606_v28 }
 0x8cb   :  { %2517 = vmatprep.mubr.msk.bf16.mxu0 %vm3209_vm0, %v3208_v1  ;;  %2502 = vmatpush3.bf16.msra.mxu0 %v2690_v30 }
 0x8cc   :  { %2503 = vmatprep.subr.bf16.mxu0 %v3208_v1 }
 0x8cf   :  { %2504 = vmatpush3.bf16.msra.mxu0 %v2691_v31 }
 0x8d0   :  { %2505 = vmatprep.subr.bf16.mxu0 %v3208_v1 }
 0x8d3   :  { %2506 = vmatpush3.bf16.msra.mxu0 %v2692_v32 }
 0x8d4   :  { %2507 = vmatprep.subr.bf16.mxu0 %v3208_v1 }
 0x8d7   :  { %2508 = vmatpush3.bf16.msra.mxu0 %v2693_v37 }
 0x8d8   :  { %2509 = vmatprep.subr.bf16.mxu0 %v3208_v1 }
 0x8db   :  { %2510 = vmatpush3.bf16.msra.mxu0 %v2694_v38 }
 0x8dc   :  { %2511 = vmatprep.subr.bf16.mxu0 %v3208_v1 }
 0x8df   :  { %2512 = vmatpush3.bf16.msra.mxu0 %v2695_v39 }
 0x8e0   :  { %2513 = vmatprep.subr.bf16.mxu0 %v3208_v1 }
 0x8e3   :  { %2514 = vmatpush3.bf16.msra.mxu0 %v2696_v52 }
 0x8e4   :  { %2515 = vmatprep.subr.bf16.mxu0 %v3208_v1 }
 0x8e7   :  { %2516 = vmatpush3.bf16.msra.mxu0 %v2697_v40 }
 0x99d   :  { %v1712_v43 = vpop.f32.mrb[20].mxu0 }
 0x99e   :  { %v1713_v45 = vadd.f32 %v2178_v41, %v1712_v43  ;;  %v2479_v46 = vpop.f32.mrb[21].mxu0 }
 0x99f   :  { %v1715_v47 = vpop.f32.mrb[22].mxu0 }
 0x9a0   :  { %v1718_v49 = vmax.f32 %v1713_v45, 0.0  ;;  %v2480_v50 = vpop.f32.mrb[23].mxu0 }
 0x9a2   :  { %v1719_v36 = vpack.c.bf16 %v1718_v49, %v1718_v49 }
 0x9a4   :  { %2498 = vmatmul.mubr.bf16.vlgmr.msra.gmra.mrb[20].mxu1 %v1719_v36 }
 0x9a5   :  { %2522 = vmatpush3.msra.mxu1 %v1046_v51  ;;  %2523 = vmatprep.mubr.msk.f32.mxu1 %vm3209_vm0, %v3208_v1 }
 0x9ac   :  { %2524 = vmatmul.mubr.msk.f32.vlgmr.msra.gmra.mrb[24].mxu1 %vm1952_vm2, %v2205_v54 }
 0xa77   :  { %v1825_v55 = vpop.f32.mrb[20].mxu1 }
 0xa78   :  { %v1826_v56 = vadd.f32 %v2187_v44, %v1825_v55  ;;  %v2499_v57 = vpop.f32.mrb[21].mxu1 }
 0xa79   :  { %v1828_v58 = vpop.f32.mrb[22].mxu1 }
 0xa7a   :  { %v1831_v0 = vmax.f32 %v1826_v56, 0.0  ;;  %v2500_v59 = vpop.f32.mrb[23].mxu1 }
 0xa7c   :  { %v1832_v60 = vpack.c.bf16 %v1831_v0, %v1831_v0 }
 0xa7e   :  { %2518 = vmatmul.mubr.bf16.vlgmr.msra.gmra.mrb[24].mxu0 %v1832_v60 }
 0xa7f   :  { %v2022_v61 = vpop.f32.mrb[24].mxu1 }
 0xa80   :  { %2026 = vst [vmem:[#allocation32] sm:$0x1] %v2022_v61  ;;  %v2525_v33 = vpop.f32.mrb[25].mxu1 }
 0xa81   :  { %3127 = shalt.err (!%p3124_p2)
}
 0xa82   :  { %s3925_s3 = sld [smem:[#allocation61_spill]] }
 0xa88   :  { %s3128_s21 = scalar_lea.hbm %s3925_s3, 16 }
 0xa89   :  { %p3129_p3 = scmp.ne.s32.totalorder %s3925_s3, %s3128_s21  ;;  %p3132_p4 = scmp.lt.u32.totalorder %s3128_s21, %s3925_s3 }
 0xa8b   :  { %p3134_p5 = pnand %p3132_p4, %p3129_p3 }
 0xa8d   :  { %3137 = shalt.err (!%p3134_p5)
}
 0xa8e   :  { %2037 = dma.vmem_to_hbm [thread:$0]  %s2035_s10, 16, %s3925_s3, [#allocation4]  }
 0xa8f   :  { %s3926_s6 = sld [smem:[#allocation60_spill]]  ;;  %s3211_s12 = smov [#allocation33]  }
 0xa90   :  { %s2044_s27 = sshll.u32 %s3211_s12, 4  ;;  %s2045_s27 = int_to_ptr.vmem [resolvable:$true] %s2044_s27 }
 0xa91   :  { %s3138_s0 = scalar_lea.vmem %s2045_s27, 128  ;;  %p3143_p7 = scmp.lt.s32.totalorder %s2045_s27, %s2045_s27 }
 0xa92   :  { %p3139_p6 = scmp.ne.s32.totalorder %s2045_s27, %s3138_s0  ;;  %p3144_p8 = scmp.lt.s32.totalorder %s3138_s0, %s3138_s0 }
 0xa94   :  { %p3145_p9 = por %p3144_p8, %p3143_p7 }
 0xa95   :  { %v2196_v1 = vld [vmem:[%s3926_s6] ss:$0 sm:$0xff] }
 0xa96   :  { %p3146_p10 = pnand %p3145_p9, %p3139_p6 }
 0xb51   :  { %v1938_v62 = vpop.f32.mrb[24].mxu0 }
 0xb52   :  { %v1939_v63 = vadd.f32 %v2196_v1, %v1938_v62  ;;  %v2519_v2 = vpop.f32.mrb[25].mxu0 }
 0xb53   :  { %v1941_v3 = vpop.f32.mrb[26].mxu0 }
 0xb54   :  { %2027 = vst [vmem:[#allocation33] sm:$0xff] %v1939_v63  ;;  %v2520_v4 = vpop.f32.mrb[27].mxu0 }
 0xb55   :  { %3149 = shalt.err (!%p3146_p10)
}
 0xb56   :  { %s3927_s4 = sld [smem:[#allocation62_spill]] }
 0xb5c   :  { %s3150_s18 = scalar_lea.hbm %s3927_s4, 128 }
 0xb5d   :  { %p3151_p11 = scmp.ne.s32.totalorder %s3927_s4, %s3150_s18  ;;  %p3154_p12 = scmp.lt.u32.totalorder %s3150_s18, %s3927_s4 }
 0xb5f   :  { %p3156_p13 = pnand %p3154_p12, %p3151_p11 }
 0xb61   :  { %3159 = shalt.err (!%p3156_p13)
}
 0xb62   :  { %2047 = dma.vmem_to_hbm [thread:$0]  %s2045_s27, 128, %s3927_s4, [#allocation34]  }
 0xb63   :  { %3180 = dma.done.wait [#allocation4], 16  }
 0xb64   :  { %3181 = vsyncadd [#allocation4], 4294967280 }
 0xb65   :  { %3182 = dma.done.wait [#allocation34], 128  }
 0xb66   :  { %3183 = vsyncadd [#allocation34], 4294967168 }
 0xb67   :  { %2054 = vsyncpa [#allocation3], 1 }
 0xb68   :  { %2055 = vsyncpa [#allocation6], 1 }
 0xb69   :  { %2056 = vsyncpa [#allocation9], 1 }
 0xb6a   :  { %2057 = vsyncpa [#allocation12], 1 }
 0xb6b   :  { %2058 = vsyncpa [#allocation15], 1 }
 0xb6c   :  { %2059 = vsyncpa [#allocation18], 1 }
 0xb6d   :  { %2060 = vsyncpa [#allocation21], 1 }
 0xb6e   :  { %2061 = vsyncpa [#allocation24], 1 }
 0xb6f   :  { %2062 = vsyncpa [#allocation27], 1 }
 0xb70   :  { %2063 = vsyncpa [#allocation30], 1 }
 0xb71   :  { %2064 = vsyncpa [#allocation4], 1 }
 0xb72   :  { %2065 = vsyncpa [#allocation34], 1 }

</bundles_post_ra>
